<compile_context>
chip_gen: v6e
topology: v6e:2x2x1
jax: 0.10.0
libtpu: 0.0.40
codegen_flags: <defaults>
</compile_context>

<pallas_src>
import jax
import jax.numpy as jnp
from jax.experimental import pallas as pl
from jax.experimental.pallas import tpu as pltpu

L = 14            # spatial length implied by nnBatch_Norm_2D(*, 14)
EPS = 1e-5        # BatchNorm eps
HP = jax.lax.Precision.HIGHEST


def _round_up(x, m):
    return ((x + m - 1) // m) * m


# ----------------------------------------------------------------------------
# Fused Pallas kernel: full TCNN conv stack + FC head for one batch tile
# ----------------------------------------------------------------------------
def _tcnn_fused_kernel(xf_ref, w1_ref, vecs_ref, w2_ref, w3_ref, fcw_ref, out_ref):
    f32 = jnp.float32
    bt = xf_ref.shape[0]

    # Conv1d(W -> 32, k=3, pad=1) as ONE matmul; output lanes are o*14 + l,
    # which is exactly BatchNorm1d(32*14)'s feature index.
    h = jnp.dot(xf_ref[...], w1_ref[...], preferred_element_type=f32, precision=HP)
    h = jnp.maximum(h + vecs_ref[0:1, :], 0.0)               # conv1 bias + ReLU
    h = h * vecs_ref[1:2, :] + vecs_ref[2:3, :]               # BN1 (eval) per-lane fold

    # permute -> MaxPool1d(17, stride=1) -> permute == sliding max over the 32
    # conv channels; one channel step == 14 lanes.  Log-doubling: 5 maxes.
    m = jnp.maximum(h[:, :-14], h[:, 14:])                    # window 2
    m = jnp.maximum(m[:, :-28], m[:, 28:])                    # window 4
    m = jnp.maximum(m[:, :-56], m[:, 56:])                    # window 8
    m = jnp.maximum(m[:, :-112], m[:, 112:])                  # window 16
    m = jnp.maximum(m[:, :224], m[:, 14:238])                 # window 17 -> (bt, 224)

    # Conv1d(16 -> 8, k=1) + ReLU (output lanes are o2*14 + l).
    h2 = jnp.dot(m, w2_ref[...], preferred_element_type=f32, precision=HP)
    h2 = jnp.maximum(h2 + vecs_ref[3:4, :112], 0.0)

    # BN2 (eval) + AvgPool1d(5) + Conv1d(4 -> 1) folded into one (112, 14) map.
    y3 = jnp.dot(h2, w3_ref[...], preferred_element_type=f32, precision=HP)
    y3 = jnp.maximum(y3 + vecs_ref[4:5, :14], 0.0)            # (bt, 14)

    # BN3 folded into FC1; Dropout is the identity in eval mode.
    z = jnp.dot(y3, fcw_ref[0:14, 0:16], preferred_element_type=f32, precision=HP)
    z = jnp.maximum(z + vecs_ref[5:6, :16], 0.0)              # (bt, 16)
    z = jnp.dot(z, fcw_ref[16:32, 0:8], preferred_element_type=f32, precision=HP)
    z = jnp.maximum(z + vecs_ref[6:7, :8], 0.0)               # (bt, 8)

    # Final Linear(8 -> 1) computed transposed so the store is a lane-dense
    # (1, bt) row instead of a masked 1-lane column.
    row = jnp.dot(fcw_ref[32:33, 0:8], z.T, preferred_element_type=f32, precision=HP)
    out_ref[...] = (row + vecs_ref[7:8, 0:1]).reshape(1, 1, bt)


# ----------------------------------------------------------------------------
# Parameter setup (deterministic, synthetic)
# ----------------------------------------------------------------------------
def init_params(key, window_size):
    ks = jax.random.split(key, 16)

    def u(k, shape, scale=0.2):
        return jax.random.uniform(k, shape, jnp.float32, -1.0, 1.0) * scale

    def bn(k, n):
        k1, k2, k3, k4 = jax.random.split(k, 4)
        gamma = 1.0 + u(k1, (n,), 0.1)
        beta = u(k2, (n,), 0.1)
        run_mean = u(k3, (n,), 0.1)
        run_var = 1.0 + jnp.abs(u(k4, (n,), 0.1))
        return gamma, beta, run_mean, run_var

    p = {
        "w_conv1": u(ks[0], (32, window_size, 3)), "b_conv1": u(ks[1], (32,)),
        "w_conv2": u(ks[2], (8, 16, 1)),           "b_conv2": u(ks[3], (8,)),
        "w_conv3": u(ks[4], (1, 4, 1)),            "b_conv3": u(ks[5], (1,)),
        "bn1": bn(ks[6], 32 * L),
        "bn2": bn(ks[7], 8 * L),
        "bn3": bn(ks[8], 1 * L),
        "w_fc1": u(ks[9], (16, 14)),  "b_fc1": u(ks[10], (16,)),
        "w_fc2": u(ks[11], (8, 16)),  "b_fc2": u(ks[12], (8,)),
        "w_fc3": u(ks[13], (1, 8)),   "b_fc3": u(ks[14], (1,)),
    }
    return p


def _bn_fold_vec(bn):
    # Eval-mode BatchNorm1d as a per-feature scale/shift (feature = c*14 + l).
    gamma, beta, rm, rv = bn
    s = gamma * jax.lax.rsqrt(rv + EPS)
    return s, beta - rm * s


def _pad_lanes(v, n):
    return jnp.pad(v, (0, n - v.shape[0]))


# ----------------------------------------------------------------------------
# Forward wrapper (parameter folding in plain JAX, hot path in one Pallas kernel)
# ----------------------------------------------------------------------------
def tcnn_base_forward(params, X):
    B, W, Lx = X.shape
    assert Lx == L and B >= 1

    # Batch tile: multiple of 8 sublanes, capped at 512 batches per grid step.
    # Per-step VMEM is only a few MiB (<< 16 MiB v5e scoped default), so no
    # vmem_limit override is needed; for B > 512 the grid has >=2 "parallel"
    # steps so both v7x TensorCores stay busy.
    B_tile = min(_round_up(B, 8), 512)
    Bp = _round_up(B, B_tile)
    T = Bp // B_tile

    # Streamed input: raw reshape, lanes = c*14 + l.  No transpose, no im2col.
    Xf = X.reshape(B, W * L).astype(jnp.float32)
    if Bp > B:
        Xf = jnp.pad(Xf, ((0, Bp - B), (0, 0)))

    # ---- Conv1d(W -> 32, k=3, pad=1) as a (W*14, 32*14) matrix -------------
    w1 = params["w_conv1"]                                    # (32, W, 3)
    l_in = jnp.arange(L)[:, None]
    l_out = jnp.arange(L)[None, :]
    kk = l_in - l_out + 1                                     # tap index k = l' - l + 1
    valid = ((kk >= 0) & (kk <= 2)).astype(jnp.float32)
    w1_sel = w1[:, :, jnp.clip(kk, 0, 2)] * valid[None, None]  # (32, W, 14, 14)
    W1big = jnp.transpose(w1_sel, (1, 2, 0, 3)).reshape(W * L, 32 * L)
    b1big = jnp.repeat(params["b_conv1"], L)                  # (448,)
    s1v, t1v = _bn_fold_vec(params["bn1"])                    # (448,)

    # ---- Conv1d(16 -> 8, k=1) as a (16*14, 8*14) matrix ---------------------
    w2m = params["w_conv2"][:, :, 0]                          # (8, 16)
    eye = jnp.eye(L, dtype=jnp.float32)
    W2big = (w2m.T[:, None, :, None] * eye[None, :, None, :]).reshape(16 * L, 8 * L)
    b2big = jnp.repeat(params["b_conv2"], L)                  # (112,)
    s2v, t2v = _bn_fold_vec(params["bn2"])                    # (112,)

    # ---- BN2 + AvgPool1d(5) + Conv1d(4 -> 1) folded into (112, 14) ----------
    #   coef[c] = (1/5) * sum_{j : j <= c <= j+4} w3[j]
    w3vec = params["w_conv3"][0, :, 0]                        # (4,)
    cidx = jnp.arange(8)[:, None]
    jidx = jnp.arange(4)[None, :]
    P = ((cidx >= jidx) & (cidx <= jidx + 4)).astype(jnp.float32) / 5.0
    coef = jnp.dot(P, w3vec, precision=HP)                    # (8,)
    W3eff = (jnp.repeat(coef, L) * s2v)[:, None] * jnp.tile(eye, (8, 1))  # (112, 14)
    b3eff = params["b_conv3"][0] + jnp.dot(coef, t2v.reshape(8, L), precision=HP)  # (14,)

    # ---- BN3 folded into FC1 -------------------------------------------------
    s3v, t3v = _bn_fold_vec(params["bn3"])                    # (14,)
    wfc1_eff = s3v[:, None] * params["w_fc1"].T               # (14, 16)
    bfc1_eff = jnp.dot(t3v, params["w_fc1"].T, precision=HP) + params["b_fc1"]  # (16,)

    # ---- pack all per-lane vectors into ONE (8, 448) resident buffer --------
    C1 = 32 * L
    vecs = jnp.stack([
        b1big, s1v, t1v,
        _pad_lanes(b2big, C1), _pad_lanes(b3eff, C1), _pad_lanes(bfc1_eff, C1),
        _pad_lanes(params["b_fc2"], C1), _pad_lanes(params["b_fc3"], C1),
    ], axis=0)                                                # (8, 448)

    # ---- pack the FC weights into ONE (40, 16) resident buffer --------------
    fcw = jnp.zeros((40, 16), jnp.float32)
    fcw = fcw.at[0:14, 0:16].set(wfc1_eff)
    fcw = fcw.at[16:32, 0:8].set(params["w_fc2"].T)
    fcw = fcw.at[32:33, 0:8].set(params["w_fc3"])

    def const(a):
        # Resident constant: block index never changes -> DMA'd once across grid.
        return pl.BlockSpec(a.shape, lambda i: (0,) * a.ndim)

    out = pl.pallas_call(
        _tcnn_fused_kernel,
        out_shape=jax.ShapeDtypeStruct((T, 1, B_tile), jnp.float32),
        grid=(T,),
        in_specs=[
            pl.BlockSpec((B_tile, W * L), lambda i: (i, 0)),  # streamed input tile
            const(W1big), const(vecs), const(W2big), const(W3eff), const(fcw),
        ],
        out_specs=pl.BlockSpec((1, 1, B_tile), lambda i: (i, 0, 0)),
        compiler_params=pltpu.CompilerParams(
            dimension_semantics=("parallel",)),
    )(Xf, W1big, vecs, W2big, W3eff, fcw)

    return out.reshape(Bp)[:B].reshape(B, 1)


# ----------------------------------------------------------------------------
# Pure-JAX reference (for correctness check)
# ----------------------------------------------------------------------------
def reference_forward(params, X):
    B = X.shape[0]
    X = X.astype(jnp.float32)

    def bn_eval(x3, bn):
        gamma, beta, rm, rv = bn
        flat = x3.reshape(B, -1)
        flat = (flat - rm) * jax.lax.rsqrt(rv + EPS) * gamma + beta
        return flat.reshape(x3.shape)

    w1, b1 = params["w_conv1"], params["b_conv1"]
    xpad = jnp.pad(X, ((0, 0), (0, 0), (1, 1)))
    y = b1[None, :, None] + sum(
        jnp.einsum('oc,bcl->bol', w1[:, :, k], xpad[:, :, k:k + L], precision=HP)
        for k in range(3))
    y = jax.nn.relu(y)
    y = bn_eval(y, params["bn1"])                                           # (B,32,14)
    y = jnp.max(jnp.stack([y[:, t:t + 16, :] for t in range(17)], 0), 0)    # (B,16,14)
    y = jnp.einsum('oc,bcl->bol', params["w_conv2"][:, :, 0], y, precision=HP) \
        + params["b_conv2"][None, :, None]
    y = jax.nn.relu(y)
    y = bn_eval(y, params["bn2"])                                           # (B,8,14)
    y = jnp.mean(jnp.stack([y[:, t:t + 4, :] for t in range(5)], 0), 0)     # (B,4,14)
    y = jnp.einsum('oc,bcl->bol', params["w_conv3"][:, :, 0], y, precision=HP) \
        + params["b_conv3"][None, :, None]
    y = jax.nn.relu(y)
    y = bn_eval(y, params["bn3"])                                           # (B,1,14)
    x = y.reshape(-1, L)
    x = jax.nn.relu(jnp.dot(x, params["w_fc1"].T, precision=HP) + params["b_fc1"])
    x = jax.nn.relu(jnp.dot(x, params["w_fc2"].T, precision=HP) + params["b_fc2"])
    return jnp.dot(x, params["w_fc3"].T, precision=HP) + params["b_fc3"]


if __name__ == "__main__":
    WINDOW_SIZE = 8
    B = 4
    key = jax.random.PRNGKey(0)
    kx, kp = jax.random.split(key)
    X = jax.random.normal(kx, (B, WINDOW_SIZE, L), jnp.float32)
    params = init_params(kp, WINDOW_SIZE)

    out = tcnn_base_forward(params, X)
    out = jax.block_until_ready(out)
    ref = reference_forward(params, X)

    assert out.shape == (B, 1), out.shape
    assert jnp.allclose(out, ref, rtol=1e-4, atol=1e-4), (out, ref)
    print("KERNEL_OK")
</pallas_src>

<mosaic_0001>
module attributes {stable_mosaic.version = 11 : i64} {
  func.func @_tcnn_fused_kernel(%arg0: i32, %arg1: memref<8x112xf32, #tpu.memory_space<vmem>>, %arg2: memref<112x448xf32, #tpu.memory_space<vmem>>, %arg3: memref<8x448xf32, #tpu.memory_space<vmem>>, %arg4: memref<224x112xf32, #tpu.memory_space<vmem>>, %arg5: memref<112x14xf32, #tpu.memory_space<vmem>>, %arg6: memref<40x16xf32, #tpu.memory_space<vmem>>, %arg7: memref<1x1x8xf32, #tpu.memory_space<vmem>>) attributes {dimension_semantics = [#tpu.dimension_semantics<parallel>], iteration_bounds = array<i64: 1>, scalar_prefetch = 0 : i64, scratch_operands = 0 : i64, tpu.core_type = #tpu.core_type<tc>, window_params = [{transform_indices = @transform_0, window_bounds = array<i64: 8, 112>}, {pipeline_mode = #tpu.pipeline_mode<synchronous>, transform_indices = @transform_1, window_bounds = array<i64: 112, 448>}, {pipeline_mode = #tpu.pipeline_mode<synchronous>, transform_indices = @transform_2, window_bounds = array<i64: 8, 448>}, {pipeline_mode = #tpu.pipeline_mode<synchronous>, transform_indices = @transform_3, window_bounds = array<i64: 224, 112>}, {pipeline_mode = #tpu.pipeline_mode<synchronous>, transform_indices = @transform_4, window_bounds = array<i64: 112, 14>}, {pipeline_mode = #tpu.pipeline_mode<synchronous>, transform_indices = @transform_5, window_bounds = array<i64: 40, 16>}, {transform_indices = @transform_6, window_bounds = array<i64: 1, 1, 8>}]} {
    %c0 = arith.constant 0 : index
    %c0_0 = arith.constant 0 : index
    %0 = vector.load %arg1[%c0, %c0_0] : memref<8x112xf32, #tpu.memory_space<vmem>>, vector<8x112xf32>
    %c0_1 = arith.constant 0 : index
    %c0_2 = arith.constant 0 : index
    %1 = vector.load %arg2[%c0_1, %c0_2] : memref<112x448xf32, #tpu.memory_space<vmem>>, vector<112x448xf32>
    %cst = arith.constant dense<0.000000e+00> : vector<8x448xf32>
    %2 = tpu.matmul %0, %1, %cst {dimension_numbers = #tpu.dot_dimension_numbers<[1], [0], [0], [1], [0, 0, 1, 1], [], []>, precision = #tpu.contract_precision<fp32>} : vector<8x112xf32>, vector<112x448xf32>, vector<8x448xf32> -> vector<8x448xf32>
    %c0_3 = arith.constant 0 : index
    %c0_4 = arith.constant 0 : index
    %3 = vector.load %arg3[%c0_3, %c0_4] : memref<8x448xf32, #tpu.memory_space<vmem>>, vector<1x448xf32>
    %4 = vector.broadcast %3 : vector<1x448xf32> to vector<8x448xf32>
    %5 = arith.addf %2, %4 : vector<8x448xf32>
    %cst_5 = arith.constant 0.000000e+00 : f32
    %6 = vector.broadcast %cst_5 : f32 to vector<8x448xf32>
    %7 = arith.maximumf %5, %6 : vector<8x448xf32>
    %c1 = arith.constant 1 : index
    %c0_6 = arith.constant 0 : index
    %8 = vector.load %arg3[%c1, %c0_6] : memref<8x448xf32, #tpu.memory_space<vmem>>, vector<1x448xf32>
    %9 = vector.broadcast %8 : vector<1x448xf32> to vector<8x448xf32>
    %10 = arith.mulf %7, %9 : vector<8x448xf32>
    %c2 = arith.constant 2 : index
    %c0_7 = arith.constant 0 : index
    %11 = vector.load %arg3[%c2, %c0_7] : memref<8x448xf32, #tpu.memory_space<vmem>>, vector<1x448xf32>
    %12 = vector.broadcast %11 : vector<1x448xf32> to vector<8x448xf32>
    %13 = arith.addf %10, %12 : vector<8x448xf32>
    %14 = vector.extract_strided_slice %13 {offsets = [0, 0], sizes = [8, 434], strides = [1, 1]} : vector<8x448xf32> to vector<8x434xf32>
    %15 = vector.extract_strided_slice %13 {offsets = [0, 14], sizes = [8, 434], strides = [1, 1]} : vector<8x448xf32> to vector<8x434xf32>
    %16 = arith.maximumf %14, %15 : vector<8x434xf32>
    %17 = vector.extract_strided_slice %16 {offsets = [0, 0], sizes = [8, 406], strides = [1, 1]} : vector<8x434xf32> to vector<8x406xf32>
    %18 = vector.extract_strided_slice %16 {offsets = [0, 28], sizes = [8, 406], strides = [1, 1]} : vector<8x434xf32> to vector<8x406xf32>
    %19 = arith.maximumf %17, %18 : vector<8x406xf32>
    %20 = vector.extract_strided_slice %19 {offsets = [0, 0], sizes = [8, 350], strides = [1, 1]} : vector<8x406xf32> to vector<8x350xf32>
    %21 = vector.extract_strided_slice %19 {offsets = [0, 56], sizes = [8, 350], strides = [1, 1]} : vector<8x406xf32> to vector<8x350xf32>
    %22 = arith.maximumf %20, %21 : vector<8x350xf32>
    %23 = vector.extract_strided_slice %22 {offsets = [0, 0], sizes = [8, 238], strides = [1, 1]} : vector<8x350xf32> to vector<8x238xf32>
    %24 = vector.extract_strided_slice %22 {offsets = [0, 112], sizes = [8, 238], strides = [1, 1]} : vector<8x350xf32> to vector<8x238xf32>
    %25 = arith.maximumf %23, %24 : vector<8x238xf32>
    %26 = vector.extract_strided_slice %25 {offsets = [0, 0], sizes = [8, 224], strides = [1, 1]} : vector<8x238xf32> to vector<8x224xf32>
    %27 = vector.extract_strided_slice %25 {offsets = [0, 14], sizes = [8, 224], strides = [1, 1]} : vector<8x238xf32> to vector<8x224xf32>
    %28 = arith.maximumf %26, %27 : vector<8x224xf32>
    %c0_8 = arith.constant 0 : index
    %c0_9 = arith.constant 0 : index
    %29 = vector.load %arg4[%c0_8, %c0_9] : memref<224x112xf32, #tpu.memory_space<vmem>>, vector<224x112xf32>
    %cst_10 = arith.constant dense<0.000000e+00> : vector<8x112xf32>
    %30 = tpu.matmul %28, %29, %cst_10 {dimension_numbers = #tpu.dot_dimension_numbers<[1], [0], [0], [1], [0, 0, 1, 1], [], []>, precision = #tpu.contract_precision<fp32>} : vector<8x224xf32>, vector<224x112xf32>, vector<8x112xf32> -> vector<8x112xf32>
    %c3 = arith.constant 3 : index
    %c0_11 = arith.constant 0 : index
    %31 = vector.load %arg3[%c3, %c0_11] : memref<8x448xf32, #tpu.memory_space<vmem>>, vector<1x112xf32>
    %32 = vector.broadcast %31 : vector<1x112xf32> to vector<8x112xf32>
    %33 = arith.addf %30, %32 : vector<8x112xf32>
    %cst_12 = arith.constant 0.000000e+00 : f32
    %34 = vector.broadcast %cst_12 : f32 to vector<8x112xf32>
    %35 = arith.maximumf %33, %34 : vector<8x112xf32>
    %c0_13 = arith.constant 0 : index
    %c0_14 = arith.constant 0 : index
    %36 = vector.load %arg5[%c0_13, %c0_14] : memref<112x14xf32, #tpu.memory_space<vmem>>, vector<112x14xf32>
    %cst_15 = arith.constant dense<0.000000e+00> : vector<8x14xf32>
    %37 = tpu.matmul %35, %36, %cst_15 {dimension_numbers = #tpu.dot_dimension_numbers<[1], [0], [0], [1], [0, 0, 1, 1], [], []>, precision = #tpu.contract_precision<fp32>} : vector<8x112xf32>, vector<112x14xf32>, vector<8x14xf32> -> vector<8x14xf32>
    %c4 = arith.constant 4 : index
    %c0_16 = arith.constant 0 : index
    %38 = vector.load %arg3[%c4, %c0_16] : memref<8x448xf32, #tpu.memory_space<vmem>>, vector<1x14xf32>
    %39 = vector.broadcast %38 : vector<1x14xf32> to vector<8x14xf32>
    %40 = arith.addf %37, %39 : vector<8x14xf32>
    %cst_17 = arith.constant 0.000000e+00 : f32
    %41 = vector.broadcast %cst_17 : f32 to vector<8x14xf32>
    %42 = arith.maximumf %40, %41 : vector<8x14xf32>
    %c0_18 = arith.constant 0 : index
    %c0_19 = arith.constant 0 : index
    %43 = vector.load %arg6[%c0_18, %c0_19] : memref<40x16xf32, #tpu.memory_space<vmem>>, vector<14x16xf32>
    %cst_20 = arith.constant dense<0.000000e+00> : vector<8x16xf32>
    %44 = tpu.matmul %42, %43, %cst_20 {dimension_numbers = #tpu.dot_dimension_numbers<[1], [0], [0], [1], [0, 0, 1, 1], [], []>, precision = #tpu.contract_precision<fp32>} : vector<8x14xf32>, vector<14x16xf32>, vector<8x16xf32> -> vector<8x16xf32>
    %c5 = arith.constant 5 : index
    %c0_21 = arith.constant 0 : index
    %45 = vector.load %arg3[%c5, %c0_21] : memref<8x448xf32, #tpu.memory_space<vmem>>, vector<1x16xf32>
    %46 = vector.broadcast %45 : vector<1x16xf32> to vector<8x16xf32>
    %47 = arith.addf %44, %46 : vector<8x16xf32>
    %cst_22 = arith.constant 0.000000e+00 : f32
    %48 = vector.broadcast %cst_22 : f32 to vector<8x16xf32>
    %49 = arith.maximumf %47, %48 : vector<8x16xf32>
    %c16 = arith.constant 16 : index
    %c0_23 = arith.constant 0 : index
    %50 = vector.load %arg6[%c16, %c0_23] : memref<40x16xf32, #tpu.memory_space<vmem>>, vector<16x8xf32>
    %cst_24 = arith.constant dense<0.000000e+00> : vector<8x8xf32>
    %51 = tpu.matmul %49, %50, %cst_24 {dimension_numbers = #tpu.dot_dimension_numbers<[1], [0], [0], [1], [0, 0, 1, 1], [], []>, precision = #tpu.contract_precision<fp32>} : vector<8x16xf32>, vector<16x8xf32>, vector<8x8xf32> -> vector<8x8xf32>
    %c6 = arith.constant 6 : index
    %c0_25 = arith.constant 0 : index
    %52 = vector.load %arg3[%c6, %c0_25] : memref<8x448xf32, #tpu.memory_space<vmem>>, vector<1x8xf32>
    %53 = vector.broadcast %52 : vector<1x8xf32> to vector<8x8xf32>
    %54 = arith.addf %51, %53 : vector<8x8xf32>
    %cst_26 = arith.constant 0.000000e+00 : f32
    %55 = vector.broadcast %cst_26 : f32 to vector<8x8xf32>
    %56 = arith.maximumf %54, %55 : vector<8x8xf32>
    %c32 = arith.constant 32 : index
    %c0_27 = arith.constant 0 : index
    %57 = vector.load %arg6[%c32, %c0_27] : memref<40x16xf32, #tpu.memory_space<vmem>>, vector<1x8xf32>
    %58 = tpu.transpose %56, [1, 0] : vector<8x8xf32> -> vector<8x8xf32>
    %cst_28 = arith.constant dense<0.000000e+00> : vector<1x8xf32>
    %59 = tpu.matmul %57, %58, %cst_28 {dimension_numbers = #tpu.dot_dimension_numbers<[1], [0], [0], [1], [0, 0, 1, 1], [], []>, precision = #tpu.contract_precision<fp32>} : vector<1x8xf32>, vector<8x8xf32>, vector<1x8xf32> -> vector<1x8xf32>
    %c7 = arith.constant 7 : index
    %c0_29 = arith.constant 0 : index
    %60 = vector.load %arg3[%c7, %c0_29] : memref<8x448xf32, #tpu.memory_space<vmem>>, vector<1x1xf32>
    %61 = vector.broadcast %60 : vector<1x1xf32> to vector<1x8xf32>
    %62 = arith.addf %59, %61 : vector<1x8xf32>
    %63 = vector.shape_cast %62 : vector<1x8xf32> to vector<1x1x8xf32>
    %c0_30 = arith.constant 0 : index
    %c0_31 = arith.constant 0 : index
    %c0_32 = arith.constant 0 : index
    %64 = vector.load %arg7[%c0_30, %c0_31, %c0_32] : memref<1x1x8xf32, #tpu.memory_space<vmem>>, vector<1x1x8xf32>
    tpu.vector_store %arg7[%c0_30, %c0_31, %c0_32], %63 {strides = array<i32>} : memref<1x1x8xf32, #tpu.memory_space<vmem>>, vector<1x1x8xf32>,
    return
  }
  func.func @transform_0(%arg0: i32) -> (i32, i32) {
    %c0_i32 = arith.constant 0 : i32
    %c0_i32_0 = arith.constant 0 : i32
    return %arg0, %c0_i32 : i32, i32
  }
  func.func @transform_1(%arg0: i32) -> (i32, i32) {
    %c0_i32 = arith.constant 0 : i32
    %c0_i32_0 = arith.constant 0 : i32
    %c0_i32_1 = arith.constant 0 : i32
    return %c0_i32, %c0_i32_0 : i32, i32
  }
  func.func @transform_2(%arg0: i32) -> (i32, i32) {
    %c0_i32 = arith.constant 0 : i32
    %c0_i32_0 = arith.constant 0 : i32
    %c0_i32_1 = arith.constant 0 : i32
    return %c0_i32, %c0_i32_0 : i32, i32
  }
  func.func @transform_3(%arg0: i32) -> (i32, i32) {
    %c0_i32 = arith.constant 0 : i32
    %c0_i32_0 = arith.constant 0 : i32
    %c0_i32_1 = arith.constant 0 : i32
    return %c0_i32, %c0_i32_0 : i32, i32
  }
  func.func @transform_4(%arg0: i32) -> (i32, i32) {
    %c0_i32 = arith.constant 0 : i32
    %c0_i32_0 = arith.constant 0 : i32
    %c0_i32_1 = arith.constant 0 : i32
    return %c0_i32, %c0_i32_0 : i32, i32
  }
  func.func @transform_5(%arg0: i32) -> (i32, i32) {
    %c0_i32 = arith.constant 0 : i32
    %c0_i32_0 = arith.constant 0 : i32
    %c0_i32_1 = arith.constant 0 : i32
    return %c0_i32, %c0_i32_0 : i32, i32
  }
  func.func @transform_6(%arg0: i32) -> (i32, i32, i32) {
    %c0_i32 = arith.constant 0 : i32
    %c0_i32_0 = arith.constant 0 : i32
    %c0_i32_1 = arith.constant 0 : i32
    return %arg0, %c0_i32, %c0_i32_0 : i32, i32, i32
  }
}

</mosaic_0001>

<bundles_post_ra>
// kernel: tpu_custom_call.1
= control target key start
LH: loop header
LB: loop body
LE: loop exit
PB: predicated region body
PF: predicated region fallthrough
CT: control target
= control target key end

     0   :  { %11 = vsyncpa [#allocation3], 0  ;;  %s7478_s0 = inlined_call_operand.vmem [shape: f32[8,112], index: 0, kind: input, shape index: {}]   ;;  %s7479_s1 = inlined_call_operand.hbm [shape: f32[112,448], index: 1, kind: input, shape index: {}]   ;;  %s7480_s2 = inlined_call_operand.vmem [shape: f32[8,448], index: 2, kind: input, shape index: {}]   ;;  %s7481_s3 = inlined_call_operand.hbm [shape: f32[224,112], index: 3, kind: input, shape index: {}]   ;;  %s7482_s4 = inlined_call_operand.vmem [shape: f32[112,14], index: 4, kind: input, shape index: {}]   ;;  %s7483_s5 = inlined_call_operand.vmem [shape: f32[40,16], index: 5, kind: input, shape index: {}]   ;;  %s7484_s6 = inlined_call_operand.hbm [shape: f32[1,1,8], index: 6, kind: output, shape index: {}]  }
   0x1   :  { %12 = vsyncpa [#allocation6], 0 }
   0x2   :  { %13 = vsyncpa [#allocation4], 0  ;;  %s5311_s21 = smov [#allocation2]  }
   0x3   :  { %s21_s22 = sshll.u32 %s5311_s21, 4  ;;  %s22_s22 = int_to_ptr.vmem [resolvable:$true] %s21_s22 }
   0x4   :  { %s5253_s23 = scalar_lea.vmem %s22_s22, 7168  ;;  %p5258_p1 = scmp.lt.s32.totalorder %s22_s22, %s22_s22 }
   0x5   :  { %p5254_p0 = scmp.ne.s32.totalorder %s22_s22, %s5253_s23  ;;  %p5259_p2 = scmp.lt.s32.totalorder %s5253_s23, %s5253_s23 }
   0x7   :  { %p5260_p3 = por %p5259_p2, %p5258_p1 }
   0x9   :  { %p5261_p4 = pnand %p5260_p3, %p5254_p0 }
   0xb   :  { %5264 = shalt.err (!%p5261_p4)
}
   0xc   :  { %s5312_s24 = smov 512   ;;  %s5313_s25 = smov 32  }
   0xd   :  { %27 = dma.hbm_to_vmem [thread:$0]  %s7479_s1, 7168, %s22_s22, [#allocation3], %s5312_s24, %s5312_s24, %s5313_s25  }
   0xe   :  { %s5314_s28 = smov [#allocation5]  }
   0xf   :  { %s35_s29 = sshll.u32 %s5314_s28, 4  ;;  %s36_s29 = int_to_ptr.vmem [resolvable:$true] %s35_s29 }
  0x10   :  { %s5273_s30 = scalar_lea.vmem %s36_s29, 3584  ;;  %p5278_p6 = scmp.lt.s32.totalorder %s36_s29, %s36_s29 }
  0x11   :  { %p5274_p5 = scmp.ne.s32.totalorder %s36_s29, %s5273_s30  ;;  %p5279_p7 = scmp.lt.s32.totalorder %s5273_s30, %s5273_s30 }
  0x13   :  { %p5280_p8 = por %p5279_p7, %p5278_p6 }
  0x15   :  { %p5281_p9 = pnand %p5280_p8, %p5274_p5 }
  0x17   :  { %5284 = shalt.err (!%p5281_p9)
}
  0x18   :  { %s5315_s7 = smov 128   ;;  %s5316_s8 = smov 8  }
  0x19   :  { %41 = dma.hbm_to_vmem [thread:$0]  %s7481_s3, 3584, %s36_s29, [#allocation6], %s5315_s7, %s5315_s7, %s5316_s8  }
  0x1a   :  { %5305 = dma.done.wait [#allocation3], 7168  }
  0x1b   :  { %5306 = vsyncadd [#allocation3], 4294960128 }
  0x1c   :  { %5307 = dma.done.wait [#allocation6], 3584  }
  0x1d   :  { %5308 = vsyncadd [#allocation6], 4294963712  ;;  %v7499_v0 = vmov 0.0   ;;  %v106_v1 = vld [vmem:[#allocation2 + $0x1a8] sm:$0xff]  ;;  %v105_v2 = vld [vmem:[#allocation2 + $0x1a0] sm:$0xff]  ;;  %vm131_vm0 = vcmask 916480  }
  0x1e   :  { %227 = vmatprep.mubr.f32.mxu0 %v7499_v0  ;;  %443 = vmatprep.mubr.f32.mxu1 %v7499_v0  ;;  %v102_v3 = vld [vmem:[#allocation2 + $0x188] sm:$0xff]  ;;  %v5368_v4 = vand.u32 4294901760, %v106_v1  ;;  %v5370_v5 = vand.u32 4294901760, %v105_v2  ;;  %v101_v7 = vld [vmem:[#allocation2 + $0x180] sm:$0xff]  ;;  %s5318_s16 = smov 114   ;;  %vm1811_vm1 = vcmask 932864  }
  0x1f   :  { %v5372_v6 = vand.u32 4294901760, %v102_v3  ;;  %v98_v8 = vld [vmem:[#allocation2 + $0x168] sm:$0xff]  ;;  %v97_v9 = vld [vmem:[#allocation2 + $0x160] sm:$0xff]  ;;  %v5374_v10 = vand.u32 4294901760, %v101_v7  ;;  %s5319_s17 = smov 100   ;;  %vm1835_vm2 = vcmask 818176  }
  0x20   :  { %v5376_v11 = vand.u32 4294901760, %v98_v8  ;;  %v5378_v12 = vand.u32 4294901760, %v97_v9  ;;  %v94_v13 = vld [vmem:[#allocation2 + $0x148] sm:$0xff]  ;;  %v93_v14 = vld [vmem:[#allocation2 + $0x140] sm:$0xff]  ;;  %140 = vmatprep.subr.mxu0 %v5368_v4  ;;  %v5388_v19 = vsub.f32 %v106_v1, %v5368_v4  ;;  %v5401_v24 = vsub.f32 %v105_v2, %v5370_v5  ;;  %s5320_s18 = smov 72   ;;  %s5321_s19 = smov 16  }
  0x21   :  { %v90_v15 = vld [vmem:[#allocation2 + $0x128] sm:$0xff]  ;;  %v5381_v16 = vand.u32 4294901760, %v94_v13  ;;  %v5383_v17 = vand.u32 4294901760, %v93_v14  ;;  %v5390_v20 = vld [vmem:[#allocation2 + $0x120] sm:$0xff]  ;;  %142 = vmatpush1.msra.mxu0 %v5370_v5  ;;  %v5407_v26 = vsub.f32 %v102_v3, %v5372_v6  ;;  %v5421_v32 = vsub.f32 %v101_v7, %v5374_v10 }
  0x22   :  { %v5385_v18 = vand.u32 4294901760, %v90_v15  ;;  %v5392_v21 = vld [vmem:[#allocation2 + $0x108] sm:$0xff]  ;;  %v5394_v22 = vld [vmem:[#allocation2 + $0x100] sm:$0xff]  ;;  %v5398_v23 = vand.u32 4294901760, %v5390_v20  ;;  %144 = vmatprep.subr.mxu0 %v5372_v6  ;;  %v7497_v30 = vand.u32 4294901760, %v5388_v19  ;;  %v7496_v34 = vand.u32 4294901760, %v5401_v24 }
  0x23   :  { %v5404_v25 = vand.u32 4294901760, %v5392_v21  ;;  %v5409_v27 = vld [vmem:[#allocation2 + $0xe8] sm:$0xff]  ;;  %v5411_v28 = vld [vmem:[#allocation2 + $0xe0] sm:$0xff]  ;;  %v5418_v31 = vand.u32 4294901760, %v5394_v22  ;;  %146 = vmatpush1.msra.mxu0 %v5374_v10  ;;  %v7494_v35 = vand.u32 4294901760, %v5407_v26  ;;  %v5430_v36 = vsub.f32 %v98_v8, %v5376_v11 }
  0x24   :  { %v5413_v29 = vld [vmem:[#allocation2 + $0xc8] sm:$0xff]  ;;  %v5424_v33 = vand.u32 4294901760, %v5409_v27  ;;  %v5433_v37 = vand.u32 4294901760, %v5411_v28  ;;  %v5435_v38 = vld [vmem:[#allocation2 + $0xc0] sm:$0xff]  ;;  %148 = vmatprep.subr.mxu0 %v5376_v11  ;;  %v246_v39 = vsub.f32 %v5388_v19, %v7497_v30  ;;  %v7492_v40 = vand.u32 4294901760, %v5421_v32 }
  0x25   :  { %v5443_v41 = vsub.f32 %v97_v9, %v5378_v12  ;;  %v5446_v42 = vand.u32 4294901760, %v5413_v29  ;;  %150 = vmatpush1.msra.mxu0 %v5378_v12  ;;  %v252_v43 = vsub.f32 %v5401_v24, %v7496_v34  ;;  %v258_v44 = vsub.f32 %v5407_v26, %v7494_v35  ;;  %v5459_v47 = vld [vmem:[#allocation2 + $0xa8] sm:$0xff]  ;;  %v5469_v52 = vld [vmem:[#allocation2 + $0xa0] sm:$0xff] }
  0x26   :  { %v7491_v45 = vand.u32 4294901760, %v5430_v36  ;;  %v5457_v46 = vsub.f32 %v94_v13, %v5381_v16  ;;  %152 = vmatprep.subr.mxu0 %v5381_v16  ;;  %v247_v48 = vand.u32 4294901760, %v246_v39  ;;  %v264_v49 = vsub.f32 %v5421_v32, %v7492_v40  ;;  %v5476_v57 = vld [vmem:[#allocation2 + $0x88] sm:$0xff]  ;;  %v5488_v62 = vld [vmem:[#allocation2 + $0x80] sm:$0xff] }
  0x27   :  { %v7489_v50 = vand.u32 4294901760, %v5443_v41  ;;  %v5467_v51 = vand.u32 4294901760, %v5435_v38  ;;  %154 = vmatpush1.msra.mxu0 %v5383_v17  ;;  %v253_v53 = vand.u32 4294901760, %v252_v43  ;;  %v259_v54 = vand.u32 4294901760, %v258_v44  ;;  %v5500_v7 = vld [vmem:[#allocation2 + $0x68] sm:$0xff]  ;;  %v5601_v34 = vld [vmem:[#allocation2] sm:$0xff] }
  0x28   :  { %v270_v55 = vsub.f32 %v5430_v36, %v7491_v45  ;;  %v7487_v56 = vand.u32 4294901760, %v5457_v46  ;;  %156 = vmatprep.subr.mxu0 %v5385_v18  ;;  %248 = vmatprep.subr.mxu1 %v247_v48  ;;  %v265_v58 = vand.u32 4294901760, %v264_v49  ;;  %v5483_v60 = vsub.f32 %v93_v14, %v5383_v17  ;;  %v5578_v45 = vld [vmem:[#allocation2 + $0x20] sm:$0xff]  ;;  %v5591_v35 = vld [vmem:[#allocation2 + $0x8] sm:$0xff] }
  0x29   :  { %v276_v59 = vsub.f32 %v5443_v41, %v7489_v50  ;;  %v5486_v61 = vand.u32 4294901760, %v5459_v47  ;;  %158 = vmatpush1.msra.mxu0 %v5398_v23  ;;  %254 = vmatpush1.msra.mxu1 %v253_v53  ;;  %v5495_v2 = vsub.f32 %v90_v15, %v5385_v18  ;;  %v5498_v3 = vand.u32 4294901760, %v5469_v52  ;;  %v5511_v15 = vld [vmem:[#allocation2 + $0x60] sm:$0xff] }
  0x2a   :  { %v271_v63 = vand.u32 4294901760, %v270_v55  ;;  %v282_v1 = vsub.f32 %v5457_v46, %v7487_v56  ;;  %160 = vmatprep.subr.mxu0 %v5404_v25  ;;  %260 = vmatprep.subr.mxu1 %v259_v54  ;;  %v7486_v9 = vand.u32 4294901760, %v5483_v60  ;;  %v5506_v13 = vsub.f32 %v5390_v20, %v5398_v23 }
  0x2b   :  { %7610 = vst [vmem:[#allocation11_spill] sm:$0xff] %v5486_v61  ;;  %7611 = vst [vmem:[#allocation12_spill] sm:$0xff] %v5498_v3  ;;  %v277_v8 = vand.u32 4294901760, %v276_v59  ;;  %v5509_v14 = vand.u32 4294901760, %v5476_v57  ;;  %162 = vmatpush1.msra.mxu0 %v5418_v31  ;;  %266 = vmatpush1.msra.mxu1 %v265_v58  ;;  %v7485_v43 = vand.u32 4294901760, %v5495_v2  ;;  %v5517_v44 = vsub.f32 %v5392_v21, %v5404_v25  ;;  %v5534_v21 = vld [vmem:[#allocation2 + $0x48] sm:$0xff] }
  0x2c   :  { %v283_v39 = vand.u32 4294901760, %v282_v1  ;;  %v5520_v48 = vand.u32 4294901760, %v5488_v62  ;;  %164 = vmatprep.subr.mxu0 %v5424_v33  ;;  %272 = vmatprep.subr.mxu1 %v271_v63  ;;  %v288_v20 = vsub.f32 %v5483_v60, %v7486_v9  ;;  %v7488_v49 = vand.u32 4294901760, %v5506_v13  ;;  %v5557_v9 = vld [vmem:[#allocation2 + $0x40] sm:$0xff] }
  0x2d   :  { %7612 = vst [vmem:[#allocation13_spill] sm:$0xff] %v5509_v14  ;;  %v5529_v53 = vsub.f32 %v5394_v22, %v5418_v31  ;;  %v5532_v54 = vand.u32 4294901760, %v5500_v7  ;;  %166 = vmatpush1.msra.mxu0 %v5433_v37  ;;  %278 = vmatpush1.msra.mxu1 %v277_v8  ;;  %v294_v55 = vsub.f32 %v5495_v2, %v7485_v43  ;;  %v7490_v58 = vand.u32 4294901760, %v5517_v44 }
  0x2e   :  { %7613 = vst [vmem:[#allocation14_spill] sm:$0xff] %v5520_v48  ;;  %v5543_v59 = vsub.f32 %v5409_v27, %v5424_v33  ;;  %v5546_v22 = vand.u32 4294901760, %v5511_v15  ;;  %168 = vmatprep.subr.mxu0 %v5446_v42  ;;  %284 = vmatprep.subr.mxu1 %v283_v39  ;;  %v289_v63 = vand.u32 4294901760, %v288_v20  ;;  %v300_v1 = vsub.f32 %v5506_v13, %v7488_v49  ;;  %v5567_v49 = vld [vmem:[#allocation2 + $0x28] sm:$0xff] }
  0x2f   :  { %7614 = vst [vmem:[#allocation15_spill] sm:$0xff] %v5532_v54  ;;  %v7493_v8 = vand.u32 4294901760, %v5529_v53  ;;  %v5555_v43 = vsub.f32 %v5411_v28, %v5433_v37  ;;  %170 = vmatpush1.msra.mxu0 %v5467_v51  ;;  %v295_v27 = vand.u32 4294901760, %v294_v55  ;;  %v306_v39 = vsub.f32 %v5517_v44, %v7490_v58 }
  0x30   :  { %7615 = vst [vmem:[#allocation16_spill] sm:$0xff] %v5546_v22  ;;  %v7495_v20 = vand.u32 4294901760, %v5543_v59  ;;  %v5565_v56 = vand.u32 4294901760, %v5534_v21  ;;  %290 = vmatpush1.msra.mxu1 %v289_v63  ;;  %172 = vmatprep.subr.mxu0 %v5486_v61  ;;  %v301_v28 = vand.u32 4294901760, %v300_v1  ;;  %v5576_v58 = vsub.f32 %v5413_v29, %v5446_v42 }
  0x31   :  { %v312_v50 = vsub.f32 %v5529_v53, %v7493_v8  ;;  %v7498_v55 = vand.u32 4294901760, %v5555_v43  ;;  %296 = vmatprep.subr.mxu1 %v295_v27  ;;  %174 = vmatpush1.msra.mxu0 %v5498_v3  ;;  %v307_v40 = vand.u32 4294901760, %v306_v39  ;;  %v5585_v1 = vand.u32 4294901760, %v5557_v9 }
  0x32   :  { %7616 = vst [vmem:[#allocation17_spill] sm:$0xff] %v5565_v56  ;;  %v318_v63 = vsub.f32 %v5543_v59, %v7495_v20  ;;  %v5589_v8 = vsub.f32 %v5435_v38, %v5467_v51  ;;  %302 = vmatpush1.msra.mxu1 %v301_v28  ;;  %176 = vmatprep.subr.mxu0 %v5509_v14  ;;  %v7501_v39 = vand.u32 4294901760, %v5576_v58  ;;  %v5599_v20 = vand.u32 4294901760, %v5567_v49 }
  0x33   :  { %v313_v29 = vand.u32 4294901760, %v312_v50  ;;  %v324_v27 = vsub.f32 %v5555_v43, %v7498_v55  ;;  %308 = vmatprep.subr.mxu1 %v307_v40  ;;  %178 = vmatpush1.msra.mxu0 %v5520_v48  ;;  %v5607_v50 = vsub.f32 %v5459_v47, %v5486_v61  ;;  %v5610_v30 = vand.u32 4294901760, %v5578_v45  ;;  %v52_v47 = vld [vmem:[%s7478_s0] sm:$0xff] }
  0x34   :  { %v319_v38 = vand.u32 4294901760, %v318_v63  ;;  %v7506_v28 = vand.u32 4294901760, %v5589_v8  ;;  %180 = vmatprep.subr.mxu0 %v5532_v54  ;;  %v330_v40 = vsub.f32 %v5576_v58, %v7501_v39  ;;  %v5618_v63 = vsub.f32 %v5469_v52, %v5498_v3 }
  0x35   :  { %314 = vmatpush1.msra.mxu1 %v313_v29  ;;  %v325_v55 = vand.u32 4294901760, %v324_v27  ;;  %v5621_v0 = vand.u32 4294901760, %v5591_v35  ;;  %182 = vmatpush1.msra.mxu0 %v5546_v22  ;;  %v7514_v27 = vand.u32 4294901760, %v5607_v50  ;;  %v5633_v52 = vsub.f32 %v5476_v57, %v5509_v14 }
  0x36   :  { %320 = vmatprep.subr.mxu1 %v319_v38  ;;  %v336_v29 = vsub.f32 %v5589_v8, %v7506_v28  ;;  %v5636_v39 = vand.u32 4294901760, %v5601_v34  ;;  %184 = vmatprep.subr.mxu0 %v5565_v56  ;;  %v331_v3 = vand.u32 4294901760, %v330_v40  ;;  %v7513_v38 = vand.u32 4294901760, %v5618_v63 }
  0x37   :  { %7617 = vst [vmem:[#allocation18_spill] sm:$0xff] %v5621_v0  ;;  %326 = vmatpush1.msra.mxu1 %v325_v55  ;;  %v5642_v61 = vsub.f32 %v5488_v62, %v5520_v48  ;;  %v5646_v28 = vsub.f32 %v5500_v7, %v5532_v54  ;;  %186 = vmatpush1.msra.mxu0 %v5585_v1  ;;  %v7515_v14 = vand.u32 4294901760, %v5633_v52  ;;  %v133_v40 = vsel %vm131_vm0, %v52_v47, 0 }
  0x38   :  { %v337_v57 = vand.u32 4294901760, %v336_v29  ;;  %v342_v55 = vsub.f32 %v5607_v50, %v7514_v27  ;;  %332 = vmatprep.subr.mxu1 %v331_v3  ;;  %188 = vmatprep.subr.mxu0 %v5599_v20  ;;  %v348_v62 = vsub.f32 %v5618_v63, %v7513_v38  ;;  %v5660_v29 = vand.u32 4294901760, %v133_v40 }
  0x39   :  { %v7518_v7 = vand.u32 4294901760, %v5642_v61  ;;  %v7523_v54 = vand.u32 4294901760, %v5646_v28  ;;  %190 = vmatpush1.msra.mxu0 %v5610_v30  ;;  %v354_v3 = vsub.f32 %v5633_v52, %v7515_v14  ;;  %v5668_v47 = vsub.f32 %v5511_v15, %v5546_v22 }
  0x3a   :  { %338 = vmatpush1.msra.mxu1 %v337_v57  ;;  %v343_v48 = vand.u32 4294901760, %v342_v55  ;;  %v5672_v38 = vsub.f32 %v5534_v21, %v5565_v56  ;;  %v349_v27 = vand.u32 4294901760, %v348_v62  ;;  %192 = vmatprep.subr.mxu0 %v5621_v0  ;;  %v5682_v14 = vsub.f32 %v133_v40, %v5660_v29 }
  0x3b   :  { %v360_v57 = vsub.f32 %v5642_v61, %v7518_v7  ;;  %v366_v55 = vsub.f32 %v5646_v28, %v7523_v54  ;;  %v355_v15 = vand.u32 4294901760, %v354_v3  ;;  %194 = vmatpush1.msra.mxu0 %v5636_v39  ;;  %v7521_v21 = vand.u32 4294901760, %v5668_v47 }
  0x3c   :  { %7618 = vst [vmem:[#allocation19_spill] sm:$0xff] %v5682_v14  ;;  %344 = vmatprep.subr.mxu1 %v343_v48  ;;  %v7522_v62 = vand.u32 4294901760, %v5672_v38  ;;  %v5689_v56 = vsub.f32 %v5557_v9, %v5585_v1  ;;  %457 = vmatprep.subr.mxu0 %v5388_v19  ;;  %v5693_v40 = vand.u32 4294901760, %v5682_v14  ;;  %v5697_v48 = vsub.f32 %v5567_v49, %v5599_v20 }
  0x3d   :  { %350 = vmatpush1.msra.mxu1 %v349_v27  ;;  %v361_v7 = vand.u32 4294901760, %v360_v57  ;;  %v367_v22 = vand.u32 4294901760, %v366_v55  ;;  %v372_v3 = vsub.f32 %v5668_v47, %v7521_v21  ;;  %v5708_v57 = vsub.f32 %v5578_v45, %v5610_v30 }
  0x3e   :  { %7619 = vst [vmem:[#allocation20_spill] sm:$0xff] %v5693_v40  ;;  %356 = vmatprep.subr.mxu1 %v355_v15  ;;  %v378_v9 = vsub.f32 %v5672_v38, %v7522_v62  ;;  %v383_v27 = vand.u32 4294901760, %v5689_v56  ;;  %v231_v49 = vsub.f32 %v5682_v14, %v5693_v40  ;;  %v7528_v55 = vand.u32 4294901760, %v5697_v48 }
  0x3f   :  { %362 = vmatpush1.msra.mxu1 %v361_v7  ;;  %v5715_v15 = vsub.f32 %v5591_v35, %v5621_v0  ;;  %v5719_v21 = vsub.f32 %v5601_v34, %v5636_v39  ;;  %v373_v62 = vand.u32 4294901760, %v372_v3  ;;  %v7529_v7 = vand.u32 4294901760, %v5708_v57 }
  0x40   :  { %368 = vmatprep.subr.mxu1 %v367_v22  ;;  %v379_v54 = vand.u32 4294901760, %v378_v9  ;;  %v384_v45 = vsub.f32 %v5689_v56, %v383_v27  ;;  %v5725_v40 = vand.u32 4294901760, %v231_v49  ;;  %v390_v35 = vsub.f32 %v5697_v48, %v7528_v55 }
  0x41   :  { %v7531_v0 = vand.u32 4294901760, %v5715_v15  ;;  %v7530_v34 = vand.u32 4294901760, %v5719_v21  ;;  %374 = vmatpush1.msra.mxu1 %v373_v62  ;;  %v396_v3 = vsub.f32 %v5708_v57, %v7529_v7  ;;  %vm1859_vm3 = vcmask 588800  }
  0x42   :  { %v385_v22 = vand.u32 4294901760, %v384_v45  ;;  %233 = vmatmul.mubr.f32.vlgmr.msra.gmra.mxu0 %v5725_v40  ;;  %380 = vmatprep.subr.mxu1 %v379_v54  ;;  %v391_v9 = vand.u32 4294901760, %v390_v35  ;;  %v7620_v54 = vld [vmem:[#allocation11_spill] sm:$0xff]  ;;  %v7623_v35 = vmov 0.0   ;;  %vm1878_vm4 = vcmask 130048  }
  0x43   :  { %v402_v49 = vsub.f32 %v5715_v15, %v7531_v0  ;;  %v408_v55 = vsub.f32 %v5719_v21, %v7530_v34  ;;  %460 = vmatpush1.msra.mxu0 %v5401_v24  ;;  %v397_v62 = vand.u32 4294901760, %v396_v3  ;;  %571 = vmatprep.mubr.f32.mxu0 %v7623_v35  ;;  %v7625_v3 = vld [vmem:[#allocation15_spill] sm:$0xff]  ;;  %v7630_v34 = vand.u32 4294901760, %v5407_v26 }
  0x44   :  { %386 = vmatpush1.msra.mxu1 %v385_v22  ;;  %463 = vmatprep.subr.mxu0 %v5407_v26  ;;  %v7624_v22 = vld [vmem:[#allocation14_spill] sm:$0xff]  ;;  %v7631_v0 = vand.u32 4294901760, %v5421_v32  ;;  %v7635_v26 = vand.u32 4294901760, %v5457_v46  ;;  %vm1925_vm5 = vcmask 785408   ;;  %vm5322_vm6 = vmmov 0  }
  0x45   :  { %392 = vmatprep.subr.mxu1 %v391_v9  ;;  %v403_v45 = vand.u32 4294901760, %v402_v49  ;;  %v409_v7 = vand.u32 4294901760, %v408_v55  ;;  %466 = vmatpush1.msra.mxu0 %v5421_v32  ;;  %v7621_v55 = vld [vmem:[#allocation12_spill] sm:$0xff]  ;;  %v7626_v9 = vand.u32 4294901760, %v5388_v19  ;;  %v7632_v19 = vand.u32 4294901760, %v5430_v36 }
  0x46   :  { %398 = vmatpush1.msra.mxu1 %v397_v62  ;;  %469 = vmatprep.subr.mxu0 %v5430_v36  ;;  %v7627_v49 = vld [vmem:[#allocation16_spill] sm:$0xff]  ;;  %v7628_v62 = vand.u32 4294901760, %v5401_v24  ;;  %v7633_v24 = vand.u32 4294901760, %v5443_v41  ;;  %v7638_v36 = vand.u32 4294901760, %v5495_v2  ;;  %vm3381_vm7 = vcmask 1045504  }
  0x47   :  { %404 = vmatprep.subr.mxu1 %v403_v45  ;;  %472 = vmatpush1.msra.mxu0 %v5443_v41  ;;  %v7629_v45 = vld [vmem:[#allocation17_spill] sm:$0xff]  ;;  %v7637_v32 = vld [vmem:[#allocation20_spill] sm:$0xff]  ;;  %v7639_v41 = vand.u32 4294901760, %v5506_v13  ;;  %vm3377_vm8 = vcmask 113664   ;;  %vm4318_vm9 = vcmask 64512   ;;  %vm4771_vm10 = vcmask 57344  }
  0x48   :  { %410 = vmatpush1.msra.mxu1 %v409_v7  ;;  %475 = vmatprep.subr.mxu0 %v5457_v46  ;;  %v7622_v7 = vld [vmem:[#allocation13_spill] sm:$0xff]  ;;  %v7640_v46 = vand.u32 4294901760, %v5517_v44 }
  0x49   :  { %445 = vmatmul.mubr.f32.vlgmr.msra.gmra.mxu1 %v5660_v29  ;;  %478 = vmatpush1.msra.mxu0 %v5483_v60 }
  0x4a   :  { %585 = vmatprep.subr.mxu1 %v5368_v4  ;;  %481 = vmatprep.subr.mxu0 %v5495_v2  ;;  %v7642_v2 = vand.u32 4294901760, %v5543_v59 }
  0x4b   :  { %587 = vmatpush1.msra.mxu1 %v5370_v5  ;;  %484 = vmatpush1.msra.mxu0 %v5506_v13  ;;  %v7643_v13 = vand.u32 4294901760, %v5555_v43 }
  0x4c   :  { %589 = vmatprep.subr.mxu1 %v5372_v6  ;;  %487 = vmatprep.subr.mxu0 %v5517_v44 }
  0x4d   :  { %591 = vmatpush1.msra.mxu1 %v5374_v10  ;;  %490 = vmatpush1.msra.mxu0 %v5529_v53 }
  0x4e   :  { %593 = vmatprep.subr.mxu1 %v5376_v11  ;;  %493 = vmatprep.subr.mxu0 %v5543_v59  ;;  %v104_v59 = vld [vmem:[#allocation2 + $0x198] sm:$0xff] }
  0x4f   :  { %595 = vmatpush1.msra.mxu1 %v5378_v12  ;;  %496 = vmatpush1.msra.mxu0 %v5555_v43  ;;  %v7647_v43 = vand.u32 4294901760, %v5618_v63 }
  0x50   :  { %597 = vmatprep.subr.mxu1 %v5381_v16  ;;  %499 = vmatprep.subr.mxu0 %v5576_v58 }
  0x51   :  { %599 = vmatpush1.msra.mxu1 %v5383_v17  ;;  %502 = vmatpush1.msra.mxu0 %v5589_v8 }
  0x52   :  { %601 = vmatprep.subr.mxu1 %v5385_v18  ;;  %505 = vmatprep.subr.mxu0 %v5607_v50 }
  0x53   :  { %603 = vmatpush1.msra.mxu1 %v5398_v23  ;;  %508 = vmatpush1.msra.mxu0 %v5618_v63  ;;  %v95_v63 = vld [vmem:[#allocation2 + $0x150] sm:$0xff] }
  0x54   :  { %605 = vmatprep.subr.mxu1 %v5404_v25  ;;  %511 = vmatprep.subr.mxu0 %v5633_v52 }
  0x55   :  { %607 = vmatpush1.msra.mxu1 %v5418_v31  ;;  %514 = vmatpush1.msra.mxu0 %v5642_v61 }
  0x56   :  { %609 = vmatprep.subr.mxu1 %v5424_v33  ;;  %517 = vmatprep.subr.mxu0 %v5646_v28 }
  0x57   :  { %611 = vmatpush1.msra.mxu1 %v5433_v37  ;;  %520 = vmatpush1.msra.mxu0 %v5668_v47 }
  0x58   :  { %613 = vmatprep.subr.mxu1 %v5446_v42  ;;  %523 = vmatprep.subr.mxu0 %v5672_v38 }
  0x59   :  { %615 = vmatpush1.msra.mxu1 %v5467_v51  ;;  %526 = vmatpush1.msra.mxu0 %v5689_v56  ;;  %v7657_v56 = vand.u32 4294901760, %v5708_v57 }
  0x5a   :  { %617 = vmatprep.subr.mxu1 %v7620_v54  ;;  %529 = vmatprep.subr.mxu0 %v5697_v48 }
  0x5b   :  { %619 = vmatpush1.msra.mxu1 %v7621_v55  ;;  %532 = vmatpush1.msra.mxu0 %v5708_v57  ;;  %v7661_v57 = vand.u32 4294901760, %v5719_v21 }
  0x5c   :  { %621 = vmatprep.subr.mxu1 %v7622_v7  ;;  %535 = vmatprep.subr.mxu0 %v5715_v15 }
  0x5d   :  { %538 = vmatpush1.msra.mxu0 %v5719_v21  ;;  %623 = vmatpush1.msra.mxu1 %v7624_v22 }
  0x5e   :  { %574 = vmatmul.mubr.f32.vlgmr.msra.gmra.mxu0 %v5682_v14  ;;  %625 = vmatprep.subr.mxu1 %v7625_v3  ;;  %v63_v14 = vld [vmem:[#allocation2 + $0x50] sm:$0xff] }
  0x5f   :  { %689 = vmatprep.subr.mxu0 %v7626_v9  ;;  %627 = vmatpush1.msra.mxu1 %v7627_v49  ;;  %v7634_v9 = vld [vmem:[#allocation18_spill] sm:$0xff] }
  0x60   :  { %693 = vmatpush1.msra.mxu0 %v7628_v62  ;;  %629 = vmatprep.subr.mxu1 %v7629_v45  ;;  %v5856_v62 = vand.u32 4294901760, %v104_v59 }
  0x61   :  { %697 = vmatprep.subr.mxu0 %v7630_v34  ;;  %631 = vmatpush1.msra.mxu1 %v5585_v1  ;;  %v108_v34 = vld [vmem:[#allocation2 + $0x1b8] sm:$0xff] }
  0x62   :  { %701 = vmatpush1.msra.mxu0 %v7631_v0  ;;  %633 = vmatprep.subr.mxu1 %v5599_v20  ;;  %v7636_v0 = vand.u32 4294901760, %v5483_v60  ;;  %v7641_v60 = vand.u32 4294901760, %v5529_v53  ;;  %v5841_v44 = vand.u32 4294901760, %v108_v34 }
  0x63   :  { %705 = vmatprep.subr.mxu0 %v7632_v19  ;;  %635 = vmatpush1.msra.mxu1 %v5610_v30 }
  0x64   :  { %709 = vmatpush1.msra.mxu0 %v7633_v24  ;;  %637 = vmatprep.subr.mxu1 %v7634_v9  ;;  %v5867_v19 = vsub.f32 %v108_v34, %v5841_v44 }
  0x65   :  { %713 = vmatprep.subr.mxu0 %v7635_v26  ;;  %639 = vmatpush1.msra.mxu1 %v5636_v39  ;;  %v92_v26 = vld [vmem:[#allocation2 + $0x138] sm:$0xff] }
  0x66   :  { %672 = vmatprep.mubr.f32.mxu1 %v7623_v35  ;;  %717 = vmatpush1.msra.mxu0 %v7636_v0  ;;  %v7652_v0 = vand.u32 4294901760, %v5672_v38 }
  0x67   :  { %676 = vmatmul.mubr.f32.vlgmr.msra.gmra.mxu1 %v7637_v32  ;;  %721 = vmatprep.subr.mxu0 %v7638_v36  ;;  %v5886_v36 = vsub.f32 %v104_v59, %v5856_v62 }
  0x68   :  { %843 = vmatprep.subr.mxu1 %v5368_v4  ;;  %725 = vmatpush1.msra.mxu0 %v7639_v41  ;;  %v107_v4 = vld [vmem:[#allocation2 + $0x1b0] sm:$0xff] }
  0x69   :  { %845 = vmatpush1.msra.mxu1 %v5370_v5  ;;  %729 = vmatprep.subr.mxu0 %v7640_v46  ;;  %v7644_v5 = vand.u32 4294901760, %v5576_v58  ;;  %v5843_v53 = vand.u32 4294901760, %v107_v4  ;;  %v100_v58 = vld [vmem:[#allocation2 + $0x178] sm:$0xff]  ;;  %v87_v41 = vld [vmem:[#allocation2 + $0x110] sm:$0xff]  ;;  %v7655_v46 = vand.u32 4294901760, %v5697_v48 }
  0x6a   :  { %847 = vmatprep.subr.mxu1 %v5372_v6  ;;  %733 = vmatpush1.msra.mxu0 %v7641_v60  ;;  %v103_v6 = vld [vmem:[#allocation2 + $0x190] sm:$0xff]  ;;  %v5901_v60 = vand.u32 4294901760, %v92_v26 }
  0x6b   :  { %849 = vmatpush1.msra.mxu1 %v5374_v10  ;;  %737 = vmatprep.subr.mxu0 %v7642_v2  ;;  %v7645_v10 = vand.u32 4294901760, %v5589_v8  ;;  %v7648_v8 = vand.u32 4294901760, %v5633_v52  ;;  %v5872_v52 = vand.u32 4294901760, %v100_v58  ;;  %v88_v2 = vld [vmem:[#allocation2 + $0x118] sm:$0xff] }
  0x6c   :  { %851 = vmatprep.subr.mxu1 %v5376_v11  ;;  %741 = vmatpush1.msra.mxu0 %v7643_v13  ;;  %v7646_v11 = vand.u32 4294901760, %v5607_v50  ;;  %7656 = vst [vmem:[#allocation13_spill] sm:$0xff] %v5901_v60  ;;  %v5919_v13 = vand.u32 4294901760, %v87_v41  ;;  %v5940_v21 = vand.u32 4294901760, %v88_v2  ;;  %v5944_v59 = vsub.f32 %v92_v26, %v5901_v60  ;;  %v75_v26 = vld [vmem:[#allocation2 + $0xb0] sm:$0xff] }
  0x6d   :  { %853 = vmatpush1.msra.mxu1 %v5378_v12  ;;  %745 = vmatprep.subr.mxu0 %v7644_v5  ;;  %v99_v12 = vld [vmem:[#allocation2 + $0x170] sm:$0xff]  ;;  %v84_v5 = vld [vmem:[#allocation2 + $0xf8] sm:$0xff] }
  0x6e   :  { %855 = vmatprep.subr.mxu1 %v5381_v16  ;;  %749 = vmatpush1.msra.mxu0 %v7645_v10  ;;  %v5851_v16 = vand.u32 4294901760, %v103_v6  ;;  %v5864_v50 = vand.u32 4294901760, %v99_v12  ;;  %7660 = vst [vmem:[#allocation15_spill] sm:$0xff] %v5919_v13  ;;  %7662 = vst [vmem:[#allocation16_spill] sm:$0xff] %v5940_v21 }
  0x6f   :  { %857 = vmatpush1.msra.mxu1 %v5383_v17  ;;  %753 = vmatprep.subr.mxu0 %v7646_v11  ;;  %v7649_v17 = vand.u32 4294901760, %v5642_v61  ;;  %v7651_v61 = vand.u32 4294901760, %v5668_v47 }
  0x70   :  { %859 = vmatprep.subr.mxu1 %v5385_v18  ;;  %757 = vmatpush1.msra.mxu0 %v7647_v43  ;;  %v5862_v18 = vsub.f32 %v107_v4, %v5843_v53  ;;  %v5878_v24 = vsub.f32 %v103_v6, %v5851_v16  ;;  %v7537_v4 = vand.u32 4294901760, %v5886_v36  ;;  %v80_v43 = vld [vmem:[#allocation2 + $0xd8] sm:$0xff] }
  0x71   :  { %861 = vmatpush1.msra.mxu1 %v5398_v23  ;;  %761 = vmatprep.subr.mxu0 %v7648_v8  ;;  %v7650_v23 = vand.u32 4294901760, %v5646_v28  ;;  %v91_v28 = vld [vmem:[#allocation2 + $0x130] sm:$0xff]  ;;  %v5968_v8 = vand.u32 4294901760, %v84_v5 }
  0x72   :  { %863 = vmatprep.subr.mxu1 %v5404_v25  ;;  %765 = vmatpush1.msra.mxu0 %v7649_v17  ;;  %v96_v25 = vld [vmem:[#allocation2 + $0x158] sm:$0xff]  ;;  %v7539_v38 = vand.u32 4294901760, %v5862_v18  ;;  %v7535_v34 = vand.u32 4294901760, %v5878_v24  ;;  %v79_v17 = vld [vmem:[#allocation2 + $0xd0] sm:$0xff] }
  0x73   :  { %865 = vmatpush1.msra.mxu1 %v5418_v31  ;;  %769 = vmatprep.subr.mxu0 %v7650_v23  ;;  %v5883_v31 = vand.u32 4294901760, %v95_v63  ;;  %v5894_v47 = vand.u32 4294901760, %v96_v25  ;;  %7664 = vst [vmem:[#allocation18_spill] sm:$0xff] %v5968_v8 }
  0x74   :  { %867 = vmatprep.subr.mxu1 %v5424_v33  ;;  %773 = vmatpush1.msra.mxu0 %v7651_v61  ;;  %v5892_v33 = vsub.f32 %v99_v12, %v5864_v50  ;;  %v5954_v12 = vsub.f32 %v5878_v24, %v7535_v34 }
  0x75   :  { %869 = vmatpush1.msra.mxu1 %v5433_v37  ;;  %777 = vmatprep.subr.mxu0 %v7652_v0  ;;  %7653 = vst [vmem:[#allocation11_spill] sm:$0xff] %v5883_v31  ;;  %7654 = vst [vmem:[#allocation12_spill] sm:$0xff] %v5894_v47  ;;  %v7540_v37 = vand.u32 4294901760, %v5867_v19  ;;  %v5916_v48 = vsub.f32 %v95_v63, %v5883_v31  ;;  %v5936_v10 = vsub.f32 %v96_v25, %v5894_v47 }
  0x76   :  { %871 = vmatprep.subr.mxu1 %v5446_v42  ;;  %781 = vmatpush1.msra.mxu0 %v383_v27  ;;  %v5904_v42 = vsub.f32 %v100_v58, %v5872_v52  ;;  %v5909_v27 = vand.u32 4294901760, %v91_v28  ;;  %v7532_v6 = vand.u32 4294901760, %v5892_v33  ;;  %v5963_v58 = vsub.f32 %v5886_v36, %v7537_v4  ;;  %v68_v4 = vld [vmem:[#allocation2 + $0x78] sm:$0xff] }
  0x77   :  { %873 = vmatpush1.msra.mxu1 %v5467_v51  ;;  %785 = vmatprep.subr.mxu0 %v7655_v46  ;;  %v7659_v51 = vand.u32 4294901760, %v5715_v15  ;;  %v5932_v15 = vsub.f32 %v5862_v18, %v7539_v38  ;;  %v7533_v63 = vand.u32 4294901760, %v5916_v48  ;;  %v7536_v61 = vand.u32 4294901760, %v5936_v10 }
  0x78   :  { %875 = vmatprep.subr.mxu1 %v7620_v54  ;;  %789 = vmatpush1.msra.mxu0 %v7657_v56  ;;  %7658 = vst [vmem:[#allocation14_spill] sm:$0xff] %v5909_v27  ;;  %v83_v54 = vld [vmem:[#allocation2 + $0xf0] sm:$0xff]  ;;  %v5949_v11 = vsub.f32 %v91_v28, %v5909_v27  ;;  %v5978_v25 = vsub.f32 %v5892_v33, %v7532_v6  ;;  %v5988_v0 = vand.u32 4294901760, %v80_v43  ;;  %v76_v28 = vld [vmem:[#allocation2 + $0xb8] sm:$0xff]  ;;  %v1068_v56 = vand.u32 4294901760, %v5954_v12 }
  0x79   :  { %877 = vmatpush1.msra.mxu1 %v7621_v55  ;;  %793 = vmatprep.subr.mxu0 %v7659_v51  ;;  %v5927_v55 = vsub.f32 %v5867_v19, %v7540_v37  ;;  %v5992_v46 = vsub.f32 %v88_v2, %v5940_v21  ;;  %v6000_v51 = vand.u32 4294901760, %v79_v17  ;;  %v1062_v2 = vand.u32 4294901760, %v5963_v58 }
  0x7a   :  { %879 = vmatprep.subr.mxu1 %v7622_v7  ;;  %797 = vmatpush1.msra.mxu0 %v7661_v57  ;;  %v7534_v7 = vand.u32 4294901760, %v5904_v42  ;;  %7665 = vst [vmem:[#allocation21_spill] sm:$0xff] %v5988_v0  ;;  %v7541_v57 = vand.u32 4294901760, %v5949_v11  ;;  %v1080_v6 = vand.u32 4294901760, %v5978_v25  ;;  %v6022_v58 = vand.u32 4294901760, %v76_v28  ;;  %v64_v25 = vld [vmem:[#allocation2 + $0x58] sm:$0xff] }
  0x7b   :  { %830 = vmatprep.mubr.f32.mxu0 %v7623_v35  ;;  %881 = vmatpush1.msra.mxu1 %v7624_v22  ;;  %v5956_v22 = vand.u32 4294901760, %v83_v54  ;;  %v1050_v23 = vand.u32 4294901760, %v5927_v55  ;;  %7666 = vst [vmem:[#allocation22_spill] sm:$0xff] %v6000_v51  ;;  %v71_v55 = vld [vmem:[#allocation2 + $0x90] sm:$0xff]  ;;  %v6068_v32 = vand.u32 4294901760, %v68_v4 }
  0x7c   :  { %832 = vmatmul.mubr.f32.vlgmr.msra.gmra.mxu0 %v5660_v29  ;;  %883 = vmatprep.subr.mxu1 %v7625_v3  ;;  %v5966_v3 = vsub.f32 %v87_v41, %v5919_v13  ;;  %v7538_v41 = vand.u32 4294901760, %v5944_v59  ;;  %7667 = vst [vmem:[#allocation23_spill] sm:$0xff] %v6022_v58 }
  0x7d   :  { %7663 = vst [vmem:[#allocation17_spill] sm:$0xff] %v5956_v22  ;;  %943 = vmatprep.subr.mxu0 %v5841_v44  ;;  %885 = vmatpush1.msra.mxu1 %v7627_v49  ;;  %v1056_v49 = vand.u32 4294901760, %v5932_v15  ;;  %v6011_v15 = vand.u32 4294901760, %v75_v26 }
  0x7e   :  { %945 = vmatpush1.msra.mxu0 %v5843_v53  ;;  %887 = vmatprep.subr.mxu1 %v7629_v45  ;;  %v5986_v45 = vsub.f32 %v5904_v42, %v7534_v7  ;;  %v7543_v12 = vand.u32 4294901760, %v5966_v3  ;;  %v67_v7 = vld [vmem:[#allocation2 + $0x70] sm:$0xff] }
  0x7f   :  { %947 = vmatprep.subr.mxu0 %v5856_v62  ;;  %889 = vmatpush1.msra.mxu1 %v5585_v1  ;;  %v5998_v1 = vsub.f32 %v83_v54, %v5956_v22  ;;  %v72_v54 = vld [vmem:[#allocation2 + $0x98] sm:$0xff]  ;;  %v6057_v37 = vsub.f32 %v75_v26, %v6011_v15  ;;  %v6072_v26 = vsub.f32 %v76_v28, %v6022_v58 }
  0x80   :  { %949 = vmatpush1.msra.mxu0 %v5851_v16  ;;  %891 = vmatprep.subr.mxu1 %v5599_v20  ;;  %v6009_v20 = vsub.f32 %v5916_v48, %v7533_v63  ;;  %v6025_v63 = vsub.f32 %v84_v5, %v5968_v8  ;;  %v1074_v34 = vand.u32 4294901760, %v5986_v45  ;;  %v6041_v5 = vsub.f32 %v79_v17, %v6000_v51 }
  0x81   :  { %951 = vmatprep.subr.mxu0 %v5872_v52  ;;  %893 = vmatpush1.msra.mxu1 %v5610_v30  ;;  %v6020_v30 = vsub.f32 %v5936_v10, %v7536_v61  ;;  %v6036_v61 = vand.u32 4294901760, %v71_v55  ;;  %v6048_v45 = vand.u32 4294901760, %v72_v54  ;;  %v6062_v17 = vsub.f32 %v5966_v3, %v7543_v12 }
  0x82   :  { %953 = vmatpush1.msra.mxu0 %v5864_v50  ;;  %895 = vmatprep.subr.mxu1 %v7634_v9  ;;  %v6033_v9 = vsub.f32 %v5944_v59, %v7538_v41  ;;  %v6051_v41 = vsub.f32 %v80_v43, %v5988_v0  ;;  %v1092_v38 = vand.u32 4294901760, %v6009_v20  ;;  %v7669_v20 = vand.u32 4294901760, %v6025_v63 }
  0x83   :  { %955 = vmatprep.subr.mxu0 %v5894_v47  ;;  %897 = vmatpush1.msra.mxu1 %v5636_v39  ;;  %v6046_v39 = vsub.f32 %v5949_v11, %v7541_v57  ;;  %v6064_v57 = vand.u32 4294901760, %v67_v7  ;;  %v1086_v43 = vand.u32 4294901760, %v6020_v30  ;;  %v56_v30 = vld [vmem:[#allocation2 + $0x18] sm:$0xff] }
  0x84   :  { %930 = vmatprep.mubr.f32.mxu1 %v7623_v35  ;;  %957 = vmatpush1.msra.mxu0 %v5883_v31  ;;  %v1098_v12 = vand.u32 4294901760, %v6033_v9  ;;  %v60_v31 = vld [vmem:[#allocation2 + $0x38] sm:$0xff]  ;;  %v59_v9 = vld [vmem:[#allocation2 + $0x30] sm:$0xff]  ;;  %v6120_v47 = vand.u32 4294901760, %v56_v30 }
  0x85   :  { %932 = vmatmul.mubr.f32.vlgmr.msra.gmra.mxu1 %v5660_v29  ;;  %959 = vmatprep.subr.mxu0 %v5901_v60  ;;  %v7668_v60 = vand.u32 4294901760, %v5992_v46  ;;  %v1104_v28 = vand.u32 4294901760, %v6046_v39 }
  0x86   :  { %1051 = vmatprep.subr.mxu1 %v1050_v23  ;;  %961 = vmatpush1.msra.mxu0 %v5909_v27  ;;  %v6080_v27 = vsub.f32 %v71_v55, %v6036_v61  ;;  %v6094_v55 = vsub.f32 %v67_v7, %v6064_v57  ;;  %v6107_v7 = vsub.f32 %v68_v4, %v6068_v32 }
  0x87   :  { %1057 = vmatpush1.msra.mxu1 %v1056_v49  ;;  %963 = vmatprep.subr.mxu0 %v5940_v21  ;;  %v1109_v23 = vsub.f32 %v5992_v46, %v7668_v60  ;;  %v6085_v49 = vand.u32 4294901760, %v64_v25  ;;  %v6089_v21 = vsub.f32 %v72_v54, %v6048_v45  ;;  %v1116_v60 = vand.u32 4294901760, %v6062_v17  ;;  %v55_v17 = vld [vmem:[#allocation2 + $0x10] sm:$0xff] }
  0x88   :  { %1063 = vmatprep.subr.mxu1 %v1062_v2  ;;  %965 = vmatpush1.msra.mxu0 %v5919_v13  ;;  %v6096_v2 = vand.u32 4294901760, %v63_v14  ;;  %v1121_v54 = vsub.f32 %v6025_v63, %v7669_v20  ;;  %v6113_v13 = vand.u32 4294901760, %v59_v9 }
  0x89   :  { %1069 = vmatpush1.msra.mxu1 %v1068_v56  ;;  %967 = vmatprep.subr.mxu0 %v5968_v8  ;;  %v6103_v56 = vand.u32 4294901760, %v60_v31  ;;  %v1110_v39 = vand.u32 4294901760, %v1109_v23  ;;  %v7671_v8 = vand.u32 4294901760, %v6051_v41  ;;  %v6124_v23 = vsub.f32 %v64_v25, %v6085_v49 }
  0x8a   :  { %1075 = vmatprep.subr.mxu1 %v1074_v34  ;;  %969 = vmatpush1.msra.mxu0 %v5956_v22  ;;  %v7670_v34 = vand.u32 4294901760, %v5998_v1  ;;  %v7673_v25 = vand.u32 4294901760, %v6072_v26 }
  0x8b   :  { %1081 = vmatpush1.msra.mxu1 %v1080_v6  ;;  %971 = vmatprep.subr.mxu0 %v5988_v0  ;;  %v1133_v4 = vsub.f32 %v6051_v41, %v7671_v8  ;;  %v1122_v6 = vand.u32 4294901760, %v1121_v54  ;;  %v6146_v0 = vsub.f32 %v59_v9, %v6113_v13 }
  0x8c   :  { %v1127_v22 = vsub.f32 %v5998_v1, %v7670_v34  ;;  %1087 = vmatprep.subr.mxu1 %v1086_v43  ;;  %973 = vmatpush1.msra.mxu0 %v6000_v51  ;;  %v6128_v34 = vsub.f32 %v63_v14, %v6096_v2  ;;  %v7672_v43 = vand.u32 4294901760, %v6041_v5  ;;  %v6133_v51 = vand.u32 4294901760, %v55_v17 }
  0x8d   :  { %1093 = vmatpush1.msra.mxu1 %v1092_v38  ;;  %975 = vmatprep.subr.mxu0 %v6022_v58  ;;  %v1145_v38 = vsub.f32 %v6072_v26, %v7673_v25  ;;  %v6142_v14 = vsub.f32 %v60_v31, %v6103_v56  ;;  %v1134_v25 = vand.u32 4294901760, %v1133_v4  ;;  %v7675_v31 = vand.u32 4294901760, %v6089_v21 }
  0x8e   :  { %v1139_v20 = vsub.f32 %v6041_v5, %v7672_v43  ;;  %1099 = vmatprep.subr.mxu1 %v1098_v12  ;;  %977 = vmatpush1.msra.mxu0 %v6011_v15  ;;  %v1128_v43 = vand.u32 4294901760, %v1127_v22  ;;  %v7674_v12 = vand.u32 4294901760, %v6057_v37  ;;  %v6158_v22 = vsub.f32 %v56_v30, %v6120_v47 }
  0x8f   :  { %1105 = vmatpush1.msra.mxu1 %v1104_v28  ;;  %979 = vmatprep.subr.mxu0 %v6048_v45  ;;  %v1157_v28 = vsub.f32 %v6089_v21, %v7675_v31  ;;  %v1146_v31 = vand.u32 4294901760, %v1145_v38  ;;  %v7677_v30 = vand.u32 4294901760, %v6107_v7  ;;  %v7679_v38 = vand.u32 4294901760, %v6124_v23 }
  0x90   :  { %v1151_v54 = vsub.f32 %v6057_v37, %v7674_v12  ;;  %1111 = vmatprep.subr.mxu1 %v1110_v39  ;;  %981 = vmatpush1.msra.mxu0 %v6036_v61  ;;  %v1140_v9 = vand.u32 4294901760, %v1139_v20  ;;  %v6162_v12 = vsub.f32 %v55_v17, %v6133_v51  ;;  %v7676_v39 = vand.u32 4294901760, %v6080_v27 }
  0x91   :  { %1117 = vmatpush1.msra.mxu1 %v1116_v60  ;;  %983 = vmatprep.subr.mxu0 %v6068_v32  ;;  %v1169_v60 = vsub.f32 %v6107_v7, %v7677_v30  ;;  %v7678_v20 = vand.u32 4294901760, %v6094_v55  ;;  %v1181_v30 = vsub.f32 %v6124_v23, %v7679_v38 }
  0x92   :  { %v1163_v4 = vsub.f32 %v6080_v27, %v7676_v39  ;;  %1123 = vmatprep.subr.mxu1 %v1122_v6  ;;  %985 = vmatpush1.msra.mxu0 %v6064_v57  ;;  %v1152_v17 = vand.u32 4294901760, %v1151_v54  ;;  %v1158_v6 = vand.u32 4294901760, %v1157_v28  ;;  %v7680_v54 = vand.u32 4294901760, %v6128_v34 }
  0x93   :  { %1129 = vmatpush1.msra.mxu1 %v1128_v43  ;;  %987 = vmatprep.subr.mxu0 %v6085_v49  ;;  %v1175_v39 = vsub.f32 %v6094_v55, %v7678_v20  ;;  %v1210_v8 = vand.u32 4294901760, %v6162_v12  ;;  %v7681_v28 = vand.u32 4294901760, %v6142_v14 }
  0x94   :  { %1135 = vmatprep.subr.mxu1 %v1134_v25  ;;  %989 = vmatpush1.msra.mxu0 %v6096_v2  ;;  %v1164_v43 = vand.u32 4294901760, %v1163_v4  ;;  %v1187_v20 = vsub.f32 %v6128_v34, %v7680_v54  ;;  %v1170_v25 = vand.u32 4294901760, %v1169_v60  ;;  %v7682_v4 = vand.u32 4294901760, %v6146_v0 }
  0x95   :  { %1141 = vmatpush1.msra.mxu1 %v1140_v9  ;;  %991 = vmatprep.subr.mxu0 %v6103_v56  ;;  %v1193_v38 = vsub.f32 %v6142_v14, %v7681_v28  ;;  %v1176_v9 = vand.u32 4294901760, %v1175_v39  ;;  %v1182_v54 = vand.u32 4294901760, %v1181_v30 }
  0x96   :  { %1147 = vmatprep.subr.mxu1 %v1146_v31  ;;  %993 = vmatpush1.msra.mxu0 %v6113_v13  ;;  %v1199_v58 = vsub.f32 %v6146_v0, %v7682_v4  ;;  %v7683_v31 = vand.u32 4294901760, %v6158_v22  ;;  %v1188_v28 = vand.u32 4294901760, %v1187_v20  ;;  %v7686_v20 = vld [vmem:[#allocation13_spill] sm:$0xff]  ;;  %v7690_v4 = vld [vmem:[#allocation18_spill] sm:$0xff] }
  0x97   :  { %1153 = vmatpush1.msra.mxu1 %v1152_v17  ;;  %995 = vmatprep.subr.mxu0 %v6120_v47  ;;  %v1211_v17 = vsub.f32 %v6162_v12, %v1210_v8  ;;  %v1194_v39 = vand.u32 4294901760, %v1193_v38  ;;  %v7688_v38 = vld [vmem:[#allocation16_spill] sm:$0xff] }
  0x98   :  { %1159 = vmatprep.subr.mxu1 %v1158_v6  ;;  %997 = vmatpush1.msra.mxu0 %v6133_v51  ;;  %v1205_v60 = vsub.f32 %v6158_v22, %v7683_v31  ;;  %v1200_v6 = vand.u32 4294901760, %v1199_v58  ;;  %v7685_v58 = vld [vmem:[#allocation11_spill] sm:$0xff]  ;;  %v7692_v31 = vld [vmem:[#allocation21_spill] sm:$0xff] }
  0x99   :  { %1165 = vmatpush1.msra.mxu1 %v1164_v43  ;;  %1030 = vmatprep.mubr.f32.mxu0 %v7623_v35  ;;  %v1212_v43 = vand.u32 4294901760, %v1211_v17  ;;  %v7695_v17 = vld [vmem:[#allocation19_spill] sm:$0xff] }
  0x9a   :  { %1171 = vmatprep.subr.mxu1 %v1170_v25  ;;  %1260 = vmatprep.subr.mxu0 %v5867_v19  ;;  %v1206_v30 = vand.u32 4294901760, %v1205_v60  ;;  %v7687_v25 = vld [vmem:[#allocation14_spill] sm:$0xff] }
  0x9b   :  { %1036 = vmatmul.mubr.f32.vlgmr.msra.gmra.mxu0 %v5725_v40  ;;  %1177 = vmatpush1.msra.mxu1 %v1176_v9  ;;  %v7684_v40 = vld [vmem:[#allocation12_spill] sm:$0xff]  ;;  %v7689_v9 = vld [vmem:[#allocation15_spill] sm:$0xff]  ;;  %v7693_v60 = vld [vmem:[#allocation22_spill] sm:$0xff] }
  0x9c   :  { %1263 = vmatpush1.msra.mxu0 %v5862_v18  ;;  %1183 = vmatprep.subr.mxu1 %v1182_v54  ;;  %v7691_v54 = vld [vmem:[#allocation17_spill] sm:$0xff] }
  0x9d   :  { %1266 = vmatprep.subr.mxu0 %v5886_v36  ;;  %1189 = vmatpush1.msra.mxu1 %v1188_v28  ;;  %v7694_v28 = vld [vmem:[#allocation23_spill] sm:$0xff] }
  0x9e   :  { %1269 = vmatpush1.msra.mxu0 %v5878_v24  ;;  %1195 = vmatprep.subr.mxu1 %v1194_v39  ;;  %v7696_v39 = vand.u32 4294901760, %v5867_v19  ;;  %v7700_v19 = vand.u32 4294901760, %v5904_v42 }
  0x9f   :  { %1272 = vmatprep.subr.mxu0 %v5904_v42  ;;  %1201 = vmatpush1.msra.mxu1 %v1200_v6  ;;  %v7697_v6 = vand.u32 4294901760, %v5862_v18  ;;  %v7701_v18 = vand.u32 4294901760, %v5892_v33  ;;  %v7705_v42 = vand.u32 4294901760, %v5944_v59 }
  0xa0   :  { %1275 = vmatpush1.msra.mxu0 %v5892_v33  ;;  %1207 = vmatprep.subr.mxu1 %v1206_v30  ;;  %v7698_v30 = vand.u32 4294901760, %v5886_v36  ;;  %v7702_v36 = vand.u32 4294901760, %v5936_v10  ;;  %v7706_v33 = vand.u32 4294901760, %v5949_v11 }
  0xa1   :  { %1278 = vmatprep.subr.mxu0 %v5936_v10  ;;  %1213 = vmatpush1.msra.mxu1 %v1212_v43  ;;  %v7699_v43 = vand.u32 4294901760, %v5878_v24  ;;  %v7703_v24 = vand.u32 4294901760, %v5916_v48  ;;  %v7707_v10 = vand.u32 4294901760, %v5992_v46 }
  0xa2   :  { %1246 = vmatprep.mubr.f32.mxu1 %v7623_v35  ;;  %1281 = vmatpush1.msra.mxu0 %v5916_v48  ;;  %v7708_v48 = vand.u32 4294901760, %v5966_v3 }
  0xa3   :  { %1248 = vmatmul.mubr.f32.vlgmr.msra.gmra.mxu1 %v5660_v29  ;;  %1284 = vmatprep.subr.mxu0 %v5944_v59  ;;  %v7709_v59 = vand.u32 4294901760, %v6025_v63 }
  0xa4   :  { %1388 = vmatprep.subr.mxu1 %v5841_v44  ;;  %1287 = vmatpush1.msra.mxu0 %v5949_v11  ;;  %v7716_v11 = vand.u32 4294901760, %v6080_v27 }
  0xa5   :  { %1390 = vmatpush1.msra.mxu1 %v5843_v53  ;;  %1290 = vmatprep.subr.mxu0 %v5992_v46  ;;  %v7723_v46 = vand.u32 4294901760, %v6158_v22 }
  0xa6   :  { %1392 = vmatprep.subr.mxu1 %v5856_v62  ;;  %1293 = vmatpush1.msra.mxu0 %v5966_v3  ;;  %v7717_v3 = vand.u32 4294901760, %v6107_v7 }
  0xa7   :  { %1394 = vmatpush1.msra.mxu1 %v5851_v16  ;;  %1296 = vmatprep.subr.mxu0 %v6025_v63  ;;  %v7721_v63 = vand.u32 4294901760, %v6142_v14 }
  0xa8   :  { %1396 = vmatprep.subr.mxu1 %v5872_v52  ;;  %1299 = vmatpush1.msra.mxu0 %v5998_v1 }
  0xa9   :  { %1398 = vmatpush1.msra.mxu1 %v5864_v50  ;;  %1302 = vmatprep.subr.mxu0 %v6051_v41 }
  0xaa   :  { %1400 = vmatprep.subr.mxu1 %v7684_v40  ;;  %1305 = vmatpush1.msra.mxu0 %v6041_v5 }
  0xab   :  { %1402 = vmatpush1.msra.mxu1 %v7685_v58  ;;  %1308 = vmatprep.subr.mxu0 %v6072_v26 }
  0xac   :  { %1404 = vmatprep.subr.mxu1 %v7686_v20  ;;  %1311 = vmatpush1.msra.mxu0 %v6057_v37 }
  0xad   :  { %1406 = vmatpush1.msra.mxu1 %v7687_v25  ;;  %1314 = vmatprep.subr.mxu0 %v6089_v21 }
  0xae   :  { %1408 = vmatprep.subr.mxu1 %v7688_v38  ;;  %1317 = vmatpush1.msra.mxu0 %v6080_v27  ;;  %v7720_v27 = vand.u32 4294901760, %v6128_v34 }
  0xaf   :  { %1410 = vmatpush1.msra.mxu1 %v7689_v9  ;;  %1320 = vmatprep.subr.mxu0 %v6107_v7 }
  0xb0   :  { %1412 = vmatprep.subr.mxu1 %v7690_v4  ;;  %1323 = vmatpush1.msra.mxu0 %v6094_v55 }
  0xb1   :  { %1414 = vmatpush1.msra.mxu1 %v7691_v54  ;;  %1326 = vmatprep.subr.mxu0 %v6124_v23 }
  0xb2   :  { %1416 = vmatprep.subr.mxu1 %v7692_v31  ;;  %1329 = vmatpush1.msra.mxu0 %v6128_v34 }
  0xb3   :  { %1418 = vmatpush1.msra.mxu1 %v7693_v60  ;;  %1332 = vmatprep.subr.mxu0 %v6142_v14 }
  0xb4   :  { %1420 = vmatprep.subr.mxu1 %v7694_v28  ;;  %1335 = vmatpush1.msra.mxu0 %v6146_v0 }
  0xb5   :  { %1422 = vmatpush1.msra.mxu1 %v6011_v15  ;;  %1338 = vmatprep.subr.mxu0 %v6158_v22 }
  0xb6   :  { %1424 = vmatprep.subr.mxu1 %v6048_v45  ;;  %1341 = vmatpush1.msra.mxu0 %v6162_v12 }
  0xb7   :  { %1374 = vmatprep.mubr.f32.mxu0 %v7623_v35  ;;  %1426 = vmatpush1.msra.mxu1 %v6036_v61 }
  0xb8   :  { %1377 = vmatmul.mubr.f32.vlgmr.msra.gmra.mxu0 %v7695_v17  ;;  %1428 = vmatprep.subr.mxu1 %v6068_v32  ;;  %v7704_v17 = vld [vmem:[#allocation20_spill] sm:$0xff] }
  0xb9   :  { %1492 = vmatprep.subr.mxu0 %v7696_v39  ;;  %1430 = vmatpush1.msra.mxu1 %v6064_v57 }
  0xba   :  { %1496 = vmatpush1.msra.mxu0 %v7697_v6  ;;  %1432 = vmatprep.subr.mxu1 %v6085_v49 }
  0xbb   :  { %1500 = vmatprep.subr.mxu0 %v7698_v30  ;;  %1434 = vmatpush1.msra.mxu1 %v6096_v2 }
  0xbc   :  { %1504 = vmatpush1.msra.mxu0 %v7699_v43  ;;  %1436 = vmatprep.subr.mxu1 %v6103_v56 }
  0xbd   :  { %1508 = vmatprep.subr.mxu0 %v7700_v19  ;;  %1438 = vmatpush1.msra.mxu1 %v6113_v13 }
  0xbe   :  { %1512 = vmatpush1.msra.mxu0 %v7701_v18  ;;  %1440 = vmatprep.subr.mxu1 %v6120_v47 }
  0xbf   :  { %1516 = vmatprep.subr.mxu0 %v7702_v36  ;;  %1442 = vmatpush1.msra.mxu1 %v6133_v51 }
  0xc0   :  { %1475 = vmatprep.mubr.f32.mxu1 %v7623_v35  ;;  %1520 = vmatpush1.msra.mxu0 %v7703_v24 }
  0xc1   :  { %1479 = vmatmul.mubr.f32.vlgmr.msra.gmra.mxu1 %v7704_v17  ;;  %1524 = vmatprep.subr.mxu0 %v7705_v42 }
  0xc2   :  { %1646 = vmatprep.subr.mxu1 %v5841_v44  ;;  %1528 = vmatpush1.msra.mxu0 %v7706_v33  ;;  %v7710_v44 = vand.u32 4294901760, %v5998_v1  ;;  %v109_v1 = vld [vmem:[%s7480_s2] ss:$8 sm:$0xf] }
  0xc3   :  { %1648 = vmatpush1.msra.mxu1 %v5843_v53  ;;  %1532 = vmatprep.subr.mxu0 %v7707_v10  ;;  %v7711_v53 = vand.u32 4294901760, %v6051_v41  ;;  %v7722_v41 = vand.u32 4294901760, %v6146_v0 }
  0xc4   :  { %1650 = vmatprep.subr.mxu1 %v5856_v62  ;;  %1536 = vmatpush1.msra.mxu0 %v7708_v48  ;;  %v7712_v62 = vand.u32 4294901760, %v6041_v5 }
  0xc5   :  { %1652 = vmatpush1.msra.mxu1 %v5851_v16  ;;  %1540 = vmatprep.subr.mxu0 %v7709_v59  ;;  %v7713_v16 = vand.u32 4294901760, %v6072_v26 }
  0xc6   :  { %1654 = vmatprep.subr.mxu1 %v5872_v52  ;;  %1544 = vmatpush1.msra.mxu0 %v7710_v44  ;;  %v7714_v52 = vand.u32 4294901760, %v6057_v37  ;;  %v7718_v37 = vand.u32 4294901760, %v6094_v55 }
  0xc7   :  { %1656 = vmatpush1.msra.mxu1 %v5864_v50  ;;  %1548 = vmatprep.subr.mxu0 %v7711_v53  ;;  %v7715_v50 = vand.u32 4294901760, %v6089_v21  ;;  %v7719_v21 = vand.u32 4294901760, %v6124_v23 }
  0xc8   :  { %1658 = vmatprep.subr.mxu1 %v7684_v40  ;;  %1552 = vmatpush1.msra.mxu0 %v7712_v62 }
  0xc9   :  { %1660 = vmatpush1.msra.mxu1 %v7685_v58  ;;  %1556 = vmatprep.subr.mxu0 %v7713_v16 }
  0xca   :  { %1662 = vmatprep.subr.mxu1 %v7686_v20  ;;  %1560 = vmatpush1.msra.mxu0 %v7714_v52 }
  0xcb   :  { %1664 = vmatpush1.msra.mxu1 %v7687_v25  ;;  %1564 = vmatprep.subr.mxu0 %v7715_v50 }
  0xcc   :  { %1666 = vmatprep.subr.mxu1 %v7688_v38  ;;  %1568 = vmatpush1.msra.mxu0 %v7716_v11 }
  0xcd   :  { %1668 = vmatpush1.msra.mxu1 %v7689_v9  ;;  %1572 = vmatprep.subr.mxu0 %v7717_v3  ;;  %v4789_v9 = vld [vmem:[%s7480_s2 + $0x1] ss:$8 sm:$0xf] }
  0xce   :  { %1670 = vmatprep.subr.mxu1 %v7690_v4  ;;  %1576 = vmatpush1.msra.mxu0 %v7718_v37 }
  0xcf   :  { %1672 = vmatpush1.msra.mxu1 %v7691_v54  ;;  %1580 = vmatprep.subr.mxu0 %v7719_v21 }
  0xd0   :  { %1674 = vmatprep.subr.mxu1 %v7692_v31  ;;  %1584 = vmatpush1.msra.mxu0 %v7720_v27 }
  0xd1   :  { %1676 = vmatpush1.msra.mxu1 %v7693_v60  ;;  %1588 = vmatprep.subr.mxu0 %v7721_v63  ;;  %v4790_v60 = vld [vmem:[%s7480_s2 + $0x2] ss:$8 sm:$0xf] }
  0xd2   :  { %1678 = vmatprep.subr.mxu1 %v7694_v28  ;;  %1592 = vmatpush1.msra.mxu0 %v7722_v41 }
  0xd3   :  { %1680 = vmatpush1.msra.mxu1 %v6011_v15  ;;  %1596 = vmatprep.subr.mxu0 %v7723_v46 }
  0xd4   :  { %1682 = vmatprep.subr.mxu1 %v6048_v45  ;;  %1600 = vmatpush1.msra.mxu0 %v1210_v8 }
  0xd5   :  { %1633 = vmatprep.mubr.f32.mxu0 %v7623_v35  ;;  %1684 = vmatpush1.msra.mxu1 %v6036_v61 }
  0xd6   :  { %1635 = vmatmul.mubr.f32.vlgmr.msra.gmra.mxu0 %v5660_v29  ;;  %1686 = vmatprep.subr.mxu1 %v6068_v32  ;;  %v111_v32 = vlaneseq }
  0xd7   :  { %1688 = vmatpush1.msra.mxu1 %v6064_v57  ;;  %1733 = vmatprep.mubr.f32.mxu1 %v7623_v35 }
  0xd8   :  { %1690 = vmatprep.subr.mxu1 %v6085_v49  ;;  %1929 = vmatprep.subr.mxu0 %v7623_v35  ;;  %v112_v61 = vshrl.u32 %v111_v32, 7 }
  0xd9   :  { %1692 = vmatpush1.msra.mxu1 %v6096_v2 }
  0xda   :  { %1694 = vmatprep.subr.mxu1 %v6103_v56  ;;  %v6357_v0 = vsub.s32 0, %v112_v61  ;;  %v117_v2 = vsub.s32 1, %v112_v61  ;;  %v121_v43 = vsub.s32 2, %v112_v61  ;;  %v125_v18 = vsub.s32 3, %v112_v61 }
  0xdb   :  { %1696 = vmatpush1.msra.mxu1 %v6113_v13 }
  0xdc   :  { %1698 = vmatprep.subr.mxu1 %v6120_v47  ;;  %v114_v57 = vrot.slane %v109_v1, %v6357_v0  ;;  %v118_v56 = vrot.slane %v109_v1, %v117_v2  ;;  %v1755_v31 = vrot.slane %v4789_v9, %v117_v2  ;;  %v1782_v39 = vrot.slane %v4790_v60, %v117_v2 }
  0xdd   :  { %1700 = vmatpush1.msra.mxu1 %v6133_v51  ;;  %v122_v36 = vrot.slane %v109_v1, %v121_v43  ;;  %v126_v42 = vrot.slane %v109_v1, %v125_v18  ;;  %v1759_v61 = vrot.slane %v4789_v9, %v121_v43 }
  0xde   :  { %1735 = vmatmul.mubr.f32.vlgmr.msra.gmra.mxu1 %v5660_v29  ;;  %2037 = vmatprep.subr.mxu1 %v7623_v35 }
 0x102   :  { %v234_v15 = vpop.f32.mrf.mxu0 }
 0x103   :  { %v235_v13 = vadd.f32 %v234_v15, %v114_v57 }
 0x104   :  { %v236_v45 = vpop.f32.mrf.mxu0 }
 0x105   :  { %v237_v23 = vadd.f32 %v236_v45, %v118_v56 }
 0x109   :  { %v446_v5 = vpop.f32.mrf.mxu1 }
 0x10a   :  { %v447_v47 = vadd.f32 %v446_v5, %v235_v13  ;;  %v1763_v13 = vrot.slane %v4789_v9, %v125_v18  ;;  %v1786_v5 = vrot.slane %v4790_v60, %v121_v43 }
 0x10b   :  { %v448_v29 = vpop.f32.mrf.mxu1 }
 0x10c   :  { %v449_v14 = vadd.f32 %v448_v29, %v237_v23  ;;  %v1790_v29 = vrot.slane %v4790_v60, %v125_v18 }
 0x11e   :  { %v575_v51 = vpop.f32.mrf.mxu0 }
 0x11f   :  { %v576_v26 = vadd.f32 %v575_v51, %v447_v47  ;;  %v1751_v47 = vrot.slane %v4789_v9, %v6357_v0 }
 0x120   :  { %v577_v7 = vpop.f32.mrf.mxu0 }
 0x121   :  { %v578_v12 = vadd.f32 %v577_v7, %v449_v14  ;;  %v1778_v7 = vrot.slane %v4790_v60, %v6357_v0 }
 0x127   :  { %v677_v49 = vpop.f32.mrf.mxu1 }
 0x128   :  { %v678_v55 = vadd.f32 %v677_v49, %v576_v26 }
 0x129   :  { %v679_v22 = vpop.f32.mrf.mxu1 }
 0x12a   :  { %v680_v58 = vadd.f32 %v679_v22, %v578_v12 }
 0x13c   :  { %v833_v34 = vpop.f32.mrf.mxu0 }
 0x13d   :  { %v834_v8 = vadd.f32 %v833_v34, %v678_v55 }
 0x13e   :  { %v835_v40 = vpop.f32.mrf.mxu0 }
 0x13f   :  { %v836_v25 = vadd.f32 %v835_v40, %v680_v58 }
 0x145   :  { %v933_v20 = vpop.f32.mrf.mxu1 }
 0x146   :  { %v934_v38 = vadd.f32 %v933_v20, %v834_v8 }
 0x147   :  { %v935_v4 = vpop.f32.mrf.mxu1 }
 0x148   :  { %v936_v54 = vadd.f32 %v935_v4, %v836_v25  ;;  %v1741_v45 = vmax.f32 %v934_v38, 0.0 }
 0x14a   :  { %v1742_v28 = vmax.f32 %v936_v54, 0.0  ;;  %v1768_v2 = vmul.f32 %v1751_v47, %v1741_v45  ;;  %v1905_v45 = vld [vmem:[#allocation5 + $0x48] sm:$0xff] }
 0x14c   :  { %v1769_v6 = vmul.f32 %v1755_v31, %v1742_v28  ;;  %v1795_v23 = vadd.f32 %v1778_v7, %v1768_v2 }
 0x14e   :  { %v1796_v30 = vadd.f32 %v1782_v39, %v1769_v6 }
 0x150   :  { %1805 = vrot.lane.b32.xlu0 %v1796_v30, %s5318_s16 }
 0x15b   :  { %v1037_v19 = vpop.f32.mrf.mxu0 }
 0x15c   :  { %v1038_v10 = vadd.f32 %v1037_v19, %v122_v36  ;;  %v1911_v36 = vld [vmem:[#allocation5 + $0x78] sm:$0xff] }
 0x15d   :  { %v1039_v24 = vpop.f32.mrf.mxu0 }
 0x15e   :  { %v1040_v59 = vadd.f32 %v1039_v24, %v126_v42  ;;  %v1910_v24 = vld [vmem:[#allocation5 + $0x70] sm:$0xff]  ;;  %v6378_v42 = vand.u32 4294901760, %v1911_v36 }
 0x160   :  { %1931 = vmatpush1.msra.mxu0 %v6378_v42 }
 0x161   :  { %1932 = vmatprep.subr.mxu0 %v7623_v35 }
 0x163   :  { %v1249_v17 = vpop.f32.mrf.mxu1 }
 0x164   :  { %v1250_v62 = vadd.f32 %v1249_v17, %v1038_v10  ;;  %v1909_v17 = vld [vmem:[#allocation5 + $0x68] sm:$0xff] }
 0x165   :  { %v1251_v48 = vpop.f32.mrf.mxu1  ;;  %v6382_v10 = vand.u32 4294901760, %v1909_v17 }
 0x166   :  { %v1252_v52 = vadd.f32 %v1251_v48, %v1040_v59  ;;  %v1908_v48 = vld [vmem:[#allocation5 + $0x60] sm:$0xff]  ;;  %v1907_v59 = vld [vmem:[#allocation5 + $0x58] sm:$0xff] }
 0x178   :  { %v1378_v33 = vpop.f32.mrf.mxu0 }
 0x179   :  { %v1379_v50 = vadd.f32 %v1378_v33, %v1250_v62  ;;  %v6380_v33 = vand.u32 4294901760, %v1910_v24  ;;  %v6384_v62 = vand.u32 4294901760, %v1908_v48 }
 0x17a   :  { %v1380_v44 = vpop.f32.mrf.mxu0 }
 0x17b   :  { %v1381_v3 = vadd.f32 %v1380_v44, %v1252_v52  ;;  %v1906_v44 = vld [vmem:[#allocation5 + $0x50] sm:$0xff]  ;;  %1934 = vmatpush1.msra.mxu0 %v6380_v33 }
 0x17c   :  { %v6388_v52 = vand.u32 4294901760, %v1906_v44  ;;  %1935 = vmatprep.subr.mxu0 %v7623_v35 }
 0x17d   :  { %1937 = vmatpush1.msra.mxu0 %v6382_v10 }
 0x17e   :  { %1938 = vmatprep.subr.mxu0 %v7623_v35 }
 0x17f   :  { %1940 = vmatpush1.msra.mxu0 %v6384_v62 }
 0x180   :  { %1941 = vmatprep.subr.mxu0 %v7623_v35 }
 0x181   :  { %v1480_v53 = vpop.f32.mrf.mxu1 }
 0x182   :  { %v1481_v37 = vadd.f32 %v1480_v53, %v1379_v50 }
 0x183   :  { %v1482_v11 = vpop.f32.mrf.mxu1 }
 0x184   :  { %v1483_v27 = vadd.f32 %v1482_v11, %v1381_v3  ;;  %v6392_v11 = vsub.f32 %v1911_v36, %v6378_v42  ;;  %v6395_v3 = vsub.f32 %v1910_v24, %v6380_v33 }
 0x196   :  { %v1636_v16 = vpop.f32.mrf.mxu0 }
 0x197   :  { %v1637_v63 = vadd.f32 %v1636_v16, %v1481_v37  ;;  %v6386_v16 = vand.u32 4294901760, %v1907_v59  ;;  %v6398_v37 = vsub.f32 %v1909_v17, %v6382_v10 }
 0x198   :  { %v1638_v21 = vpop.f32.mrf.mxu0 }
 0x199   :  { %v1639_v46 = vadd.f32 %v1638_v21, %v1483_v27  ;;  %1943 = vmatpush1.msra.mxu0 %v6386_v16 }
 0x19a   :  { %1944 = vmatprep.subr.mxu0 %v7623_v35 }
 0x19b   :  { %1946 = vmatpush1.msra.mxu0 %v6388_v52 }
 0x19c   :  { %1947 = vmatprep.subr.mxu0 %v7623_v35 }
 0x19e   :  { %v1736_v41 = vpop.f32.mrf.mxu1 }
 0x19f   :  { %v1737_v32 = vadd.f32 %v1736_v41, %v1637_v63  ;;  %v6404_v63 = vsub.f32 %v1908_v48, %v6384_v62  ;;  %v6407_v41 = vsub.f32 %v1907_v59, %v6386_v16 }
 0x1a0   :  { %v1738_v1 = vpop.f32.mrf.mxu1 }
 0x1a1   :  { %v1743_v57 = vmax.f32 %v1737_v32, 0.0  ;;  %v1739_v15 = vadd.f32 %v1738_v1, %v1639_v46  ;;  %v6411_v46 = vsub.f32 %v1906_v44, %v6388_v52  ;;  %v7581_v1 = vand.u32 4294901760, %v6395_v3 }
 0x1a2   :  { %v7577_v47 = vand.u32 4294901760, %v6407_v41 }
 0x1a3   :  { %v1770_v51 = vmul.f32 %v1759_v61, %v1743_v57  ;;  %v1744_v26 = vmax.f32 %v1739_v15, 0.0  ;;  %v7583_v61 = vand.u32 4294901760, %v6392_v11  ;;  %v7580_v57 = vand.u32 4294901760, %v6398_v37 }
 0x1a4   :  { %v7575_v7 = vand.u32 4294901760, %v6411_v46 }
 0x1a5   :  { %v1771_v49 = vmul.f32 %v1763_v13, %v1744_v26  ;;  %v1797_v55 = vadd.f32 %v1786_v5, %v1770_v51  ;;  %v7578_v5 = vand.u32 4294901760, %v6404_v63  ;;  %v2041_v26 = vsub.f32 %v6392_v11, %v7583_v61 }
 0x1a7   :  { %1807 = vrot.lane.b32.xlu0 %v1797_v55, %s5318_s16  ;;  %v1798_v56 = vadd.f32 %v1790_v29, %v1771_v49  ;;  %v2048_v29 = vsub.f32 %v6395_v3, %v7581_v1  ;;  %v2055_v49 = vsub.f32 %v6398_v37, %v7580_v57 }
 0x1a9   :  { %1809 = vrot.lane.b32.xlu1 %v1798_v56, %s5318_s16 }
 0x1ad   :  { %1803 = vrot.lane.b32.xlu1 %v1795_v23, %s5318_s16 }
 0x1c2   :  { %v1806_v34 = vpop.permute.xlu0 %1805 }
 0x219   :  { %v1808_v8 = vpop.permute.xlu0 %1807 }
 0x21a   :  { %v1813_v14 = vsel %vm1811_vm1, %v1806_v34, %v1808_v8 }
 0x21b   :  { %v1820_v22 = vmax.f32 %v1796_v30, %v1813_v14  ;;  %v1810_v12 = vpop.permute.xlu1 %1809  ;;  %v2042_v14 = vand.u32 4294901760, %v2041_v26 }
 0x21c   :  { %v1814_v40 = vsel %vm1811_vm1, %v1808_v8, %v1810_v12  ;;  %v1822_v20 = vmax.f32 %v1798_v56, %v1810_v12  ;;  %v2062_v56 = vsub.f32 %v6404_v63, %v7578_v5  ;;  %v1901_v8 = vld [vmem:[#allocation5 + $0x28] sm:$0xff]  ;;  %v6439_v12 = vand.u32 4294901760, %v1905_v45  ;;  %v1915_v5 = vld [vmem:[#allocation5 + $0x98] sm:$0xff] }
 0x21d   :  { %v1821_v58 = vmax.f32 %v1797_v55, %v1814_v40  ;;  %1829 = vrot.lane.b32.xlu0 %v1820_v22, %s5319_s17  ;;  %v1904_v55 = vld [vmem:[#allocation5 + $0x40] sm:$0xff]  ;;  %v2056_v40 = vand.u32 4294901760, %v2055_v49  ;;  %2043 = vmatpush1.msra.mxu1 %v2042_v14 }
 0x21e   :  { %2044 = vmatprep.subr.mxu1 %v7623_v35  ;;  %1949 = vmatpush1.msra.mxu0 %v6439_v12 }
 0x21f   :  { %1831 = vrot.lane.b32.xlu1 %v1821_v58, %s5319_s17  ;;  %v1804_v0 = vpop.permute.xlu1 %1803  ;;  %1950 = vmatprep.subr.mxu0 %v7623_v35 }
 0x220   :  { %v1812_v25 = vsel %vm1811_vm1, %v1804_v0, %v1806_v34  ;;  %v1902_v34 = vld [vmem:[#allocation5 + $0x30] sm:$0xff]  ;;  %v1900_v0 = vld [vmem:[#allocation5 + $0x20] sm:$0xff] }
 0x221   :  { %v1819_v38 = vmax.f32 %v1795_v23, %v1812_v25  ;;  %1833 = vrot.lane.b32.xlu0 %v1822_v20, %s5319_s17  ;;  %v1903_v23 = vld [vmem:[#allocation5 + $0x38] sm:$0xff]  ;;  %v6450_v25 = vsub.f32 %v1905_v45, %v6439_v12  ;;  %v1896_v45 = vld [vmem:[#allocation5] sm:$0xff] }
 0x222   :  { %v6524_v14 = vand.u32 4294901760, %v1896_v45 }
 0x223   :  { %1827 = vrot.lane.b32.xlu1 %v1819_v38, %s5319_s17 }
 0x28f   :  { %v1830_v9 = vpop.permute.xlu0 %1829 }
 0x291   :  { %v1832_v4 = vpop.permute.xlu1 %1831 }
 0x292   :  { %v1837_v54 = vsel %vm1835_vm2, %v1830_v9, %v1832_v4 }
 0x293   :  { %v1844_v31 = vmax.f32 %v1820_v22, %v1837_v54  ;;  %v1834_v60 = vpop.permute.xlu0 %1833  ;;  %v2049_v22 = vand.u32 4294901760, %v2048_v29  ;;  %v1899_v54 = vld [vmem:[#allocation5 + $0x18] sm:$0xff] }
 0x294   :  { %v1838_v28 = vsel %vm1835_vm2, %v1832_v4, %v1834_v60  ;;  %v1846_v43 = vmax.f32 %v1822_v20, %v1834_v60  ;;  %v6447_v20 = vand.u32 4294901760, %v1904_v55  ;;  %v6457_v4 = vand.u32 4294901760, %v1901_v8 }
 0x295   :  { %v1845_v39 = vmax.f32 %v1821_v58, %v1838_v28  ;;  %1853 = vrot.lane.b32.xlu0 %v1844_v31, %s5320_s18  ;;  %v1828_v6 = vpop.permute.xlu1 %1827  ;;  %v2069_v58 = vsub.f32 %v6407_v41, %v7577_v47  ;;  %v2076_v60 = vsub.f32 %v6411_v46, %v7575_v7  ;;  %2050 = vmatpush1.msra.mxu1 %v2049_v22  ;;  %v6480_v36 = vand.u32 4294901760, %v1899_v54 }
 0x296   :  { %v1836_v30 = vsel %vm1835_vm2, %v1828_v6, %v1830_v9  ;;  %v6455_v9 = vand.u32 4294901760, %v1902_v34  ;;  %v6464_v28 = vsub.f32 %v1904_v55, %v6447_v20  ;;  %2051 = vmatprep.subr.mxu1 %v7623_v35  ;;  %v6488_v59 = vsub.f32 %v1901_v8, %v6457_v4  ;;  %1952 = vmatpush1.msra.mxu0 %v6447_v20 }
 0x297   :  { %1855 = vrot.lane.b32.xlu1 %v1845_v39, %s5320_s18  ;;  %v1843_v19 = vmax.f32 %v1819_v38, %v1836_v30  ;;  %v6453_v38 = vand.u32 4294901760, %v1903_v23  ;;  %2057 = vmatpush1.msra.mxu1 %v2056_v40  ;;  %v2070_v24 = vand.u32 4294901760, %v2069_v58  ;;  %v1922_v40 = vld [vmem:[#allocation5 + $0xd0] sm:$0xff] }
 0x298   :  { %v6473_v30 = vsub.f32 %v1902_v34, %v6455_v9  ;;  %2058 = vmatprep.subr.mxu1 %v7623_v35  ;;  %v7568_v29 = vand.u32 4294901760, %v6488_v59  ;;  %1953 = vmatprep.subr.mxu0 %v7623_v35 }
 0x299   :  { %1857 = vrot.lane.b32.xlu0 %v1846_v43, %s5320_s18  ;;  %v6469_v6 = vsub.f32 %v1903_v23, %v6453_v38  ;;  %v6475_v43 = vand.u32 4294901760, %v1900_v0  ;;  %1955 = vmatpush1.msra.mxu0 %v6453_v38 }
 0x29a   :  { %1956 = vmatprep.subr.mxu0 %v7623_v35 }
 0x29b   :  { %1851 = vrot.lane.b32.xlu1 %v1843_v19, %s5320_s18  ;;  %v7570_v48 = vand.u32 4294901760, %v6469_v6  ;;  %1958 = vmatpush1.msra.mxu0 %v6455_v9 }
 0x29c   :  { %1959 = vmatprep.subr.mxu0 %v7623_v35 }
 0x29d   :  { %v2097_v26 = vsub.f32 %v6469_v6, %v7570_v48  ;;  %1961 = vmatpush1.msra.mxu0 %v6457_v4 }
 0x29e   :  { %1962 = vmatprep.subr.mxu0 %v7623_v35 }
 0x29f   :  { %v2098_v58 = vand.u32 4294901760, %v2097_v26  ;;  %1964 = vmatpush1.msra.mxu0 %v6475_v43 }
 0x2a0   :  { %1965 = vmatprep.subr.mxu0 %v7623_v35 }
 0x2a1   :  { %1967 = vmatpush1.msra.mxu0 %v6480_v36 }
 0x2a2   :  { %1968 = vmatprep.subr.mxu0 %v7623_v35 }
 0x307   :  { %v1854_v18 = vpop.permute.xlu0 %1853 }
 0x309   :  { %v1856_v53 = vpop.permute.xlu1 %1855 }
 0x30a   :  { %v1861_v50 = vsel %vm1859_vm3, %v1854_v18, %v1856_v53 }
 0x30b   :  { %v6401_v21 = vmax.f32 %v1844_v31, %v1861_v50  ;;  %v1858_v27 = vpop.permute.xlu0 %1857  ;;  %v2063_v31 = vand.u32 4294901760, %v2062_v56  ;;  %v2077_v50 = vand.u32 4294901760, %v2076_v60  ;;  %v1923_v56 = vld [vmem:[#allocation5 + $0xd8] sm:$0xff] }
 0x30c   :  { %v1862_v32 = vsel %vm1859_vm3, %v1856_v53, %v1858_v27  ;;  %v1897_v53 = vld [vmem:[#allocation5 + $0x8] sm:$0xff] }
 0x30d   :  { %v1868_v15 = vmax.f32 %v1845_v39, %v1862_v32  ;;  %1874 = vrot.lane.b32.xlu0 %v6401_v21, %s5321_s19  ;;  %v1852_v13 = vpop.permute.xlu1 %1851  ;;  %v7573_v39 = vand.u32 4294901760, %v6450_v25  ;;  %2064 = vmatpush1.msra.mxu1 %v2063_v31  ;;  %v7569_v32 = vand.u32 4294901760, %v6473_v30  ;;  %v6512_v49 = vand.u32 4294901760, %v1897_v53 }
 0x30e   :  { %v1860_v51 = vsel %vm1859_vm3, %v1852_v13, %v1854_v18  ;;  %v7572_v18 = vand.u32 4294901760, %v6464_v28  ;;  %2065 = vmatprep.subr.mxu1 %v7623_v35  ;;  %v6505_v13 = vsub.f32 %v1899_v54, %v6480_v36  ;;  %v6536_v31 = vand.u32 4294901760, %v1923_v56 }
 0x30f   :  { %v6433_v2 = vmax.f32 %v1843_v19, %v1860_v51  ;;  %1876 = vrot.lane.b32.xlu1 %v1868_v15, %s5321_s19  ;;  %v1898_v19 = vld [vmem:[#allocation5 + $0x10] sm:$0xff]  ;;  %v2083_v17 = vsub.f32 %v6450_v25, %v7573_v39  ;;  %v6500_v15 = vsub.f32 %v1900_v0, %v6475_v43  ;;  %2071 = vmatpush1.msra.mxu1 %v2070_v24  ;;  %v1917_v39 = vld [vmem:[#allocation5 + $0xa8] sm:$0xff] }
 0x310   :  { %v6492_v44 = vand.u32 4294901760, %v1898_v19  ;;  %v2090_v27 = vsub.f32 %v6464_v28, %v7572_v18  ;;  %2072 = vmatprep.subr.mxu1 %v7623_v35  ;;  %v2104_v34 = vsub.f32 %v6473_v30, %v7569_v32  ;;  %v7567_v22 = vand.u32 4294901760, %v6505_v13  ;;  %v1918_v32 = vld [vmem:[#allocation5 + $0xb0] sm:$0xff] }
 0x311   :  { %1872 = vrot.lane.b32.xlu0 %v6433_v2, %s5321_s19  ;;  %v2084_v51 = vand.u32 4294901760, %v2083_v17  ;;  %2078 = vmatpush1.msra.mxu1 %v2077_v50  ;;  %v7566_v8 = vand.u32 4294901760, %v6500_v15  ;;  %v2111_v0 = vsub.f32 %v6488_v59, %v7568_v29  ;;  %v6534_v54 = vsub.f32 %v1897_v53, %v6512_v49 }
 0x312   :  { %v6517_v55 = vsub.f32 %v1898_v19, %v6492_v44  ;;  %v2091_v23 = vand.u32 4294901760, %v2090_v27  ;;  %2079 = vmatprep.subr.mxu1 %v7623_v35  ;;  %v1921_v19 = vld [vmem:[#allocation5 + $0xc8] sm:$0xff]  ;;  %v2105_v24 = vand.u32 4294901760, %v2104_v34  ;;  %v6546_v53 = vsub.f32 %v1896_v45, %v6524_v14  ;;  %1970 = vmatpush1.msra.mxu0 %v6492_v44 }
 0x313   :  { %2085 = vmatpush1.msra.mxu1 %v2084_v51  ;;  %v2118_v17 = vsub.f32 %v6500_v15, %v7566_v8  ;;  %v6548_v50 = vand.u32 4294901760, %v1922_v40  ;;  %v2125_v27 = vsub.f32 %v6505_v13, %v7567_v22  ;;  %v1920_v51 = vld [vmem:[#allocation5 + $0xc0] sm:$0xff]  ;;  %v2112_v26 = vand.u32 4294901760, %v2111_v0  ;;  %v1919_v8 = vld [vmem:[#allocation5 + $0xb8] sm:$0xff]  ;;  %1971 = vmatprep.subr.mxu0 %v7623_v35 }
 0x314   :  { %2086 = vmatprep.subr.mxu1 %v7623_v35  ;;  %v7571_v60 = vand.u32 4294901760, %v6517_v55  ;;  %v6558_v45 = vsub.f32 %v1923_v56, %v6536_v31  ;;  %v6560_v34 = vand.u32 4294901760, %v1921_v19  ;;  %v7576_v0 = vand.u32 4294901760, %v6546_v53  ;;  %1973 = vmatpush1.msra.mxu0 %v6512_v49 }
 0x315   :  { %2092 = vmatpush1.msra.mxu1 %v2091_v23  ;;  %v7574_v23 = vand.u32 4294901760, %v6534_v54  ;;  %v6570_v56 = vsub.f32 %v1922_v40, %v6548_v50  ;;  %v6572_v29 = vand.u32 4294901760, %v1920_v51  ;;  %v6576_v48 = vand.u32 4294901760, %v1919_v8  ;;  %1974 = vmatprep.subr.mxu0 %v7623_v35 }
 0x316   :  { %2093 = vmatprep.subr.mxu1 %v7623_v35  ;;  %v2132_v22 = vsub.f32 %v6517_v55, %v7571_v60  ;;  %v2126_v60 = vand.u32 4294901760, %v2125_v27  ;;  %v6584_v40 = vsub.f32 %v1921_v19, %v6560_v34  ;;  %v6588_v18 = vand.u32 4294901760, %v1918_v32  ;;  %1976 = vmatpush1.msra.mxu0 %v6524_v14 }
 0x317   :  { %2099 = vmatpush1.msra.mxu1 %v2098_v58  ;;  %v2119_v58 = vand.u32 4294901760, %v2118_v17  ;;  %v7579_v17 = vand.u32 4294901760, %v6558_v45  ;;  %v6596_v19 = vsub.f32 %v1920_v51, %v6572_v29  ;;  %v6601_v7 = vsub.f32 %v1919_v8, %v6576_v48  ;;  %1985 = vmatprep.subr.mxu0 %v7623_v35 }
 0x318   :  { %2100 = vmatprep.subr.mxu1 %v7623_v35  ;;  %v2133_v27 = vand.u32 4294901760, %v2132_v22  ;;  %v7584_v47 = vand.u32 4294901760, %v6584_v40  ;;  %v6608_v51 = vand.u32 4294901760, %v1917_v39  ;;  %1987 = vmatpush2.msra.mxu0 %v6536_v31  ;;  %v6613_v8 = vsub.f32 %v1918_v32, %v6588_v18 }
 0x319   :  { %2106 = vmatpush1.msra.mxu1 %v2105_v24  ;;  %v2139_v24 = vsub.f32 %v6534_v54, %v7574_v23  ;;  %v7582_v23 = vand.u32 4294901760, %v6570_v56  ;;  %1988 = vmatprep.subr.mxu0 %v7623_v35  ;;  %v7586_v1 = vand.u32 4294901760, %v6601_v7 }
 0x31a   :  { %2107 = vmatprep.subr.mxu1 %v7623_v35  ;;  %1990 = vmatpush2.msra.mxu0 %v6548_v50 }
 0x31b   :  { %2113 = vmatpush1.msra.mxu1 %v2112_v26  ;;  %v2146_v26 = vsub.f32 %v6546_v53, %v7576_v0  ;;  %v2140_v22 = vand.u32 4294901760, %v2139_v24  ;;  %v2161_v0 = vsub.f32 %v6558_v45, %v7579_v17  ;;  %v2168_v24 = vsub.f32 %v6570_v56, %v7582_v23  ;;  %1991 = vmatprep.subr.mxu0 %v7623_v35 }
 0x31c   :  { %2114 = vmatprep.subr.mxu1 %v7623_v35  ;;  %v7585_v17 = vand.u32 4294901760, %v6596_v19  ;;  %v6632_v23 = vand.u32 4294901760, %v1915_v5  ;;  %1993 = vmatpush2.msra.mxu0 %v6560_v34 }
 0x31d   :  { %2120 = vmatpush1.msra.mxu1 %v2119_v58  ;;  %v1916_v58 = vld [vmem:[#allocation5 + $0xa0] sm:$0xff]  ;;  %v2162_v32 = vand.u32 4294901760, %v2161_v0  ;;  %v2169_v61 = vand.u32 4294901760, %v2168_v24  ;;  %1994 = vmatprep.subr.mxu0 %v7623_v35 }
 0x31e   :  { %2121 = vmatprep.subr.mxu1 %v7623_v35  ;;  %v6620_v57 = vand.u32 4294901760, %v1916_v58  ;;  %v2182_v0 = vsub.f32 %v6596_v19, %v7585_v17  ;;  %1996 = vmatpush2.msra.mxu0 %v6572_v29  ;;  %v6652_v17 = vsub.f32 %v1915_v5, %v6632_v23 }
 0x31f   :  { %2127 = vmatpush1.msra.mxu1 %v2126_v60  ;;  %v2147_v60 = vand.u32 4294901760, %v2146_v26  ;;  %v6630_v26 = vsub.f32 %v1917_v39, %v6608_v51  ;;  %1997 = vmatprep.subr.mxu0 %v7623_v35 }
 0x320   :  { %2128 = vmatprep.subr.mxu1 %v7623_v35  ;;  %7726 = vst [vmem:[#allocation13_spill] sm:$0xff] %v6652_v17  ;;  %1999 = vmatpush2.msra.mxu0 %v6576_v48 }
 0x321   :  { %2134 = vmatpush1.msra.mxu1 %v2133_v27  ;;  %v2175_v27 = vsub.f32 %v6584_v40, %v7584_v47  ;;  %7724 = vst [vmem:[#allocation12_spill] sm:$0xff] %v6630_v26  ;;  %v6642_v47 = vsub.f32 %v1916_v58, %v6620_v57  ;;  %v7590_v24 = vand.u32 4294901760, %v6630_v26  ;;  %v2183_v58 = vand.u32 4294901760, %v2182_v0  ;;  %2000 = vmatprep.subr.mxu0 %v7623_v35 }
 0x322   :  { %2135 = vmatprep.subr.mxu1 %v7623_v35  ;;  %2002 = vmatpush2.msra.mxu0 %v6588_v18 }
 0x323   :  { %2141 = vmatpush1.msra.mxu1 %v2140_v22  ;;  %v7587_v22 = vand.u32 4294901760, %v6613_v8  ;;  %7725 = vst [vmem:[#allocation11_spill] sm:$0xff] %v6642_v47  ;;  %v2176_v39 = vand.u32 4294901760, %v2175_v27  ;;  %v7589_v27 = vand.u32 4294901760, %v6642_v47  ;;  %2003 = vmatprep.subr.mxu0 %v7623_v35 }
 0x324   :  { %2142 = vmatprep.subr.mxu1 %v7623_v35  ;;  %2005 = vmatpush2.msra.mxu0 %v6608_v51 }
 0x325   :  { %2148 = vmatpush1.msra.mxu1 %v2147_v60  ;;  %v2189_v60 = vsub.f32 %v6601_v7, %v7586_v1  ;;  %v2203_v1 = vsub.f32 %v6630_v26, %v7590_v24  ;;  %2006 = vmatprep.subr.mxu0 %v7623_v35 }
 0x326   :  { %2157 = vmatprep.subr.mxu1 %v7623_v35  ;;  %2008 = vmatpush2.msra.mxu0 %v6620_v57 }
 0x327   :  { %2163 = vmatpush2.msra.mxu1 %v2162_v32  ;;  %v2196_v32 = vsub.f32 %v6613_v8, %v7587_v22  ;;  %v2190_v5 = vand.u32 4294901760, %v2189_v60  ;;  %v2210_v22 = vsub.f32 %v6642_v47, %v7589_v27  ;;  %2009 = vmatprep.subr.mxu0 %v7623_v35 }
 0x328   :  { %2164 = vmatprep.subr.mxu1 %v7623_v35  ;;  %2011 = vmatpush2.msra.mxu0 %v6632_v23 }
 0x329   :  { %2170 = vmatpush2.msra.mxu1 %v2169_v61  ;;  %v7588_v61 = vand.u32 4294901760, %v6652_v17  ;;  %v2197_v0 = vand.u32 4294901760, %v2196_v32  ;;  %2012 = vmatprep.subr.mxu0 %v7623_v35 }
 0x32a   :  { %2171 = vmatprep.subr.mxu1 %v7623_v35 }
 0x32b   :  { %2177 = vmatpush2.msra.mxu1 %v2176_v39  ;;  %v2204_v39 = vand.u32 4294901760, %v2203_v1  ;;  %v2217_v60 = vsub.f32 %v6652_v17, %v7588_v61  ;;  %v1914_v1 = vld [vmem:[#allocation5 + $0x90] sm:$0xff]  ;;  %v1913_v61 = vld [vmem:[#allocation5 + $0x88] sm:$0xff] }
 0x32c   :  { %2178 = vmatprep.subr.mxu1 %v7623_v35 }
 0x32d   :  { %2184 = vmatpush2.msra.mxu1 %v2183_v58  ;;  %v2211_v58 = vand.u32 4294901760, %v2210_v22  ;;  %v2218_v32 = vand.u32 4294901760, %v2217_v60 }
 0x32e   :  { %2185 = vmatprep.subr.mxu1 %v7623_v35 }
 0x32f   :  { %2191 = vmatpush2.msra.mxu1 %v2190_v5  ;;  %v6687_v5 = vand.u32 4294901760, %v1914_v1 }
 0x330   :  { %2192 = vmatprep.subr.mxu1 %v7623_v35 }
 0x331   :  { %2198 = vmatpush2.msra.mxu1 %v2197_v0  ;;  %v6690_v22 = vsub.f32 %v1914_v1, %v6687_v5  ;;  %v6692_v0 = vand.u32 4294901760, %v1913_v61  ;;  %2014 = vmatpush2.msra.mxu0 %v6687_v5 }
 0x332   :  { %2199 = vmatprep.subr.mxu1 %v7623_v35  ;;  %2015 = vmatprep.subr.mxu0 %v7623_v35 }
 0x333   :  { %2205 = vmatpush2.msra.mxu1 %v2204_v39  ;;  %7727 = vst [vmem:[#allocation14_spill] sm:$0xff] %v6690_v22  ;;  %7728 = vst [vmem:[#allocation16_spill] sm:$0xff] %v6692_v0  ;;  %v1912_v39 = vld [vmem:[#allocation5 + $0x80] sm:$0xff]  ;;  %v7597_v60 = vand.u32 4294901760, %v6690_v22  ;;  %2017 = vmatpush2.msra.mxu0 %v6692_v0 }
 0x334   :  { %2206 = vmatprep.subr.mxu1 %v7623_v35  ;;  %2018 = vmatprep.subr.mxu0 %v7623_v35 }
 0x335   :  { %2212 = vmatpush2.msra.mxu1 %v2211_v58  ;;  %v6698_v58 = vsub.f32 %v1913_v61, %v6692_v0  ;;  %v2224_v1 = vsub.f32 %v6690_v22, %v7597_v60 }
 0x336   :  { %2213 = vmatprep.subr.mxu1 %v7623_v35 }
 0x337   :  { %2219 = vmatpush2.msra.mxu1 %v2218_v32  ;;  %7729 = vst [vmem:[#allocation15_spill] sm:$0xff] %v6698_v58  ;;  %v6700_v32 = vand.u32 4294901760, %v1912_v39  ;;  %v7598_v27 = vand.u32 4294901760, %v6698_v58  ;;  %v2225_v61 = vand.u32 4294901760, %v2224_v1 }
 0x338   :  { %2220 = vmatprep.subr.mxu1 %v7623_v35 }
 0x339   :  { %7730 = vst [vmem:[#allocation18_spill] sm:$0xff] %v6700_v32  ;;  %v6709_v24 = vsub.f32 %v1912_v39, %v6700_v32  ;;  %2020 = vmatpush2.msra.mxu0 %v6700_v32  ;;  %v2231_v17 = vsub.f32 %v6698_v58, %v7598_v27  ;;  %2226 = vmatpush2.msra.mxu1 %v2225_v61 }
 0x33a   :  { %2249 = vmatprep.subr.mxu0 %v7623_v35  ;;  %2227 = vmatprep.subr.mxu1 %v7623_v35 }
 0x33b   :  { %7731 = vst [vmem:[#allocation17_spill] sm:$0xff] %v6709_v24  ;;  %v7603_v47 = vand.u32 4294901760, %v6709_v24  ;;  %v2232_v0 = vand.u32 4294901760, %v2231_v17 }
 0x33d   :  { %v2238_v60 = vsub.f32 %v6709_v24, %v7603_v47  ;;  %2233 = vmatpush2.msra.mxu1 %v2232_v0 }
 0x33e   :  { %2234 = vmatprep.subr.mxu1 %v7623_v35 }
 0x33f   :  { %v2239_v39 = vand.u32 4294901760, %v2238_v60 }
 0x341   :  { %2240 = vmatpush2.msra.mxu1 %v2239_v39 }
 0x342   :  { %2379 = vmatprep.subr.mxu1 %v7623_v35 }
 0x37f   :  { %v1875_v1 = vpop.permute.xlu0 %1874 }
 0x381   :  { %v1877_v27 = vpop.permute.xlu1 %1876 }
 0x382   :  { %v1880_v58 = vsel %vm1878_vm4, %v1875_v1, %v1877_v27 }
 0x383   :  { %v1884_v17 = vmax.f32 %v6401_v21, %v1880_v58  ;;  %v1873_v61 = vpop.permute.xlu0 %1872 }
 0x384   :  { %v1879_v22 = vsel %vm1878_vm4, %v1873_v61, %v1875_v1  ;;  %v7732_v61 = vld [vmem:[#allocation12_spill] sm:$0xff] }
 0x385   :  { %v1883_v47 = vmax.f32 %v6433_v2, %v1879_v22  ;;  %1889 = vrot.lane.b32.xlu1 %v1884_v17, %s5318_s16 }
 0x387   :  { %1887 = vrot.lane.b32.xlu0 %v1883_v47, %s5318_s16 }
 0x3f7   :  { %v1890_v0 = vpop.permute.xlu1 %1889 }
 0x3f8   :  { %v1895_v60 = vmax.f32 %v1884_v17, %v1890_v0 }
 0x3f9   :  { %v1888_v39 = vpop.permute.xlu0 %1887 }
 0x3fa   :  { %v1927_v24 = vsel %vm1925_vm5, %v1895_v60, 0  ;;  %v1891_v32 = vsel %vm1811_vm1, %v1888_v39, %v1890_v0  ;;  %v7733_v0 = vld [vmem:[#allocation16_spill] sm:$0xff]  ;;  %v7734_v60 = vld [vmem:[#allocation11_spill] sm:$0xff]  ;;  %v7735_v39 = vld [vmem:[#allocation18_spill] sm:$0xff] }
 0x3fb   :  { %v6730_v26 = vand.u32 4294901760, %v1927_v24  ;;  %v1894_v27 = vmax.f32 %v1883_v47, %v1891_v32 }
 0x3fd   :  { %v2022_v21 = vsub.f32 %v1927_v24, %v6730_v26  ;;  %v6733_v58 = vand.u32 4294901760, %v1894_v27  ;;  %2242 = vmatprep.mubr.f32.mxu1 %v6730_v26 }
 0x3ff   :  { %v6737_v2 = vsub.f32 %v1894_v27, %v6733_v58  ;;  %2244 = vmatmul.mubr.f32.vlgmr.msra.gmra.mxu1 %v6733_v58  ;;  %v2023_v22 = vand.u32 4294901760, %v2022_v21  ;;  %v7736_v27 = vld [vmem:[#allocation13_spill] sm:$0xff] }
 0x400   :  { %2381 = vmatpush1.msra.mxu1 %v6378_v42 }
 0x401   :  { %v2029_v1 = vand.u32 4294901760, %v6737_v2  ;;  %2382 = vmatprep.subr.mxu1 %v7623_v35  ;;  %2474 = vmatprep.mubr.f32.mxu1 %v2023_v22  ;;  %v2024_v47 = vsub.f32 %v2022_v21, %v2023_v22  ;;  %v7738_v22 = vld [vmem:[#allocation15_spill] sm:$0xff] }
 0x402   :  { %2384 = vmatpush1.msra.mxu1 %v6380_v33 }
 0x403   :  { %2385 = vmatprep.subr.mxu1 %v7623_v35  ;;  %v2025_v24 = vand.u32 4294901760, %v2024_v47  ;;  %v2030_v32 = vsub.f32 %v6737_v2, %v2029_v1 }
 0x404   :  { %2387 = vmatpush1.msra.mxu1 %v6382_v10 }
 0x405   :  { %2388 = vmatprep.subr.mxu1 %v7623_v35  ;;  %2026 = vmatprep.mubr.f32.mxu0 %v2025_v24  ;;  %v2031_v17 = vand.u32 4294901760, %v2030_v32 }
 0x406   :  { %2390 = vmatpush1.msra.mxu1 %v6384_v62 }
 0x407   :  { %2391 = vmatprep.subr.mxu1 %v7623_v35  ;;  %2032 = vmatmul.mubr.f32.vlgmr.msra.gmra.mxu0 %v2031_v17 }
 0x408   :  { %2252 = vmatpush1.msra.mxu0 %v6392_v11  ;;  %2393 = vmatpush1.msra.mxu1 %v6386_v16 }
 0x409   :  { %2253 = vmatprep.subr.mxu0 %v7623_v35  ;;  %2371 = vmatprep.mubr.f32.mxu0 %v2022_v21  ;;  %v7737_v21 = vld [vmem:[#allocation14_spill] sm:$0xff] }
 0x40a   :  { %2394 = vmatprep.subr.mxu1 %v7623_v35  ;;  %2256 = vmatpush1.msra.mxu0 %v6395_v3 }
 0x40b   :  { %2396 = vmatpush1.msra.mxu1 %v6388_v52  ;;  %2257 = vmatprep.subr.mxu0 %v7623_v35 }
 0x40c   :  { %2397 = vmatprep.subr.mxu1 %v7623_v35  ;;  %2260 = vmatpush1.msra.mxu0 %v6398_v37 }
 0x40d   :  { %2399 = vmatpush1.msra.mxu1 %v6439_v12  ;;  %2261 = vmatprep.subr.mxu0 %v7623_v35 }
 0x40e   :  { %2400 = vmatprep.subr.mxu1 %v7623_v35  ;;  %2264 = vmatpush1.msra.mxu0 %v6404_v63 }
 0x40f   :  { %2402 = vmatpush1.msra.mxu1 %v6447_v20  ;;  %2265 = vmatprep.subr.mxu0 %v7623_v35 }
 0x410   :  { %2403 = vmatprep.subr.mxu1 %v7623_v35  ;;  %2268 = vmatpush1.msra.mxu0 %v6407_v41 }
 0x411   :  { %2405 = vmatpush1.msra.mxu1 %v6453_v38  ;;  %2269 = vmatprep.subr.mxu0 %v7623_v35 }
 0x412   :  { %2406 = vmatprep.subr.mxu1 %v7623_v35  ;;  %2272 = vmatpush1.msra.mxu0 %v6411_v46 }
 0x413   :  { %2408 = vmatpush1.msra.mxu1 %v6455_v9  ;;  %2273 = vmatprep.subr.mxu0 %v7623_v35 }
 0x414   :  { %2409 = vmatprep.subr.mxu1 %v7623_v35  ;;  %2276 = vmatpush1.msra.mxu0 %v6450_v25 }
 0x415   :  { %2411 = vmatpush1.msra.mxu1 %v6457_v4  ;;  %2277 = vmatprep.subr.mxu0 %v7623_v35 }
 0x416   :  { %2412 = vmatprep.subr.mxu1 %v7623_v35  ;;  %2280 = vmatpush1.msra.mxu0 %v6464_v28 }
 0x417   :  { %2414 = vmatpush1.msra.mxu1 %v6475_v43  ;;  %2281 = vmatprep.subr.mxu0 %v7623_v35 }
 0x418   :  { %2415 = vmatprep.subr.mxu1 %v7623_v35  ;;  %2284 = vmatpush1.msra.mxu0 %v6469_v6 }
 0x419   :  { %2417 = vmatpush1.msra.mxu1 %v6480_v36  ;;  %2285 = vmatprep.subr.mxu0 %v7623_v35 }
 0x41a   :  { %2418 = vmatprep.subr.mxu1 %v7623_v35  ;;  %2288 = vmatpush1.msra.mxu0 %v6473_v30 }
 0x41b   :  { %2420 = vmatpush1.msra.mxu1 %v6492_v44  ;;  %2289 = vmatprep.subr.mxu0 %v7623_v35 }
 0x41c   :  { %2421 = vmatprep.subr.mxu1 %v7623_v35  ;;  %2292 = vmatpush1.msra.mxu0 %v6488_v59 }
 0x41d   :  { %2423 = vmatpush1.msra.mxu1 %v6512_v49  ;;  %2293 = vmatprep.subr.mxu0 %v7623_v35 }
 0x41e   :  { %2424 = vmatprep.subr.mxu1 %v7623_v35  ;;  %2296 = vmatpush1.msra.mxu0 %v6500_v15 }
 0x41f   :  { %2426 = vmatpush1.msra.mxu1 %v6524_v14  ;;  %2297 = vmatprep.subr.mxu0 %v7623_v35 }
 0x420   :  { %2435 = vmatprep.subr.mxu1 %v7623_v35  ;;  %2300 = vmatpush1.msra.mxu0 %v6505_v13 }
 0x421   :  { %2437 = vmatpush2.msra.mxu1 %v6536_v31  ;;  %2301 = vmatprep.subr.mxu0 %v7623_v35 }
 0x422   :  { %2438 = vmatprep.subr.mxu1 %v7623_v35  ;;  %2304 = vmatpush1.msra.mxu0 %v6517_v55 }
 0x423   :  { %2440 = vmatpush2.msra.mxu1 %v6548_v50  ;;  %2305 = vmatprep.subr.mxu0 %v7623_v35 }
 0x424   :  { %2441 = vmatprep.subr.mxu1 %v7623_v35  ;;  %2308 = vmatpush1.msra.mxu0 %v6534_v54 }
 0x425   :  { %2443 = vmatpush2.msra.mxu1 %v6560_v34  ;;  %2309 = vmatprep.subr.mxu0 %v7623_v35 }
 0x426   :  { %2444 = vmatprep.subr.mxu1 %v7623_v35  ;;  %2312 = vmatpush1.msra.mxu0 %v6546_v53 }
 0x427   :  { %2446 = vmatpush2.msra.mxu1 %v6572_v29  ;;  %2321 = vmatprep.subr.mxu0 %v7623_v35 }
 0x428   :  { %2447 = vmatprep.subr.mxu1 %v7623_v35  ;;  %2324 = vmatpush2.msra.mxu0 %v6558_v45 }
 0x429   :  { %2449 = vmatpush2.msra.mxu1 %v6576_v48  ;;  %2325 = vmatprep.subr.mxu0 %v7623_v35 }
 0x42a   :  { %2450 = vmatprep.subr.mxu1 %v7623_v35  ;;  %2328 = vmatpush2.msra.mxu0 %v6570_v56 }
 0x42b   :  { %2452 = vmatpush2.msra.mxu1 %v6588_v18  ;;  %2329 = vmatprep.subr.mxu0 %v7623_v35 }
 0x42c   :  { %2453 = vmatprep.subr.mxu1 %v7623_v35  ;;  %2332 = vmatpush2.msra.mxu0 %v6584_v40 }
 0x42d   :  { %2455 = vmatpush2.msra.mxu1 %v6608_v51  ;;  %2333 = vmatprep.subr.mxu0 %v7623_v35 }
 0x42e   :  { %2456 = vmatprep.subr.mxu1 %v7623_v35  ;;  %2336 = vmatpush2.msra.mxu0 %v6596_v19 }
 0x42f   :  { %2458 = vmatpush2.msra.mxu1 %v6620_v57  ;;  %2337 = vmatprep.subr.mxu0 %v7623_v35 }
 0x430   :  { %2459 = vmatprep.subr.mxu1 %v7623_v35  ;;  %2340 = vmatpush2.msra.mxu0 %v6601_v7 }
 0x431   :  { %2461 = vmatpush2.msra.mxu1 %v6632_v23  ;;  %2341 = vmatprep.subr.mxu0 %v7623_v35 }
 0x432   :  { %2462 = vmatprep.subr.mxu1 %v7623_v35  ;;  %2344 = vmatpush2.msra.mxu0 %v6613_v8 }
 0x433   :  { %2464 = vmatpush2.msra.mxu1 %v6687_v5  ;;  %2345 = vmatprep.subr.mxu0 %v7623_v35 }
 0x434   :  { %2465 = vmatprep.subr.mxu1 %v7623_v35  ;;  %2348 = vmatpush2.msra.mxu0 %v7732_v61 }
 0x435   :  { %2467 = vmatpush2.msra.mxu1 %v7733_v0  ;;  %2349 = vmatprep.subr.mxu0 %v7623_v35 }
 0x436   :  { %2468 = vmatprep.subr.mxu1 %v7623_v35  ;;  %2352 = vmatpush2.msra.mxu0 %v7734_v60 }
 0x437   :  { %2470 = vmatpush2.msra.mxu1 %v7735_v39  ;;  %2353 = vmatprep.subr.mxu0 %v7623_v35 }
 0x438   :  { %2478 = vmatmul.mubr.f32.vlgmr.msra.gmra.mxu1 %v2029_v1  ;;  %2639 = vmatprep.subr.mxu1 %v7623_v35 }
 0x439   :  { %2356 = vmatpush2.msra.mxu0 %v7736_v27  ;;  %2641 = vmatpush1.msra.mxu1 %v6378_v42  ;;  %v7739_v42 = vld [vmem:[#allocation17_spill] sm:$0xff] }
 0x43a   :  { %2732 = vmatprep.mubr.f32.mxu1 %v6730_v26  ;;  %2357 = vmatprep.subr.mxu0 %v7623_v35 }
 0x43b   :  { %2642 = vmatprep.subr.mxu1 %v7623_v35  ;;  %2360 = vmatpush2.msra.mxu0 %v7737_v21 }
 0x43c   :  { %2644 = vmatpush1.msra.mxu1 %v6380_v33  ;;  %2361 = vmatprep.subr.mxu0 %v7623_v35  ;;  %v7740_v33 = vand.u32 4294901760, %v6392_v11  ;;  %v7745_v11 = vand.u32 4294901760, %v6411_v46  ;;  %v7750_v46 = vand.u32 4294901760, %v6488_v59  ;;  %v7766_v59 = vand.u32 4294901760, %v7738_v22 }
 0x43d   :  { %2645 = vmatprep.subr.mxu1 %v7623_v35  ;;  %2364 = vmatpush2.msra.mxu0 %v7738_v22 }
 0x43e   :  { %2647 = vmatpush1.msra.mxu1 %v6382_v10  ;;  %2365 = vmatprep.subr.mxu0 %v7623_v35  ;;  %v7741_v10 = vand.u32 4294901760, %v6395_v3  ;;  %v7746_v3 = vand.u32 4294901760, %v6450_v25  ;;  %v7753_v25 = vand.u32 4294901760, %v6517_v55 }
 0x43f   :  { %2648 = vmatprep.subr.mxu1 %v7623_v35  ;;  %2368 = vmatpush2.msra.mxu0 %v7739_v42 }
 0x440   :  { %2650 = vmatpush1.msra.mxu1 %v6384_v62  ;;  %2374 = vmatmul.mubr.f32.vlgmr.msra.gmra.mxu0 %v6737_v2  ;;  %v7742_v62 = vand.u32 4294901760, %v6398_v37  ;;  %v7747_v37 = vand.u32 4294901760, %v6464_v28  ;;  %v7757_v28 = vand.u32 4294901760, %v6570_v56 }
 0x441   :  { %2483 = vmatprep.subr.mxu0 %v7623_v35  ;;  %2651 = vmatprep.subr.mxu1 %v7623_v35 }
 0x442   :  { %2487 = vmatpush1.msra.mxu0 %v7740_v33  ;;  %2632 = vmatprep.mubr.f32.mxu0 %v6730_v26  ;;  %v2746_v33 = vld [vmem:[%s7482_s4 + $0x30] sm:$0xff] }
 0x443   :  { %2653 = vmatpush1.msra.mxu1 %v6386_v16  ;;  %2488 = vmatprep.subr.mxu0 %v7623_v35  ;;  %v7743_v16 = vand.u32 4294901760, %v6404_v63  ;;  %v7748_v63 = vand.u32 4294901760, %v6469_v6  ;;  %v7758_v6 = vand.u32 4294901760, %v6584_v40 }
 0x444   :  { %2654 = vmatprep.subr.mxu1 %v7623_v35  ;;  %2492 = vmatpush1.msra.mxu0 %v7741_v10 }
 0x445   :  { %2656 = vmatpush1.msra.mxu1 %v6388_v52  ;;  %2493 = vmatprep.subr.mxu0 %v7623_v35  ;;  %v7744_v52 = vand.u32 4294901760, %v6407_v41  ;;  %v7749_v41 = vand.u32 4294901760, %v6473_v30  ;;  %v7759_v30 = vand.u32 4294901760, %v6596_v19 }
 0x446   :  { %2657 = vmatprep.subr.mxu1 %v7623_v35  ;;  %2497 = vmatpush1.msra.mxu0 %v7742_v62 }
 0x447   :  { %2659 = vmatpush1.msra.mxu1 %v6439_v12  ;;  %2498 = vmatprep.subr.mxu0 %v7623_v35  ;;  %v7751_v12 = vand.u32 4294901760, %v6500_v15  ;;  %v2753_v15 = vld [vmem:[%s7482_s4 + $0x68] sm:$0xff] }
 0x448   :  { %2660 = vmatprep.subr.mxu1 %v7623_v35  ;;  %2502 = vmatpush1.msra.mxu0 %v7743_v16  ;;  %v7100_v16 = vand.u32 4294901760, %v2746_v33 }
 0x449   :  { %2662 = vmatpush1.msra.mxu1 %v6447_v20  ;;  %2503 = vmatprep.subr.mxu0 %v7623_v35  ;;  %v7752_v20 = vand.u32 4294901760, %v6505_v13  ;;  %v2752_v13 = vld [vmem:[%s7482_s4 + $0x60] sm:$0xff] }
 0x44a   :  { %2663 = vmatprep.subr.mxu1 %v7623_v35  ;;  %2507 = vmatpush1.msra.mxu0 %v7744_v52  ;;  %v7014_v55 = vand.u32 4294901760, %v2752_v13  ;;  %v2745_v52 = vld [vmem:[%s7482_s4 + $0x28] sm:$0xff] }
 0x44b   :  { %2665 = vmatpush1.msra.mxu1 %v6453_v38  ;;  %2508 = vmatprep.subr.mxu0 %v7623_v35  ;;  %v7754_v38 = vand.u32 4294901760, %v6534_v54  ;;  %v2750_v54 = vld [vmem:[%s7482_s4 + $0x50] sm:$0xff] }
 0x44c   :  { %2666 = vmatprep.subr.mxu1 %v7623_v35  ;;  %2512 = vmatpush1.msra.mxu0 %v7745_v11 }
 0x44d   :  { %2668 = vmatpush1.msra.mxu1 %v6455_v9  ;;  %2513 = vmatprep.subr.mxu0 %v7623_v35  ;;  %v7755_v9 = vand.u32 4294901760, %v6546_v53  ;;  %v7024_v53 = vand.u32 4294901760, %v2750_v54 }
 0x44e   :  { %2669 = vmatprep.subr.mxu1 %v7623_v35  ;;  %2517 = vmatpush1.msra.mxu0 %v7746_v3 }
 0x44f   :  { %2671 = vmatpush1.msra.mxu1 %v6457_v4  ;;  %2518 = vmatprep.subr.mxu0 %v7623_v35  ;;  %v7756_v4 = vand.u32 4294901760, %v6558_v45  ;;  %v7032_v45 = vsub.f32 %v2752_v13, %v7014_v55  ;;  %v7039_v56 = vsub.f32 %v2750_v54, %v7024_v53 }
 0x450   :  { %2672 = vmatprep.subr.mxu1 %v7623_v35  ;;  %2522 = vmatpush1.msra.mxu0 %v7747_v37  ;;  %v7112_v37 = vsub.f32 %v2746_v33, %v7100_v16 }
 0x451   :  { %2674 = vmatpush1.msra.mxu1 %v6475_v43  ;;  %2523 = vmatprep.subr.mxu0 %v7623_v35  ;;  %v7760_v43 = vand.u32 4294901760, %v6601_v7  ;;  %v7763_v7 = vand.u32 4294901760, %v7734_v60  ;;  %v2875_v26 = vand.u32 4294901760, %v7039_v56 }
 0x452   :  { %2675 = vmatprep.subr.mxu1 %v7623_v35  ;;  %2527 = vmatpush1.msra.mxu0 %v7748_v63  ;;  %v7114_v63 = vand.u32 4294901760, %v2745_v52 }
 0x453   :  { %2677 = vmatpush1.msra.mxu1 %v6480_v36  ;;  %2528 = vmatprep.subr.mxu0 %v7623_v35  ;;  %v7764_v36 = vand.u32 4294901760, %v7736_v27  ;;  %v2876_v32 = vsub.f32 %v7039_v56, %v2875_v26 }
 0x454   :  { %2678 = vmatprep.subr.mxu1 %v7623_v35  ;;  %2532 = vmatpush1.msra.mxu0 %v7749_v41  ;;  %v2744_v41 = vld [vmem:[%s7482_s4 + $0x20] sm:$0xff] }
 0x455   :  { %2680 = vmatpush1.msra.mxu1 %v6492_v44  ;;  %2533 = vmatprep.subr.mxu0 %v7623_v35  ;;  %v7767_v44 = vand.u32 4294901760, %v7739_v42 }
 0x456   :  { %2681 = vmatprep.subr.mxu1 %v7623_v35  ;;  %2537 = vmatpush1.msra.mxu0 %v7750_v46 }
 0x457   :  { %2683 = vmatpush1.msra.mxu1 %v6512_v49  ;;  %2538 = vmatprep.subr.mxu0 %v7623_v35  ;;  %v7012_v49 = vand.u32 4294901760, %v2753_v15 }
 0x458   :  { %2684 = vmatprep.subr.mxu1 %v7623_v35  ;;  %2542 = vmatpush1.msra.mxu0 %v7751_v12 }
 0x459   :  { %2686 = vmatpush1.msra.mxu1 %v6524_v14  ;;  %2543 = vmatprep.subr.mxu0 %v7623_v35 }
 0x45a   :  { %2695 = vmatprep.subr.mxu1 %v7623_v35  ;;  %2547 = vmatpush1.msra.mxu0 %v7752_v20  ;;  %v2903_v20 = vand.u32 4294901760, %v7112_v37 }
 0x45b   :  { %2697 = vmatpush2.msra.mxu1 %v6536_v31  ;;  %2548 = vmatprep.subr.mxu0 %v7623_v35  ;;  %v2749_v31 = vld [vmem:[%s7482_s4 + $0x48] sm:$0xff] }
 0x45c   :  { %2698 = vmatprep.subr.mxu1 %v7623_v35  ;;  %2552 = vmatpush1.msra.mxu0 %v7753_v25  ;;  %v7126_v25 = vsub.f32 %v2745_v52, %v7114_v63 }
 0x45d   :  { %2700 = vmatpush2.msra.mxu1 %v6548_v50  ;;  %2553 = vmatprep.subr.mxu0 %v7623_v35  ;;  %v7026_v50 = vand.u32 4294901760, %v2749_v31 }
 0x45e   :  { %2701 = vmatprep.subr.mxu1 %v7623_v35  ;;  %2557 = vmatpush1.msra.mxu0 %v7754_v38  ;;  %v7129_v38 = vand.u32 4294901760, %v2744_v41 }
 0x45f   :  { %2703 = vmatpush2.msra.mxu1 %v6560_v34  ;;  %2558 = vmatprep.subr.mxu0 %v7623_v35  ;;  %v7042_v40 = vsub.f32 %v2749_v31, %v7026_v50 }
 0x460   :  { %2704 = vmatprep.subr.mxu1 %v7623_v35  ;;  %2562 = vmatpush1.msra.mxu0 %v7755_v9  ;;  %v2743_v9 = vld [vmem:[%s7482_s4 + $0x18] sm:$0xff] }
 0x461   :  { %2706 = vmatpush2.msra.mxu1 %v6572_v29  ;;  %2571 = vmatprep.subr.mxu0 %v7623_v35  ;;  %v2751_v29 = vld [vmem:[%s7482_s4 + $0x58] sm:$0xff]  ;;  %v2882_v1 = vand.u32 4294901760, %v7042_v40 }
 0x462   :  { %2707 = vmatprep.subr.mxu1 %v7623_v35  ;;  %2575 = vmatpush2.msra.mxu0 %v7756_v4  ;;  %v7016_v14 = vand.u32 4294901760, %v2751_v29 }
 0x463   :  { %2709 = vmatpush2.msra.mxu1 %v6576_v48  ;;  %2576 = vmatprep.subr.mxu0 %v7623_v35  ;;  %v7765_v48 = vand.u32 4294901760, %v7737_v21  ;;  %v2747_v21 = vld [vmem:[%s7482_s4 + $0x38] sm:$0xff] }
 0x464   :  { %2710 = vmatprep.subr.mxu1 %v7623_v35  ;;  %2580 = vmatpush2.msra.mxu0 %v7757_v28  ;;  %v7035_v34 = vsub.f32 %v2751_v29, %v7016_v14  ;;  %v7089_v42 = vand.u32 4294901760, %v2747_v21  ;;  %v2904_v28 = vsub.f32 %v7112_v37, %v2903_v20 }
 0x465   :  { %2712 = vmatpush2.msra.mxu1 %v6588_v18  ;;  %2581 = vmatprep.subr.mxu0 %v7623_v35  ;;  %v7761_v18 = vand.u32 4294901760, %v6613_v8 }
 0x466   :  { %2713 = vmatprep.subr.mxu1 %v7623_v35  ;;  %2585 = vmatpush2.msra.mxu0 %v7758_v6  ;;  %v2868_v8 = vand.u32 4294901760, %v7035_v34  ;;  %v7098_v62 = vsub.f32 %v2747_v21, %v7089_v42  ;;  %v2910_v6 = vand.u32 4294901760, %v7126_v25 }
 0x467   :  { %2715 = vmatpush2.msra.mxu1 %v6608_v51  ;;  %2586 = vmatprep.subr.mxu0 %v7623_v35  ;;  %v2861_v51 = vand.u32 4294901760, %v7032_v45 }
 0x468   :  { %2716 = vmatprep.subr.mxu1 %v7623_v35  ;;  %2590 = vmatpush2.msra.mxu0 %v7759_v30  ;;  %v2869_v2 = vsub.f32 %v7035_v34, %v2868_v8  ;;  %v2896_v3 = vand.u32 4294901760, %v7098_v62  ;;  %v7139_v30 = vand.u32 4294901760, %v2743_v9 }
 0x469   :  { %2718 = vmatpush2.msra.mxu1 %v6620_v57  ;;  %2591 = vmatprep.subr.mxu0 %v7623_v35  ;;  %v7762_v57 = vand.u32 4294901760, %v7732_v61  ;;  %v2883_v61 = vsub.f32 %v7042_v40, %v2882_v1 }
 0x46a   :  { %2719 = vmatprep.subr.mxu1 %v7623_v35  ;;  %2595 = vmatpush2.msra.mxu0 %v7760_v43  ;;  %v2870_v17 = vand.u32 4294901760, %v2869_v2  ;;  %v2897_v12 = vsub.f32 %v7098_v62, %v2896_v3  ;;  %v7143_v43 = vsub.f32 %v2744_v41, %v7129_v38 }
 0x46b   :  { %2721 = vmatpush2.msra.mxu1 %v6632_v23  ;;  %2596 = vmatprep.subr.mxu0 %v7623_v35  ;;  %v7029_v23 = vsub.f32 %v2753_v15, %v7012_v49  ;;  %v2884_v60 = vand.u32 4294901760, %v2883_v61 }
 0x46c   :  { %2722 = vmatprep.subr.mxu1 %v7623_v35  ;;  %2600 = vmatpush2.msra.mxu0 %v7761_v18  ;;  %v2898_v4 = vand.u32 4294901760, %v2897_v12  ;;  %v2742_v18 = vld [vmem:[%s7482_s4 + $0x10] sm:$0xff] }
 0x46d   :  { %2724 = vmatpush2.msra.mxu1 %v6687_v5  ;;  %2601 = vmatprep.subr.mxu0 %v7623_v35  ;;  %v2854_v19 = vand.u32 4294901760, %v7029_v23 }
 0x46e   :  { %2725 = vmatprep.subr.mxu1 %v7623_v35  ;;  %2605 = vmatpush2.msra.mxu0 %v7762_v57  ;;  %v2905_v57 = vand.u32 4294901760, %v2904_v28 }
 0x46f   :  { %2727 = vmatpush2.msra.mxu1 %v7733_v0  ;;  %2606 = vmatprep.subr.mxu0 %v7623_v35  ;;  %v2855_v5 = vsub.f32 %v7029_v23, %v2854_v19  ;;  %v2877_v0 = vand.u32 4294901760, %v2876_v32 }
 0x470   :  { %2728 = vmatprep.subr.mxu1 %v7623_v35  ;;  %2610 = vmatpush2.msra.mxu0 %v7763_v7  ;;  %v2911_v7 = vsub.f32 %v7126_v25, %v2910_v6 }
 0x471   :  { %2730 = vmatpush2.msra.mxu1 %v7735_v39  ;;  %2611 = vmatprep.subr.mxu0 %v7623_v35  ;;  %v2856_v47 = vand.u32 4294901760, %v2855_v5  ;;  %v2748_v39 = vld [vmem:[%s7482_s4 + $0x40] sm:$0xff] }
 0x472   :  { %2734 = vmatmul.mubr.f32.vlgmr.msra.gmra.mxu1 %v6733_v58  ;;  %2615 = vmatpush2.msra.mxu0 %v7764_v36  ;;  %v7081_v27 = vand.u32 4294901760, %v2748_v39  ;;  %v7153_v36 = vsub.f32 %v2743_v9, %v7139_v30  ;;  %v2912_v15 = vand.u32 4294901760, %v2911_v7  ;;  %v2740_v5 = vld [vmem:[%s7482_s4] sm:$0xff] }
 0x473   :  { %2616 = vmatprep.subr.mxu0 %v7623_v35  ;;  %4960 = vmatprep.subr.mxu1 %v7623_v35  ;;  %v1924_v9 = vld [vmem:[%s7480_s2 + $0x3] ss:$0 sm:$0xff] }
 0x474   :  { %2620 = vmatpush2.msra.mxu0 %v7765_v48  ;;  %4961 = vmatpush3.msra.mxu1 %v2856_v47  ;;  %v7087_v22 = vsub.f32 %v2748_v39, %v7081_v27  ;;  %v7155_v48 = vand.u32 4294901760, %v2742_v18  ;;  %v2924_v13 = vand.u32 4294901760, %v7153_v36 }
 0x475   :  { %2621 = vmatprep.subr.mxu0 %v7623_v35  ;;  %4962 = vmatprep.subr.mxu1 %v7623_v35 }
 0x476   :  { %2625 = vmatpush2.msra.mxu0 %v7766_v59  ;;  %v2889_v10 = vand.u32 4294901760, %v7087_v22  ;;  %v2917_v59 = vand.u32 4294901760, %v7143_v43  ;;  %v7166_v29 = vsub.f32 %v2742_v18, %v7155_v48  ;;  %4988 = vmatprep.mubr.msk.f32.mxu1 %vm5322_vm6, %v7623_v35 }
 0x477   :  { %2626 = vmatprep.subr.mxu0 %v7623_v35 }
 0x478   :  { %2630 = vmatpush2.msra.mxu0 %v7767_v44  ;;  %v2890_v11 = vsub.f32 %v7087_v22, %v2889_v10  ;;  %v2741_v44 = vld [vmem:[%s7482_s4 + $0x8] sm:$0xff]  ;;  %v2918_v31 = vsub.f32 %v7143_v43, %v2917_v59  ;;  %v2931_v2 = vand.u32 4294901760, %v7166_v29 }
 0x479   :  { %2634 = vmatmul.mubr.f32.vlgmr.msra.gmra.mxu0 %v6733_v58  ;;  %4929 = vmatprep.subr.mxu0 %v7623_v35  ;;  %v2862_v58 = vsub.f32 %v7032_v45, %v2861_v51  ;;  %v7168_v54 = vand.u32 4294901760, %v2741_v44 }
 0x47a   :  { %4930 = vmatpush3.msra.mxu0 %v7012_v49  ;;  %v2891_v46 = vand.u32 4294901760, %v2890_v11  ;;  %v2919_v32 = vand.u32 4294901760, %v2918_v31  ;;  %v2932_v61 = vsub.f32 %v7166_v29, %v2931_v2  ;;  %4957 = vmatprep.mubr.msk.f32.mxu0 %vm5322_vm6, %v7623_v35 }
 0x47b   :  { %4931 = vmatprep.subr.mxu0 %v7623_v35  ;;  %v2863_v24 = vand.u32 4294901760, %v2862_v58  ;;  %v2925_v58 = vsub.f32 %v7153_v36, %v2924_v13  ;;  %v7184_v47 = vsub.f32 %v2741_v44, %v7168_v54 }
 0x47c   :  { %4932 = vmatpush3.msra.mxu0 %v7014_v55  ;;  %v2933_v39 = vand.u32 4294901760, %v2932_v61 }
 0x47d   :  { %4933 = vmatprep.subr.mxu0 %v7623_v35  ;;  %4963 = vmatpush3.msra.mxu1 %v2863_v24  ;;  %v7186_v24 = vand.u32 4294901760, %v2740_v5 }
 0x47e   :  { %4934 = vmatpush3.msra.mxu0 %v7016_v14  ;;  %4964 = vmatprep.subr.mxu1 %v7623_v35 }
 0x47f   :  { %4935 = vmatprep.subr.mxu0 %v7623_v35  ;;  %4965 = vmatpush3.msra.mxu1 %v2870_v17  ;;  %v2926_v17 = vand.u32 4294901760, %v2925_v58 }
 0x480   :  { %4936 = vmatpush3.msra.mxu0 %v7024_v53  ;;  %4966 = vmatprep.subr.mxu1 %v7623_v35 }
 0x481   :  { %4937 = vmatprep.subr.mxu0 %v7623_v35  ;;  %4967 = vmatpush3.msra.mxu1 %v2877_v0  ;;  %v2938_v0 = vand.u32 4294901760, %v7184_v47 }
 0x482   :  { %4938 = vmatpush3.msra.mxu0 %v7026_v50  ;;  %4968 = vmatprep.subr.mxu1 %v7623_v35 }
 0x483   :  { %4939 = vmatprep.subr.mxu0 %v7623_v35  ;;  %4969 = vmatpush3.msra.mxu1 %v2884_v60  ;;  %v7196_v60 = vsub.f32 %v2740_v5, %v7186_v24  ;;  %v2939_v21 = vsub.f32 %v7184_v47, %v2938_v0 }
 0x484   :  { %4970 = vmatprep.subr.mxu1 %v7623_v35  ;;  %4940 = vmatpush3.msra.mxu0 %v7081_v27 }
 0x485   :  { %4941 = vmatprep.subr.mxu0 %v7623_v35  ;;  %4971 = vmatpush3.msra.mxu1 %v2891_v46  ;;  %v2945_v33 = vand.u32 4294901760, %v7196_v60  ;;  %v2940_v52 = vand.u32 4294901760, %v2939_v21 }
 0x486   :  { %4942 = vmatpush3.msra.mxu0 %v7089_v42  ;;  %4972 = vmatprep.subr.mxu1 %v7623_v35 }
 0x487   :  { %4943 = vmatprep.subr.mxu0 %v7623_v35  ;;  %4973 = vmatpush3.msra.mxu1 %v2898_v4  ;;  %v2946_v11 = vsub.f32 %v7196_v60, %v2945_v33 }
 0x488   :  { %4944 = vmatpush3.msra.mxu0 %v7100_v16  ;;  %4974 = vmatprep.subr.mxu1 %v7623_v35 }
 0x489   :  { %4945 = vmatprep.subr.mxu0 %v7623_v35  ;;  %4975 = vmatpush3.msra.mxu1 %v2905_v57  ;;  %v2947_v46 = vand.u32 4294901760, %v2946_v11 }
 0x48a   :  { %4946 = vmatpush3.msra.mxu0 %v7114_v63  ;;  %4976 = vmatprep.subr.mxu1 %v7623_v35 }
 0x48b   :  { %4947 = vmatprep.subr.mxu0 %v7623_v35  ;;  %4977 = vmatpush3.msra.mxu1 %v2912_v15 }
 0x48c   :  { %4948 = vmatpush3.msra.mxu0 %v7129_v38  ;;  %4978 = vmatprep.subr.mxu1 %v7623_v35 }
 0x48d   :  { %4949 = vmatprep.subr.mxu0 %v7623_v35  ;;  %4979 = vmatpush3.msra.mxu1 %v2919_v32 }
 0x48e   :  { %4950 = vmatpush3.msra.mxu0 %v7139_v30  ;;  %4980 = vmatprep.subr.mxu1 %v7623_v35 }
 0x48f   :  { %4951 = vmatprep.subr.mxu0 %v7623_v35  ;;  %4981 = vmatpush3.msra.mxu1 %v2926_v17 }
 0x490   :  { %4952 = vmatpush3.msra.mxu0 %v7155_v48  ;;  %4982 = vmatprep.subr.mxu1 %v7623_v35 }
 0x491   :  { %4953 = vmatprep.subr.mxu0 %v7623_v35  ;;  %4983 = vmatpush3.msra.mxu1 %v2933_v39 }
 0x492   :  { %4954 = vmatpush3.msra.mxu0 %v7168_v54  ;;  %4984 = vmatprep.subr.mxu1 %v7623_v35 }
 0x493   :  { %4955 = vmatprep.subr.mxu0 %v7623_v35  ;;  %4985 = vmatpush3.msra.mxu1 %v2940_v52 }
 0x494   :  { %4956 = vmatpush3.msra.mxu0 %v7186_v24  ;;  %4986 = vmatprep.subr.mxu1 %v7623_v35 }
 0x495   :  { %4991 = vmatprep.subr.mxu0 %v7623_v35  ;;  %4987 = vmatpush3.msra.mxu1 %v2947_v46 }
 0x496   :  { %5022 = vmatprep.subr.mxu1 %v7623_v35 }
 0x4bf   :  { %v2245_v41 = vpop.f32.mrf.mxu1 }
 0x4c1   :  { %v2247_v12 = vpop.f32.mrf.mxu1 }
 0x4c7   :  { %v2033_v4 = vpop.f32.mrf.mxu0 }
 0x4c8   :  { %v2034_v28 = vadd.f32 %v2033_v4, %v1924_v9 }
 0x4c9   :  { %v2035_v18 = vpop.f32.mrf.mxu0 }
 0x4ca   :  { %v2246_v57 = vadd.f32 %v2245_v41, %v2034_v28 }
 0x4f8   :  { %v2479_v7 = vpop.f32.mrf.mxu1 }
 0x4fa   :  { %v2481_v44 = vpop.f32.mrf.mxu1 }
 0x500   :  { %v2375_v15 = vpop.f32.mrf.mxu0 }
 0x501   :  { %v2376_v58 = vadd.f32 %v2375_v15, %v2246_v57 }
 0x502   :  { %v2377_v31 = vpop.f32.mrf.mxu0 }
 0x503   :  { %v2480_v17 = vadd.f32 %v2479_v7, %v2376_v58 }
 0x532   :  { %v2735_v5 = vpop.f32.mrf.mxu1 }
 0x534   :  { %v2737_v32 = vpop.f32.mrf.mxu1 }
 0x539   :  { %v2635_v61 = vpop.f32.mrf.mxu0 }
 0x53a   :  { %v2636_v39 = vadd.f32 %v2635_v61, %v2480_v17 }
 0x53b   :  { %v2637_v21 = vpop.f32.mrf.mxu0 }
 0x53c   :  { %v2736_v52 = vadd.f32 %v2735_v5, %v2636_v39 }
 0x53e   :  { %v2739_v11 = vmax.f32 %v2736_v52, 0.0  ;;  %v3376_v52 = vld [vmem:[%s7480_s2 + $0x5] ss:$0 sm:$0xff] }
 0x540   :  { %v2756_v46 = vsel %vm131_vm0, %v2739_v11, 0 }
 0x541   :  { %v7221_v12 = vand.u32 4294901760, %v2756_v46 }
 0x543   :  { %v7224_v9 = vsub.f32 %v2756_v46, %v7221_v12  ;;  %4989 = vmatmul.mubr.f32.vlgmr.msra.gmra.mxu1 %v7221_v12 }
 0x544   :  { %5023 = vmatpush3.msra.mxu1 %v7012_v49  ;;  %5050 = vmatprep.mubr.msk.f32.mxu1 %vm5322_vm6, %v7623_v35 }
 0x545   :  { %5024 = vmatprep.subr.mxu1 %v7623_v35  ;;  %v2839_v41 = vand.u32 4294901760, %v7224_v9 }
 0x546   :  { %5025 = vmatpush3.msra.mxu1 %v7014_v55 }
 0x547   :  { %5026 = vmatprep.subr.mxu1 %v7623_v35  ;;  %v2840_v4 = vsub.f32 %v7224_v9, %v2839_v41 }
 0x548   :  { %5027 = vmatpush3.msra.mxu1 %v7016_v14 }
 0x549   :  { %5028 = vmatprep.subr.mxu1 %v7623_v35  ;;  %v2841_v28 = vand.u32 4294901760, %v2840_v4 }
 0x54a   :  { %5029 = vmatpush3.msra.mxu1 %v7024_v53 }
 0x54b   :  { %5030 = vmatprep.subr.mxu1 %v7623_v35  ;;  %4958 = vmatmul.mubr.f32.vlgmr.msra.gmra.mxu0 %v2841_v28 }
 0x54c   :  { %4992 = vmatpush3.msra.mxu0 %v7029_v23  ;;  %5031 = vmatpush3.msra.mxu1 %v7026_v50 }
 0x54d   :  { %4993 = vmatprep.subr.mxu0 %v7623_v35  ;;  %5032 = vmatprep.subr.mxu1 %v7623_v35 }
 0x54e   :  { %4994 = vmatpush3.msra.mxu0 %v7032_v45  ;;  %5033 = vmatpush3.msra.mxu1 %v7081_v27 }
 0x54f   :  { %4995 = vmatprep.subr.mxu0 %v7623_v35  ;;  %5034 = vmatprep.subr.mxu1 %v7623_v35 }
 0x550   :  { %4996 = vmatpush3.msra.mxu0 %v7035_v34  ;;  %5035 = vmatpush3.msra.mxu1 %v7089_v42 }
 0x551   :  { %4997 = vmatprep.subr.mxu0 %v7623_v35  ;;  %5036 = vmatprep.subr.mxu1 %v7623_v35 }
 0x552   :  { %4998 = vmatpush3.msra.mxu0 %v7039_v56  ;;  %5037 = vmatpush3.msra.mxu1 %v7100_v16 }
 0x553   :  { %4999 = vmatprep.subr.mxu0 %v7623_v35  ;;  %5038 = vmatprep.subr.mxu1 %v7623_v35 }
 0x554   :  { %5000 = vmatpush3.msra.mxu0 %v7042_v40  ;;  %5039 = vmatpush3.msra.mxu1 %v7114_v63 }
 0x555   :  { %5001 = vmatprep.subr.mxu0 %v7623_v35  ;;  %5040 = vmatprep.subr.mxu1 %v7623_v35 }
 0x556   :  { %5002 = vmatpush3.msra.mxu0 %v7087_v22  ;;  %5041 = vmatpush3.msra.mxu1 %v7129_v38 }
 0x557   :  { %5003 = vmatprep.subr.mxu0 %v7623_v35  ;;  %5042 = vmatprep.subr.mxu1 %v7623_v35 }
 0x558   :  { %5004 = vmatpush3.msra.mxu0 %v7098_v62  ;;  %5043 = vmatpush3.msra.mxu1 %v7139_v30 }
 0x559   :  { %5005 = vmatprep.subr.mxu0 %v7623_v35  ;;  %5044 = vmatprep.subr.mxu1 %v7623_v35 }
 0x55a   :  { %5006 = vmatpush3.msra.mxu0 %v7112_v37  ;;  %5045 = vmatpush3.msra.mxu1 %v7155_v48 }
 0x55b   :  { %5007 = vmatprep.subr.mxu0 %v7623_v35  ;;  %5046 = vmatprep.subr.mxu1 %v7623_v35 }
 0x55c   :  { %5008 = vmatpush3.msra.mxu0 %v7126_v25  ;;  %5047 = vmatpush3.msra.mxu1 %v7168_v54 }
 0x55d   :  { %5009 = vmatprep.subr.mxu0 %v7623_v35  ;;  %5048 = vmatprep.subr.mxu1 %v7623_v35 }
 0x55e   :  { %5010 = vmatpush3.msra.mxu0 %v7143_v43  ;;  %5049 = vmatpush3.msra.mxu1 %v7186_v24 }
 0x55f   :  { %5011 = vmatprep.subr.mxu0 %v7623_v35  ;;  %5051 = vmatmul.mubr.f32.vlgmr.msra.gmra.mxu1 %v2839_v41 }
 0x560   :  { %5084 = vmatprep.subr.mxu1 %v7623_v35  ;;  %5012 = vmatpush3.msra.mxu0 %v7153_v36 }
 0x561   :  { %5085 = vmatpush3.msra.mxu1 %v7012_v49  ;;  %5013 = vmatprep.subr.mxu0 %v7623_v35  ;;  %v3375_v49 = vld [vmem:[%s7483_s5 + $0x8] sm:$0x3f] }
 0x562   :  { %5086 = vmatprep.subr.mxu1 %v7623_v35  ;;  %5014 = vmatpush3.msra.mxu0 %v7166_v29 }
 0x563   :  { %5087 = vmatpush3.msra.mxu1 %v7014_v55  ;;  %5015 = vmatprep.subr.mxu0 %v7623_v35  ;;  %v3383_v55 = vsel %vm3381_vm7, %v3375_v49, 0 }
 0x564   :  { %5088 = vmatprep.subr.mxu1 %v7623_v35  ;;  %5016 = vmatpush3.msra.mxu0 %v7184_v47 }
 0x565   :  { %5089 = vmatpush3.msra.mxu1 %v7016_v14  ;;  %5017 = vmatprep.subr.mxu0 %v7623_v35  ;;  %v3414_v14 = vand.u32 4294901760, %v3383_v55 }
 0x566   :  { %5090 = vmatprep.subr.mxu1 %v7623_v35  ;;  %5018 = vmatpush3.msra.mxu0 %v7196_v60 }
 0x567   :  { %5019 = vmatprep.mubr.msk.f32.mxu0 %vm5322_vm6, %v7623_v35  ;;  %5091 = vmatpush3.msra.mxu1 %v7024_v53  ;;  %v3374_v53 = vld [vmem:[%s7483_s5] sm:$0xff] }
 0x568   :  { %5020 = vmatmul.mubr.f32.vlgmr.msra.gmra.mxu0 %v7224_v9  ;;  %5053 = vmatprep.subr.mxu0 %v7623_v35  ;;  %v3417_v23 = vand.u32 4294901760, %v3374_v53 }
 0x569   :  { %5092 = vmatprep.subr.mxu1 %v7623_v35  ;;  %5054 = vmatpush3.msra.mxu0 %v2854_v19 }
 0x56a   :  { %5093 = vmatpush3.msra.mxu1 %v7026_v50  ;;  %5055 = vmatprep.subr.mxu0 %v7623_v35  ;;  %v7376_v50 = vsub.f32 %v3383_v55, %v3414_v14  ;;  %v7380_v34 = vsub.f32 %v3374_v53, %v3417_v23 }
 0x56b   :  { %5094 = vmatprep.subr.mxu1 %v7623_v35  ;;  %5056 = vmatpush3.msra.mxu0 %v2861_v51 }
 0x56c   :  { %5095 = vmatpush3.msra.mxu1 %v7081_v27  ;;  %5057 = vmatprep.subr.mxu0 %v7623_v35  ;;  %v3493_v45 = vand.u32 4294901760, %v7376_v50  ;;  %v3500_v40 = vand.u32 4294901760, %v7380_v34 }
 0x56d   :  { %5096 = vmatprep.subr.mxu1 %v7623_v35  ;;  %5058 = vmatpush3.msra.mxu0 %v2868_v8 }
 0x56e   :  { %5097 = vmatpush3.msra.mxu1 %v7089_v42  ;;  %5059 = vmatprep.subr.mxu0 %v7623_v35  ;;  %v3494_v56 = vsub.f32 %v7376_v50, %v3493_v45  ;;  %v3501_v51 = vsub.f32 %v7380_v34, %v3500_v40 }
 0x56f   :  { %5098 = vmatprep.subr.mxu1 %v7623_v35  ;;  %5060 = vmatpush3.msra.mxu0 %v2875_v26 }
 0x570   :  { %5099 = vmatpush3.msra.mxu1 %v7100_v16  ;;  %5061 = vmatprep.subr.mxu0 %v7623_v35  ;;  %v3495_v19 = vand.u32 4294901760, %v3494_v56  ;;  %v3502_v8 = vand.u32 4294901760, %v3501_v51 }
 0x571   :  { %5100 = vmatprep.subr.mxu1 %v7623_v35  ;;  %5062 = vmatpush3.msra.mxu0 %v2882_v1 }
 0x572   :  { %5101 = vmatpush3.msra.mxu1 %v7114_v63  ;;  %5063 = vmatprep.subr.mxu0 %v7623_v35 }
 0x573   :  { %5102 = vmatprep.subr.mxu1 %v7623_v35  ;;  %5064 = vmatpush3.msra.mxu0 %v2889_v10 }
 0x574   :  { %5103 = vmatpush3.msra.mxu1 %v7129_v38  ;;  %5065 = vmatprep.subr.mxu0 %v7623_v35 }
 0x575   :  { %5104 = vmatprep.subr.mxu1 %v7623_v35  ;;  %5066 = vmatpush3.msra.mxu0 %v2896_v3  ;;  %v2754_v3 = vld [vmem:[%s7480_s2 + $0x4] ss:$0 sm:$0xff] }
 0x576   :  { %5105 = vmatpush3.msra.mxu1 %v7139_v30  ;;  %5067 = vmatprep.subr.mxu0 %v7623_v35 }
 0x577   :  { %5106 = vmatprep.subr.mxu1 %v7623_v35  ;;  %5068 = vmatpush3.msra.mxu0 %v2903_v20 }
 0x578   :  { %5107 = vmatpush3.msra.mxu1 %v7155_v48  ;;  %5069 = vmatprep.subr.mxu0 %v7623_v35 }
 0x579   :  { %5108 = vmatprep.subr.mxu1 %v7623_v35  ;;  %5070 = vmatpush3.msra.mxu0 %v2910_v6 }
 0x57a   :  { %5109 = vmatpush3.msra.mxu1 %v7168_v54  ;;  %5071 = vmatprep.subr.mxu0 %v7623_v35 }
 0x57b   :  { %5110 = vmatprep.subr.mxu1 %v7623_v35  ;;  %5072 = vmatpush3.msra.mxu0 %v2917_v59 }
 0x57c   :  { %5111 = vmatpush3.msra.mxu1 %v7186_v24  ;;  %5112 = vmatprep.mubr.msk.f32.mxu1 %vm5322_vm6, %v7623_v35 }
 0x57d   :  { %5073 = vmatprep.subr.mxu0 %v7623_v35  ;;  %5113 = vmatmul.mubr.f32.vlgmr.msra.gmra.mxu1 %v7221_v12 }
 0x57e   :  { %5074 = vmatpush3.msra.mxu0 %v2924_v13  ;;  %5081 = vmatprep.mubr.msk.f32.mxu0 %vm5322_vm6, %v7623_v35 }
 0x57f   :  { %5075 = vmatprep.subr.mxu0 %v7623_v35  ;;  %5122 = vmatprep.subr.mxu1 %v7623_v35 }
 0x580   :  { %5076 = vmatpush3.msra.mxu0 %v2931_v2  ;;  %5126 = vmatprep.mubr.msk.f32.mxu1 %vm5322_vm6, %v7623_v35 }
 0x581   :  { %5077 = vmatprep.subr.mxu0 %v7623_v35  ;;  %5123 = vmatpush3.msra.mxu1 %v3495_v19 }
 0x582   :  { %5078 = vmatpush3.msra.mxu0 %v2938_v0  ;;  %5124 = vmatprep.subr.mxu1 %v7623_v35  ;;  %v3846_v0 = vld [vmem:[%s7483_s5 + $0x18] sm:$0xff] }
 0x583   :  { %5079 = vmatprep.subr.mxu0 %v7623_v35  ;;  %5125 = vmatpush3.msra.mxu1 %v3502_v8  ;;  %v3880_v60 = vand.u32 4294901760, %v3846_v0 }
 0x584   :  { %5080 = vmatpush3.msra.mxu0 %v2945_v33  ;;  %5136 = vmatprep.subr.mxu1 %v7623_v35  ;;  %v3845_v33 = vld [vmem:[%s7483_s5 + $0x10] sm:$0xff] }
 0x585   :  { %5082 = vmatmul.mubr.f32.vlgmr.msra.gmra.mxu0 %v7221_v12  ;;  %5115 = vmatprep.subr.mxu0 %v7623_v35  ;;  %v7419_v18 = vsub.f32 %v3846_v0, %v3880_v60  ;;  %v3883_v57 = vand.u32 4294901760, %v3845_v33 }
 0x586   :  { %5119 = vmatprep.mubr.msk.f32.mxu0 %vm5322_vm6, %v7623_v35  ;;  %5116 = vmatpush3.msra.mxu0 %v3414_v14 }
 0x587   :  { %5117 = vmatprep.subr.mxu0 %v7623_v35  ;;  %v3959_v7 = vand.u32 4294901760, %v7419_v18  ;;  %v3965_v44 = vsub.f32 %v3845_v33, %v3883_v57 }
 0x588   :  { %5118 = vmatpush3.msra.mxu0 %v3417_v23 }
 0x589   :  { %5129 = vmatprep.subr.mxu0 %v7623_v35  ;;  %v3960_v15 = vsub.f32 %v7419_v18, %v3959_v7  ;;  %v3966_v31 = vand.u32 4294901760, %v3965_v44 }
 0x58b   :  { %v3961_v5 = vand.u32 4294901760, %v3960_v15  ;;  %v3967_v58 = vsub.f32 %v3965_v44, %v3966_v31 }
 0x58d   :  { %v3968_v32 = vand.u32 4294901760, %v3967_v58 }
 0x603   :  { %v2984_v26 = vpop.f32.mrf.mxu1 }
 0x605   :  { %v4990_v1 = vpop.f32.mrf.mxu1 }
 0x606   :  { %v4312_v1 = vld [vmem:[%s7480_s2 + $0x7] ss:$0 sm:$0xff] }
 0x60b   :  { %v2843_v27 = vpop.f32.mrf.mxu0 }
 0x60c   :  { %v2844_v37 = vadd.f32 %v2843_v27, %v2754_v3  ;;  %v5323_v27 = vmov 0   ;;  %v3847_v3 = vld [vmem:[%s7480_s2 + $0x6] ss:$0 sm:$0xff]  ;;  %s5324_s2 = smov [#allocation7]  }
 0x60d   :  { %v4959_v22 = vpop.f32.mrf.mxu0  ;;  %5243 = vset.pattern.permute.xlu1 %v5323_v27  ;;  %5244 = vset.pattern.permute.xlu0 %v5323_v27 }
 0x60e   :  { %v2985_v20 = vadd.f32 %v2984_v26, %v2844_v37  ;;  %4315 = vperm.xlu1 %5243, %v4312_v1  }
 0x61f   :  { %v3171_v42 = vpop.f32.mrf.mxu1 }
 0x621   :  { %v5052_v10 = vpop.f32.mrf.mxu1 }
 0x622   :  { %v4311_v10 = vld [vmem:[%s7483_s5 + $0x20] sm:$0x1]  ;;  %s4779_s5 = sshll.u32 %s5324_s2, 4  ;;  %s4780_s5 = int_to_ptr.vmem [resolvable:$true] %s4779_s5 }
 0x623   :  { %v4320_v37 = vsel %vm4318_vm9, %v4311_v10, 0  ;;  %s5285_s13 = scalar_lea.vmem %s4780_s5, 16  ;;  %s5289_s14 = scalar_lea.vmem %s4780_s5, 32 }
 0x624   :  { %p5286_p10 = scmp.ne.s32.totalorder %s4780_s5, %s5285_s13  ;;  %p5290_p11 = scmp.lt.s32.totalorder %s4780_s5, %s4780_s5 }
 0x625   :  { %p5291_p12 = scmp.lt.s32.totalorder %s5289_s14, %s5285_s13 }
 0x627   :  { %p5292_p13 = por %p5291_p12, %p5290_p11 }
 0x628   :  { %v3084_v62 = vpop.f32.mrf.mxu0 }
 0x629   :  { %v3085_v38 = vadd.f32 %v3084_v62, %v2985_v20  ;;  %p5293_p0 = pnand %p5292_p13, %p5286_p10 }
 0x62a   :  { %v5021_v16 = vpop.f32.mrf.mxu0 }
 0x62b   :  { %v3172_v6 = vadd.f32 %v3171_v42, %v3085_v38  ;;  %v4391_v38 = vand.u32 4294901760, %v4320_v37 }
 0x63d   :  { %v3369_v63 = vpop.f32.mrf.mxu1 }
 0x63f   :  { %v5114_v25 = vpop.f32.mrf.mxu1 }
 0x645   :  { %v3284_v30 = vpop.f32.mrf.mxu0 }
 0x646   :  { %v3285_v43 = vadd.f32 %v3284_v30, %v3172_v6 }
 0x647   :  { %v5083_v36 = vpop.f32.mrf.mxu0 }
 0x648   :  { %v3370_v48 = vadd.f32 %v3369_v63, %v3285_v43 }
 0x64a   :  { %v3373_v59 = vmax.f32 %v3370_v48, 0.0 }
 0x64c   :  { %v3379_v13 = vsel %vm3377_vm8, %v3373_v59, 0  ;;  %v4392_v59 = vsub.f32 %v4320_v37, %v4391_v38 }
 0x64d   :  { %v3452_v29 = vand.u32 4294901760, %v3379_v13 }
 0x64f   :  { %v3453_v54 = vsub.f32 %v3379_v13, %v3452_v29  ;;  %5127 = vmatmul.mubr.f32.vlgmr.msra.gmra.mxu1 %v3452_v29 }
 0x650   :  { %5137 = vmatpush3.msra.mxu1 %v3414_v14  ;;  %5140 = vmatprep.mubr.msk.f32.mxu1 %vm5322_vm6, %v7623_v35 }
 0x651   :  { %5138 = vmatprep.subr.mxu1 %v7623_v35  ;;  %v3454_v2 = vand.u32 4294901760, %v3453_v54 }
 0x652   :  { %5139 = vmatpush3.msra.mxu1 %v3417_v23 }
 0x653   :  { %5141 = vmatmul.mubr.f32.vlgmr.msra.gmra.mxu1 %v3454_v2  ;;  %5150 = vmatprep.subr.mxu1 %v7623_v35  ;;  %v3455_v47 = vsub.f32 %v3453_v54, %v3454_v2 }
 0x654   :  { %5151 = vmatpush3.msra.mxu1 %v3414_v14  ;;  %5154 = vmatprep.mubr.msk.f32.mxu1 %vm5322_vm6, %v7623_v35 }
 0x655   :  { %5152 = vmatprep.subr.mxu1 %v7623_v35  ;;  %v3456_v24 = vand.u32 4294901760, %v3455_v47  ;;  %v4393_v47 = vand.u32 4294901760, %v4392_v59 }
 0x656   :  { %5153 = vmatpush3.msra.mxu1 %v3417_v23 }
 0x657   :  { %5120 = vmatmul.mubr.f32.vlgmr.msra.gmra.mxu0 %v3456_v24  ;;  %5155 = vmatmul.mubr.f32.vlgmr.msra.gmra.mxu1 %v3452_v29  ;;  %v4394_v33 = vsub.f32 %v4392_v59, %v4393_v47 }
 0x658   :  { %5130 = vmatpush3.msra.mxu0 %v7376_v50  ;;  %5133 = vmatprep.mubr.msk.f32.mxu0 %vm5322_vm6, %v7623_v35 }
 0x659   :  { %5131 = vmatprep.subr.mxu0 %v7623_v35  ;;  %5164 = vmatprep.subr.mxu1 %v7623_v35 }
 0x65a   :  { %5132 = vmatpush3.msra.mxu0 %v7380_v34  ;;  %5168 = vmatprep.mubr.msk.f32.mxu1 %vm5322_vm6, %v7623_v35 }
 0x65b   :  { %5134 = vmatmul.mubr.f32.vlgmr.msra.gmra.mxu0 %v3453_v54  ;;  %5143 = vmatprep.subr.mxu0 %v7623_v35 }
 0x65c   :  { %5144 = vmatpush3.msra.mxu0 %v3493_v45  ;;  %5147 = vmatprep.mubr.msk.f32.mxu0 %vm5322_vm6, %v7623_v35 }
 0x65d   :  { %5145 = vmatprep.subr.mxu0 %v7623_v35  ;;  %5165 = vmatpush3.msra.mxu1 %v3961_v5 }
 0x65e   :  { %5146 = vmatpush3.msra.mxu0 %v3500_v40  ;;  %5166 = vmatprep.subr.mxu1 %v7623_v35 }
 0x65f   :  { %5148 = vmatmul.mubr.f32.vlgmr.msra.gmra.mxu0 %v3452_v29  ;;  %5157 = vmatprep.subr.mxu0 %v7623_v35 }
 0x660   :  { %5161 = vmatprep.mubr.msk.f32.mxu0 %vm5322_vm6, %v7623_v35  ;;  %5158 = vmatpush3.msra.mxu0 %v3880_v60 }
 0x661   :  { %5159 = vmatprep.subr.mxu0 %v7623_v35  ;;  %5167 = vmatpush3.msra.mxu1 %v3968_v32 }
 0x662   :  { %5160 = vmatpush3.msra.mxu0 %v3883_v57  ;;  %5178 = vmatprep.subr.mxu1 %v7623_v35 }
 0x663   :  { %5171 = vmatprep.subr.mxu0 %v7623_v35 }
 0x70f   :  { %v3539_v17 = vpop.f32.mrf.mxu1 }
 0x711   :  { %v5128_v61 = vpop.f32.mrf.mxu1 }
 0x713   :  { %v3690_v39 = vpop.f32.mrf.mxu1 }
 0x715   :  { %v5142_v21 = vpop.f32.mrf.mxu1 }
 0x717   :  { %v3458_v11 = vpop.f32.mrf.mxu0  ;;  %v3840_v46 = vpop.f32.mrf.mxu1 }
 0x718   :  { %v3459_v12 = vadd.f32 %v3458_v11, %v3376_v52 }
 0x719   :  { %v5121_v9 = vpop.f32.mrf.mxu0  ;;  %v5156_v41 = vpop.f32.mrf.mxu1 }
 0x71a   :  { %v3540_v4 = vadd.f32 %v3539_v17, %v3459_v12  ;;  %v4316_v17 = vpop.permute.xlu1 %4315 }
 0x71b   :  { %v3615_v28 = vpop.f32.mrf.mxu0 }
 0x71c   :  { %v3616_v49 = vadd.f32 %v3615_v28, %v3540_v4 }
 0x71d   :  { %v5135_v55 = vpop.f32.mrf.mxu0 }
 0x71e   :  { %v3691_v14 = vadd.f32 %v3690_v39, %v3616_v49 }
 0x71f   :  { %v3767_v53 = vpop.f32.mrf.mxu0 }
 0x720   :  { %v3768_v50 = vadd.f32 %v3767_v53, %v3691_v14 }
 0x721   :  { %v5149_v23 = vpop.f32.mrf.mxu0 }
 0x722   :  { %v3841_v45 = vadd.f32 %v3840_v46, %v3768_v50 }
 0x724   :  { %v3844_v34 = vmax.f32 %v3841_v45, 0.0 }
 0x726   :  { %v3849_v56 = vsel %vm1878_vm4, %v3844_v34, 0 }
 0x727   :  { %v3918_v40 = vand.u32 4294901760, %v3849_v56 }
 0x729   :  { %v3919_v19 = vsub.f32 %v3849_v56, %v3918_v40  ;;  %5169 = vmatmul.mubr.f32.vlgmr.msra.gmra.mxu1 %v3918_v40 }
 0x72a   :  { %5179 = vmatpush3.msra.mxu1 %v3880_v60  ;;  %5182 = vmatprep.mubr.msk.f32.mxu1 %vm5322_vm6, %v7623_v35 }
 0x72b   :  { %5180 = vmatprep.subr.mxu1 %v7623_v35  ;;  %v3920_v51 = vand.u32 4294901760, %v3919_v19 }
 0x72c   :  { %5181 = vmatpush3.msra.mxu1 %v3883_v57 }
 0x72d   :  { %5183 = vmatmul.mubr.f32.vlgmr.msra.gmra.mxu1 %v3920_v51  ;;  %5192 = vmatprep.subr.mxu1 %v7623_v35  ;;  %v3921_v8 = vsub.f32 %v3919_v19, %v3920_v51 }
 0x72e   :  { %5193 = vmatpush3.msra.mxu1 %v3880_v60  ;;  %5196 = vmatprep.mubr.msk.f32.mxu1 %vm5322_vm6, %v7623_v35 }
 0x72f   :  { %5194 = vmatprep.subr.mxu1 %v7623_v35  ;;  %v3922_v26 = vand.u32 4294901760, %v3921_v8 }
 0x730   :  { %5195 = vmatpush3.msra.mxu1 %v3883_v57 }
 0x731   :  { %5162 = vmatmul.mubr.f32.vlgmr.msra.gmra.mxu0 %v3922_v26  ;;  %5197 = vmatmul.mubr.f32.vlgmr.msra.gmra.mxu1 %v3918_v40 }
 0x732   :  { %5172 = vmatpush3.msra.mxu0 %v7419_v18  ;;  %5175 = vmatprep.mubr.msk.f32.mxu0 %vm5322_vm6, %v7623_v35 }
 0x733   :  { %5173 = vmatprep.subr.mxu0 %v7623_v35  ;;  %5204 = vmatprep.subr.mxu1 %v7623_v35 }
 0x734   :  { %5174 = vmatpush3.msra.mxu0 %v3965_v44  ;;  %5206 = vmatprep.mubr.msk.f32.mxu1 %vm5322_vm6, %v7623_v35 }
 0x735   :  { %5176 = vmatmul.mubr.f32.vlgmr.msra.gmra.mxu0 %v3919_v19  ;;  %5185 = vmatprep.subr.mxu0 %v7623_v35 }
 0x736   :  { %5186 = vmatpush3.msra.mxu0 %v3959_v7  ;;  %5189 = vmatprep.mubr.msk.f32.mxu0 %vm5322_vm6, %v7623_v35  ;;  %v4395_v7 = vand.u32 4294901760, %v4394_v33 }
 0x737   :  { %5187 = vmatprep.subr.mxu0 %v7623_v35 }
 0x738   :  { %5188 = vmatpush3.msra.mxu0 %v3966_v31 }
 0x739   :  { %5190 = vmatmul.mubr.f32.vlgmr.msra.gmra.mxu0 %v3918_v40  ;;  %5199 = vmatprep.subr.mxu0 %v7623_v35 }
 0x73a   :  { %5201 = vmatprep.mubr.msk.f32.mxu0 %vm5322_vm6, %v7623_v35 }
 0x7e9   :  { %v4005_v22 = vpop.f32.mrf.mxu1 }
 0x7eb   :  { %v5170_v42 = vpop.f32.mrf.mxu1 }
 0x7ed   :  { %v4156_v62 = vpop.f32.mrf.mxu1 }
 0x7ef   :  { %v5184_v16 = vpop.f32.mrf.mxu1 }
 0x7f1   :  { %v3924_v63 = vpop.f32.mrf.mxu0  ;;  %v4306_v20 = vpop.f32.mrf.mxu1 }
 0x7f2   :  { %v3925_v25 = vadd.f32 %v3924_v63, %v3847_v3 }
 0x7f3   :  { %v5163_v6 = vpop.f32.mrf.mxu0  ;;  %v5198_v30 = vpop.f32.mrf.mxu1 }
 0x7f4   :  { %v4006_v43 = vadd.f32 %v4005_v22, %v3925_v25 }
 0x7f5   :  { %v4081_v36 = vpop.f32.mrf.mxu0 }
 0x7f6   :  { %v4082_v48 = vadd.f32 %v4081_v36, %v4006_v43 }
 0x7f7   :  { %v5177_v13 = vpop.f32.mrf.mxu0 }
 0x7f8   :  { %v4157_v29 = vadd.f32 %v4156_v62, %v4082_v48 }
 0x7f9   :  { %v4233_v54 = vpop.f32.mrf.mxu0 }
 0x7fa   :  { %v4234_v2 = vadd.f32 %v4233_v54, %v4157_v29 }
 0x7fb   :  { %v5191_v24 = vpop.f32.mrf.mxu0 }
 0x7fc   :  { %v4307_v0 = vadd.f32 %v4306_v20, %v4234_v2 }
 0x7fe   :  { %v4310_v60 = vmax.f32 %v4307_v0, 0.0 }
 0x800   :  { %v4323_v18 = vsel %vm4318_vm9, %v4310_v60, 0 }
 0x801   :  { %v4356_v57 = vand.u32 4294901760, %v4323_v18 }
 0x803   :  { %v4433_v44 = vsub.f32 %v4323_v18, %v4356_v57  ;;  %5200 = vmatpush3.xpose.msra.mxu0 %v4356_v57 }
 0x804   :  { %5209 = vmatprep.subr.mxu0 %v7623_v35 }
 0x805   :  { %v4434_v15 = vand.u32 4294901760, %v4433_v44 }
 0x806   :  { %5202 = vmatmul.mubr.f32.vlgmr.msra.gmra.mxu0 %v4395_v7 }
 0x807   :  { %5210 = vmatpush3.xpose.msra.mxu0 %v4433_v44  ;;  %5211 = vmatprep.mubr.msk.f32.mxu0 %vm5322_vm6, %v7623_v35  ;;  %v4435_v31 = vsub.f32 %v4433_v44, %v4434_v15 }
 0x808   :  { %5219 = vmatprep.subr.mxu0 %v7623_v35 }
 0x809   :  { %v4436_v5 = vand.u32 4294901760, %v4435_v31 }
 0x80a   :  { %5212 = vmatmul.mubr.f32.vlgmr.msra.gmra.mxu0 %v4392_v59 }
 0x80b   :  { %5205 = vmatpush3.xpose.msra.mxu1 %v4436_v5  ;;  %5220 = vmatpush3.xpose.msra.mxu0 %v4434_v15 }
 0x80c   :  { %5214 = vmatprep.subr.mxu1 %v7623_v35  ;;  %5221 = vmatprep.mubr.msk.f32.mxu0 %vm5322_vm6, %v7623_v35 }
 0x80e   :  { %5207 = vmatmul.mubr.f32.vlgmr.msra.gmra.mxu1 %v4391_v38  ;;  %5222 = vmatmul.mubr.f32.vlgmr.msra.gmra.mxu0 %v4391_v38 }
 0x80f   :  { %5215 = vmatpush3.xpose.msra.mxu1 %v4356_v57  ;;  %5216 = vmatprep.mubr.msk.f32.mxu1 %vm5322_vm6, %v7623_v35 }
 0x810   :  { %5224 = vmatprep.subr.mxu1 %v7623_v35 }
 0x812   :  { %5217 = vmatmul.mubr.f32.vlgmr.msra.gmra.mxu1 %v4393_v47 }
 0x813   :  { %5225 = vmatpush3.xpose.msra.mxu1 %v4356_v57  ;;  %5226 = vmatprep.mubr.msk.f32.mxu1 %vm5322_vm6, %v7623_v35 }
 0x816   :  { %5227 = vmatmul.mubr.f32.vlgmr.msra.gmra.mxu1 %v4391_v38 }
 0x8c6   :  { %v4397_v58 = vpop.f32.mrf.mxu0 }
 0x8c7   :  { %v4398_v39 = vadd.f32 %v4397_v58, %v4316_v17 }
 0x8c8   :  { %v5203_v32 = vpop.f32.mrf.mxu0 }
 0x8ca   :  { %v4547_v61 = vpop.f32.mrf.mxu0 }
 0x8cc   :  { %v5213_v21 = vpop.f32.mrf.mxu0 }
 0x8ce   :  { %v4473_v52 = vpop.f32.mrf.mxu1  ;;  %v4695_v11 = vpop.f32.mrf.mxu0 }
 0x8cf   :  { %v4474_v46 = vadd.f32 %v4473_v52, %v4398_v39 }
 0x8d0   :  { %v5208_v12 = vpop.f32.mrf.mxu1  ;;  %v5223_v9 = vpop.f32.mrf.mxu0 }
 0x8d1   :  { %v4548_v41 = vadd.f32 %v4547_v61, %v4474_v46 }
 0x8d2   :  { %v4621_v4 = vpop.f32.mrf.mxu1 }
 0x8d3   :  { %v4622_v28 = vadd.f32 %v4621_v4, %v4548_v41 }
 0x8d4   :  { %v5218_v49 = vpop.f32.mrf.mxu1 }
 0x8d5   :  { %v4696_v55 = vadd.f32 %v4695_v11, %v4622_v28 }
 0x8d6   :  { %v4767_v35 = vpop.f32.mrf.mxu1 }
 0x8d7   :  { %v4768_v14 = vadd.f32 %v4767_v35, %v4696_v55 }
 0x8d8   :  { %v5228_v53 = vpop.f32.mrf.mxu1 }
 0x8d9   :  { %4772 = vst.msk [vmem:[#allocation7] sm:$0x1] %vm4771_vm10, %v4768_v14 }
 0x8da   :  { %5296 = shalt.err (!%p5293_p0)
}
 0x8db   :  { %4782 = dma.vmem_to_hbm [thread:$0]  %s4780_s5, 16, %s7484_s6, [#allocation4]  }
 0x8dc   :  { %5309 = dma.done.wait [#allocation4], 16  }
 0x8dd   :  { %5310 = vsyncadd [#allocation4], 4294967280 }
 0x8de   :  { %4786 = vsyncpa [#allocation3], 1 }
 0x8df   :  { %4787 = vsyncpa [#allocation6], 1 }
 0x8e0   :  { %4788 = vsyncpa [#allocation4], 1 }

</bundles_post_ra>
